<compile_context>
chip_gen: v5e
topology: v5e:2x2
jax: 0.10.0
libtpu: 0.0.40
codegen_flags: <defaults>
</compile_context>

<pallas_src>
import jax
import jax.numpy as jnp
from jax.experimental import pallas as pl
from jax.experimental.pallas import tpu as pltpu

# ----------------------------- config (small) -------------------------------
BATCH = 2
WAVE_LEN = 512
# (out_channels, kernel, stride) -- stride == kernel so T = 512 / 64 = 8
CONV_LAYERS = [(32, 8, 8), (64, 4, 4), (128, 2, 2)]
HIDDEN = 128
NUM_HEADS = 4
HEAD_DIM = HIDDEN // NUM_HEADS
INTERMEDIATE = 256
NUM_ENC_LAYERS = 2
LN_EPS = 1e-5

# ----------------------------- derived sizes --------------------------------
for _c, _k, _s in CONV_LAYERS:
    assert _k == _s, "front-end assumes stride == kernel (non-overlapping)"
C0, K0, _ = CONV_LAYERS[0]
C1, K1, _ = CONV_LAYERS[1]
C2, K2, _ = CONV_LAYERS[2]
C_PAD = 128                      # conv channels padded to the 128-lane width
T0 = WAVE_LEN // K0              # 64 frames after conv0
T1 = T0 // K1                    # 16 frames after conv1
T2 = T1 // K2                    # 8 frames after conv2
SEQ = T2                         # encoder sequence length per batch element
M_ENC = BATCH * SEQ              # batch folded into the matmul M dimension (16)
assert C2 == HIDDEN == C_PAD


# ----------------------------- in-kernel math helpers ------------------------
def _gelu(x):
    # TODO(synk): HF HuBERT uses erf-GELU; tanh approximation used here.
    c = 0.7978845608028654
    return 0.5 * x * (1.0 + jnp.tanh(c * (x + 0.044715 * x * x * x)))


def _ln_f32(x, g, b):
    mu = jnp.mean(x, axis=-1, keepdims=True)
    var = jnp.mean(jnp.square(x - mu), axis=-1, keepdims=True)
    return (x - mu) * jax.lax.rsqrt(var + LN_EPS) * g + b


# ----------------------------- fused forward kernel --------------------------
def _fused_kernel(p0_ref, w0_ref, s1_ref, w1t_ref, s2_ref, w2t_ref, fpw_ref,
                  fe_ref, hmask_ref, amask_ref, poolm_ref,
                  wqkv_ref, bqkv_ref, wo_ref, w1e_ref, b1e_ref, w2e_ref, ev_ref,
                  pool_ref, acc_ref):
    l = pl.program_id(0)                         # layer index ("arbitrary" axis)

    # ---------------- conv front-end prologue (only on the first layer step) ----------
    @pl.when(l == 0)
    def _frontend():
        fe = fe_ref[...]                          # (8, 128) packed f32 slab
        gn_g, gn_b = fe[0:1, :], fe[1:2, :]
        fp_ln_g, fp_ln_b, fp_b = fe[2:3, :], fe[3:4, :], fe[4:5, :]
        enc_ln_g, enc_ln_b = fe[5:6, :], fe[6:7, :]

        # conv0 (kernel=stride=8, Cin=1): lane-padded im2col patches (bf16) x bf16 weight.
        c0 = jnp.dot(p0_ref[...], w0_ref[...],
                     preferred_element_type=jnp.float32)          # (B*T0, 128) f32

        # GroupNorm(num_groups == num_channels): per-(batch, channel) stats over time.
        # Layout-safe leading-dim split (T0 = 64 is 8-sublane aligned).
        c0b = c0.reshape(BATCH, T0, C_PAD)
        mu = jnp.mean(c0b, axis=1, keepdims=True)
        var = jnp.mean(jnp.square(c0b - mu), axis=1, keepdims=True)
        c0 = ((c0b - mu) * jax.lax.rsqrt(var + LN_EPS)).reshape(BATCH * T0, C_PAD)
        c0 = _gelu(c0 * gn_g + gn_b)

        # conv1 (kernel=stride=4): sum-of-matmuls with precomputed selection matrices
        # (no wide concatenated intermediates, all MXU operands bf16).
        c0h = c0.astype(jnp.bfloat16)
        s1 = s1_ref[...]                          # (K1, B*T1, B*T0) bf16 constants
        w1t = w1t_ref[...]                        # (K1, 128, 128) bf16
        a1 = jnp.zeros((BATCH * T1, C_PAD), jnp.float32)
        for kk in range(K1):
            g = jnp.dot(s1[kk], c0h, preferred_element_type=jnp.float32)
            a1 = a1 + jnp.dot(g.astype(jnp.bfloat16), w1t[kk],
                              preferred_element_type=jnp.float32)
        c1 = _gelu(a1)                            # (B*T1, 128)

        # conv2 (kernel=stride=2)
        c1h = c1.astype(jnp.bfloat16)
        s2 = s2_ref[...]                          # (K2, B*T2, B*T1) bf16
        w2t = w2t_ref[...]                        # (K2, 128, 128) bf16
        a2 = jnp.zeros((BATCH * T2, C_PAD), jnp.float32)
        for kk in range(K2):
            g = jnp.dot(s2[kk], c1h, preferred_element_type=jnp.float32)
            a2 = a2 + jnp.dot(g.astype(jnp.bfloat16), w2t[kk],
                              preferred_element_type=jnp.float32)
        c2 = _gelu(a2)                            # (B*T2, 128) == (M_ENC, HIDDEN)

        # feature projection: LayerNorm -> Linear -> (dropout no-op) -> encoder LN
        x = _ln_f32(c2, fp_ln_g, fp_ln_b)
        x = jnp.dot(x.astype(jnp.bfloat16), fpw_ref[...],
                    preferred_element_type=jnp.float32) + fp_b
        # TODO(synk): HF HuBERT's grouped positional Conv1d (kernel=128, groups=16)
        # before the encoder is omitted in this synthetic re-implementation.
        x = _ln_f32(x, enc_ln_g, enc_ln_b)
        acc_ref[...] = x                          # (M_ENC, HIDDEN), layer-resident

    # ---------------- transformer encoder layer (batch folded into M) -----------------
    x = acc_ref[...]                              # (M_ENC, HIDDEN) f32
    ev = ev_ref[0]                                # (8, HIDDEN) packed f32 slab
    bo, ln1_g, ln1_b = ev[0:1, :], ev[1:2, :], ev[2:3, :]
    b2, ln2_g, ln2_b = ev[3:4, :], ev[4:5, :], ev[5:6, :]

    # merged QKV projection: one bf16 MXU pass, f32 accumulation
    qkv = jnp.dot(x.astype(jnp.bfloat16), wqkv_ref[0],
                  preferred_element_type=jnp.float32) + bqkv_ref[0]
    q = qkv[:, :HIDDEN]
    k = qkv[:, HIDDEN:2 * HIDDEN]
    v = qkv[:, 2 * HIDDEN:]

    # multi-head self-attention: heads stay packed on the lane axis, selected with
    # precomputed lane masks; block-diagonal additive mask keeps batches independent.
    hm_all = hmask_ref[...]                       # (NUM_HEADS, HIDDEN) f32 constants
    amask = amask_ref[...]                        # (M_ENC, M_ENC) f32, 0 / -1e9
    scale = 1.0 / float(HEAD_DIM) ** 0.5
    ctx = jnp.zeros((M_ENC, HIDDEN), jnp.float32)
    for h in range(NUM_HEADS):
        hm = hm_all[h:h + 1, :]
        s = jax.lax.dot_general(q * hm, k,
                                dimension_numbers=(((1,), (1,)), ((), ())),
                                preferred_element_type=jnp.float32) * scale + amask
        m = jnp.max(s, axis=-1, keepdims=True)
        p = jnp.exp(s - m)
        p = p * pl.reciprocal(jnp.sum(p, axis=-1, keepdims=True), approx=True)
        ctx = ctx + jnp.dot(p, v * hm, preferred_element_type=jnp.float32)

    attn = jnp.dot(ctx.astype(jnp.bfloat16), wo_ref[0],
                   preferred_element_type=jnp.float32) + bo
    h1 = _ln_f32(x + attn, ln1_g, ln1_b)          # post-LN (HuBERT-base style)

    # feed forward
    ff = _gelu(jnp.dot(h1.astype(jnp.bfloat16), w1e_ref[0],
                       preferred_element_type=jnp.float32) + b1e_ref[0])
    ff = jnp.dot(ff.astype(jnp.bfloat16), w2e_ref[0],
                 preferred_element_type=jnp.float32) + b2
    h2 = _ln_f32(h1 + ff, ln2_g, ln2_b)

    acc_ref[...] = h2                             # carry activation to next layer

    @pl.when(l == pl.num_programs(0) - 1)
    def _pool():                                  # fused torch.mean(..., dim=1)
        pool_ref[...] = jnp.dot(poolm_ref[...], h2,
                                preferred_element_type=jnp.float32)


def _forward_call(p0, frontend, encoder):
    (w0p, s1m, w1t, s2m, w2t, fpw, fe_vecs, hmask, amask, poolm) = frontend
    (wqkv, bqkv, wo, w1e, b1e, w2e, evecs) = encoder
    args = (p0, w0p, s1m, w1t, s2m, w2t, fpw, fe_vecs, hmask, amask, poolm,
            wqkv, bqkv, wo, w1e, b1e, w2e, evecs)

    mm = lambda m, kk, n: 2 * m * kk * n
    fe_flops = (mm(BATCH * T0, C_PAD, C_PAD)
                + K1 * (mm(BATCH * T1, BATCH * T0, C_PAD) + mm(BATCH * T1, C_PAD, C_PAD))
                + K2 * (mm(BATCH * T2, BATCH * T1, C_PAD) + mm(BATCH * T2, C_PAD, C_PAD))
                + mm(M_ENC, C_PAD, HIDDEN))
    enc_flops = NUM_ENC_LAYERS * (
        mm(M_ENC, HIDDEN, 3 * HIDDEN)
        + NUM_HEADS * (mm(M_ENC, HIDDEN, M_ENC) + mm(M_ENC, M_ENC, HIDDEN))
        + mm(M_ENC, HIDDEN, HIDDEN)
        + mm(M_ENC, HIDDEN, INTERMEDIATE) + mm(M_ENC, INTERMEDIATE, HIDDEN))
    cost = pl.CostEstimate(
        flops=fe_flops + enc_flops + mm(BATCH, M_ENC, HIDDEN),
        transcendentals=(BATCH * (T0 + T1 + T2) * C_PAD
                         + NUM_ENC_LAYERS * (NUM_HEADS * M_ENC * M_ENC
                                             + M_ENC * INTERMEDIATE + 2 * M_ENC)),
        bytes_accessed=int(sum(a.size * a.dtype.itemsize for a in args))
        + BATCH * HIDDEN * 4,
    )

    const2 = lambda *_: (0, 0)
    const3 = lambda *_: (0, 0, 0)
    per_layer = lambda l: (l, 0, 0)

    grid_spec = pltpu.PrefetchScalarGridSpec(
        num_scalar_prefetch=0,
        grid=(NUM_ENC_LAYERS,),                   # layers only; batch folded into M
        in_specs=[
            pl.BlockSpec(p0.shape, const2),       # (B*T0, 128) bf16 im2col (constant block)
            pl.BlockSpec(w0p.shape, const2),
            pl.BlockSpec(s1m.shape, const3),
            pl.BlockSpec(w1t.shape, const3),
            pl.BlockSpec(s2m.shape, const3),
            pl.BlockSpec(w2t.shape, const3),
            pl.BlockSpec(fpw.shape, const2),
            pl.BlockSpec(fe_vecs.shape, const2),
            pl.BlockSpec(hmask.shape, const2),
            pl.BlockSpec(amask.shape, const2),
            pl.BlockSpec(poolm.shape, const2),
            pl.BlockSpec((1, HIDDEN, 3 * HIDDEN), per_layer),     # streamed per layer
            pl.BlockSpec((1, 1, 3 * HIDDEN), per_layer),
            pl.BlockSpec((1, HIDDEN, HIDDEN), per_layer),
            pl.BlockSpec((1, HIDDEN, INTERMEDIATE), per_layer),
            pl.BlockSpec((1, 1, INTERMEDIATE), per_layer),
            pl.BlockSpec((1, INTERMEDIATE, HIDDEN), per_layer),
            pl.BlockSpec((1, 8, HIDDEN), per_layer),
        ],
        out_specs=pl.BlockSpec((BATCH, HIDDEN), const2),
        scratch_shapes=[pltpu.VMEM((M_ENC, HIDDEN), jnp.float32)],
    )
    # NOTE: at real DistilHuBERT sizes (HIDDEN=768, INTERMEDIATE=3072), set
    # vmem_limit_bytes / reduce buffering on the FFN weight streams (v7x has 64 MiB VMEM);
    # irrelevant at these toy sizes.
    return pl.pallas_call(
        _fused_kernel,
        out_shape=jax.ShapeDtypeStruct((BATCH, HIDDEN), jnp.float32),
        grid_spec=grid_spec,
        compiler_params=pltpu.CompilerParams(dimension_semantics=("arbitrary",)),
        cost_estimate=cost,
    )(*args)


# ----------------------------- parameters ------------------------------------
def _dense_init(key, shape, scale=0.02):
    return scale * jax.random.normal(key, shape, dtype=jnp.float32)


def init_params(key):
    params = {}
    keys = iter(jax.random.split(key, 64))

    # conv feature extractor (HF HuBERT conv stack is bias-free: conv_bias=False)
    convs = []
    cin = 1
    for cout, k, _s in CONV_LAYERS:
        convs.append({"w": _dense_init(next(keys), (cout, cin, k))})
        cin = cout
    params["convs"] = convs
    params["gn_g"] = jnp.ones((C0,), jnp.float32)
    params["gn_b"] = jnp.zeros((C0,), jnp.float32)

    # feature projection: LayerNorm + Linear(conv_dim -> hidden)
    params["fp_ln_g"] = jnp.ones((C2,), jnp.float32)
    params["fp_ln_b"] = jnp.zeros((C2,), jnp.float32)
    params["fp_w"] = _dense_init(next(keys), (C2, HIDDEN))
    params["fp_b"] = jnp.zeros((HIDDEN,), jnp.float32)

    # encoder-entry LayerNorm
    params["enc_ln_g"] = jnp.ones((HIDDEN,), jnp.float32)
    params["enc_ln_b"] = jnp.zeros((HIDDEN,), jnp.float32)

    # transformer encoder layers (post-LN, HuBERT-base style)
    layers = []
    for _ in range(NUM_ENC_LAYERS):
        layers.append({
            "wq": _dense_init(next(keys), (HIDDEN, HIDDEN)),
            "bq": jnp.zeros((HIDDEN,), jnp.float32),
            "wk": _dense_init(next(keys), (HIDDEN, HIDDEN)),
            "bk": jnp.zeros((HIDDEN,), jnp.float32),
            "wv": _dense_init(next(keys), (HIDDEN, HIDDEN)),
            "bv": jnp.zeros((HIDDEN,), jnp.float32),
            "wo": _dense_init(next(keys), (HIDDEN, HIDDEN)),
            "bo": jnp.zeros((HIDDEN,), jnp.float32),
            "ln1_g": jnp.ones((HIDDEN,), jnp.float32),
            "ln1_b": jnp.zeros((HIDDEN,), jnp.float32),
            "w1": _dense_init(next(keys), (HIDDEN, INTERMEDIATE)),
            "b1": jnp.zeros((INTERMEDIATE,), jnp.float32),
            "w2": _dense_init(next(keys), (INTERMEDIATE, HIDDEN)),
            "b2": jnp.zeros((HIDDEN,), jnp.float32),
            "ln2_g": jnp.ones((HIDDEN,), jnp.float32),
            "ln2_b": jnp.zeros((HIDDEN,), jnp.float32),
        })
    params["layers"] = layers
    return params


def pack_params(params):
    """Repack params + compile-time constants into kernel-ready lane-dense slabs."""
    # ---- front-end conv weights: PyTorch (Cout, Cin, K) -> lane-padded bf16 taps ----
    w0 = params["convs"][0]["w"]                                   # (32, 1, 8)
    w0p = jnp.zeros((C_PAD, C_PAD), jnp.float32)
    w0p = w0p.at[:K0, :C0].set(jnp.transpose(w0, (2, 1, 0)).reshape(K0, C0))
    w0p = w0p.astype(jnp.bfloat16)                                 # (128, 128)

    w1 = params["convs"][1]["w"]                                   # (64, 32, 4)
    w1t = jnp.pad(jnp.transpose(w1, (2, 1, 0)),
                  ((0, 0), (0, C_PAD - C0), (0, C_PAD - C1))
                  ).astype(jnp.bfloat16)                           # (4, 128, 128)
    w2 = params["convs"][2]["w"]                                   # (128, 64, 2)
    w2t = jnp.pad(jnp.transpose(w2, (2, 1, 0)),
                  ((0, 0), (0, C_PAD - C1), (0, 0))
                  ).astype(jnp.bfloat16)                           # (2, 128, 128)
    fpw = params["fp_w"].astype(jnp.bfloat16)                      # (128, 128)

    fe_vecs = jnp.stack([
        jnp.pad(params["gn_g"], (0, C_PAD - C0), constant_values=1.0),
        jnp.pad(params["gn_b"], (0, C_PAD - C0)),
        params["fp_ln_g"], params["fp_ln_b"], params["fp_b"],
        params["enc_ln_g"], params["enc_ln_b"],
        jnp.zeros((C_PAD,), jnp.float32),                          # pad to 8 sublanes
    ])                                                             # (8, 128)

    # ---- compile-time constants (previously built in-kernel with iota/compare) ----
    r1 = jnp.arange(BATCH * T1)[:, None]
    c1c = jnp.arange(BATCH * T0)[None, :]
    s1m = jnp.stack([(c1c == K1 * r1 + kk) for kk in range(K1)]
                    ).astype(jnp.bfloat16)                         # (4, 32, 128)
    r2 = jnp.arange(BATCH * T2)[:, None]
    c2c = jnp.arange(BATCH * T1)[None, :]
    s2m = jnp.stack([(c2c == K2 * r2 + kk) for kk in range(K2)]
                    ).astype(jnp.bfloat16)                         # (2, 16, 32)

    lane_head = jnp.arange(HIDDEN) // HEAD_DIM
    hmask = (lane_head[None, :] == jnp.arange(NUM_HEADS)[:, None]
             ).astype(jnp.float32)                                 # (4, 128)

    row_b = jnp.arange(M_ENC) // SEQ
    amask = jnp.where(row_b[:, None] == row_b[None, :], 0.0, -1e9
                      ).astype(jnp.float32)                        # (16, 16) block-diag
    poolm = ((jnp.arange(M_ENC)[None, :] // SEQ) == jnp.arange(BATCH)[:, None]
             ).astype(jnp.float32) / float(SEQ)                    # (2, 16) mean-pool

    frontend = (w0p, s1m, w1t, s2m, w2t, fpw, fe_vecs, hmask, amask, poolm)

    # ---- encoder: stack per-layer weights on a leading axis; matmul weights bf16 ----
    L = params["layers"]
    wqkv = jnp.stack([jnp.concatenate([lp["wq"], lp["wk"], lp["wv"]], axis=1)
                      for lp in L]).astype(jnp.bfloat16)           # (L, 128, 384)
    bqkv = jnp.stack([jnp.concatenate([lp["bq"], lp["bk"], lp["bv"]])[None, :]
                      for lp in L])                                # (L, 1, 384)
    wo = jnp.stack([lp["wo"] for lp in L]).astype(jnp.bfloat16)    # (L, 128, 128)
    w1e = jnp.stack([lp["w1"] for lp in L]).astype(jnp.bfloat16)   # (L, 128, 256)
    b1e = jnp.stack([lp["b1"][None, :] for lp in L])               # (L, 1, 256)
    w2e = jnp.stack([lp["w2"] for lp in L]).astype(jnp.bfloat16)   # (L, 256, 128)
    zeros_h = jnp.zeros((HIDDEN,), jnp.float32)
    evecs = jnp.stack([jnp.stack([lp["bo"], lp["ln1_g"], lp["ln1_b"],
                                  lp["b2"], lp["ln2_g"], lp["ln2_b"],
                                  zeros_h, zeros_h])               # pad to 8 sublanes
                       for lp in L])                               # (L, 8, 128)
    encoder = (wqkv, bqkv, wo, w1e, b1e, w2e, evecs)
    return {"frontend": frontend, "encoder": encoder}


# ----------------------------- forward ----------------------------------------
def distilhubert_forward(packed, waveform):
    """waveform: (B, L) float32 -> {'embedding': (B, HIDDEN)}."""
    B, _Lw = waveform.shape
    # conv0 im2col: stride == kernel, so this is a plain reshape (XLA glue),
    # lane-padded to 128 and cast to bf16 so the in-kernel matmul is lane-dense.
    p0 = waveform.reshape(B * T0, K0)
    p0 = jnp.pad(p0, ((0, 0), (0, C_PAD - K0))).astype(jnp.bfloat16)   # (128, 128)
    pooled = _forward_call(p0, packed["frontend"], packed["encoder"])  # (B, HIDDEN)
    return {"embedding": pooled}


# ----------------------------- main ---------------------------------------------
if __name__ == "__main__":
    key = jax.random.PRNGKey(0)
    pkey, dkey = jax.random.split(key)
    params = init_params(pkey)
    packed = pack_params(params)
    waveform = jax.random.normal(dkey, (BATCH, WAVE_LEN), dtype=jnp.float32)

    fwd = jax.jit(distilhubert_forward)
    out = fwd(packed, waveform)
    emb = jax.block_until_ready(out["embedding"])

    assert emb.shape == (BATCH, HIDDEN), emb.shape
    assert bool(jnp.all(jnp.isfinite(emb)))
    print("KERNEL_OK")
</pallas_src>

<mosaic_0001>
module attributes {stable_mosaic.version = 11 : i64} {
  func.func @_fused_kernel(%arg0: i32, %arg1: memref<128x128xbf16, #tpu.memory_space<vmem>>, %arg2: memref<128x128xbf16, #tpu.memory_space<vmem>>, %arg3: memref<4x32x128xbf16, #tpu.memory_space<vmem>>, %arg4: memref<4x128x128xbf16, #tpu.memory_space<vmem>>, %arg5: memref<2x16x32xbf16, #tpu.memory_space<vmem>>, %arg6: memref<2x128x128xbf16, #tpu.memory_space<vmem>>, %arg7: memref<128x128xbf16, #tpu.memory_space<vmem>>, %arg8: memref<8x128xf32, #tpu.memory_space<vmem>>, %arg9: memref<4x128xf32, #tpu.memory_space<vmem>>, %arg10: memref<16x16xf32, #tpu.memory_space<vmem>>, %arg11: memref<2x16xf32, #tpu.memory_space<vmem>>, %arg12: memref<1x128x384xbf16, #tpu.memory_space<vmem>>, %arg13: memref<1x1x384xf32, #tpu.memory_space<vmem>>, %arg14: memref<1x128x128xbf16, #tpu.memory_space<vmem>>, %arg15: memref<1x128x256xbf16, #tpu.memory_space<vmem>>, %arg16: memref<1x1x256xf32, #tpu.memory_space<vmem>>, %arg17: memref<1x256x128xbf16, #tpu.memory_space<vmem>>, %arg18: memref<1x8x128xf32, #tpu.memory_space<vmem>>, %arg19: memref<2x128xf32, #tpu.memory_space<vmem>>, %arg20: memref<16x128xf32, #tpu.memory_space<vmem>>) attributes {dimension_semantics = [#tpu.dimension_semantics<arbitrary>], iteration_bounds = array<i64: 2>, scalar_prefetch = 0 : i64, scratch_operands = 1 : i64, tpu.core_type = #tpu.core_type<tc>, window_params = [{pipeline_mode = #tpu.pipeline_mode<synchronous>, transform_indices = @transform_0, window_bounds = array<i64: 128, 128>}, {pipeline_mode = #tpu.pipeline_mode<synchronous>, transform_indices = @transform_1, window_bounds = array<i64: 128, 128>}, {pipeline_mode = #tpu.pipeline_mode<synchronous>, transform_indices = @transform_2, window_bounds = array<i64: 4, 32, 128>}, {pipeline_mode = #tpu.pipeline_mode<synchronous>, transform_indices = @transform_3, window_bounds = array<i64: 4, 128, 128>}, {pipeline_mode = #tpu.pipeline_mode<synchronous>, transform_indices = @transform_4, window_bounds = array<i64: 2, 16, 32>}, {pipeline_mode = #tpu.pipeline_mode<synchronous>, transform_indices = @transform_5, window_bounds = array<i64: 2, 128, 128>}, {pipeline_mode = #tpu.pipeline_mode<synchronous>, transform_indices = @transform_6, window_bounds = array<i64: 128, 128>}, {pipeline_mode = #tpu.pipeline_mode<synchronous>, transform_indices = @transform_7, window_bounds = array<i64: 8, 128>}, {pipeline_mode = #tpu.pipeline_mode<synchronous>, transform_indices = @transform_8, window_bounds = array<i64: 4, 128>}, {pipeline_mode = #tpu.pipeline_mode<synchronous>, transform_indices = @transform_9, window_bounds = array<i64: 16, 16>}, {pipeline_mode = #tpu.pipeline_mode<synchronous>, transform_indices = @transform_10, window_bounds = array<i64: 2, 16>}, {transform_indices = @transform_11, window_bounds = array<i64: 1, 128, 384>}, {transform_indices = @transform_12, window_bounds = array<i64: 1, 1, 384>}, {transform_indices = @transform_13, window_bounds = array<i64: 1, 128, 128>}, {transform_indices = @transform_14, window_bounds = array<i64: 1, 128, 256>}, {transform_indices = @transform_15, window_bounds = array<i64: 1, 1, 256>}, {transform_indices = @transform_16, window_bounds = array<i64: 1, 256, 128>}, {transform_indices = @transform_17, window_bounds = array<i64: 1, 8, 128>}, {pipeline_mode = #tpu.pipeline_mode<synchronous>, transform_indices = @transform_18, window_bounds = array<i64: 2, 128>}]} {
    %c0_i32 = arith.constant 0 : i32
    %0 = arith.cmpi eq, %arg0, %c0_i32 : i32
    %1 = arith.extui %0 : i1 to i32
    %c0_i32_0 = arith.constant 0 : i32
    %2 = arith.cmpi ne, %1, %c0_i32_0 : i32
    scf.if %2 {
      %c0_68 = arith.constant 0 : index
      %c0_69 = arith.constant 0 : index
      %193 = vector.load %arg8[%c0_68, %c0_69] : memref<8x128xf32, #tpu.memory_space<vmem>>, vector<8x128xf32>
      %194 = vector.extract_strided_slice %193 {offsets = [0, 0], sizes = [1, 128], strides = [1, 1]} : vector<8x128xf32> to vector<1x128xf32>
      %195 = vector.extract_strided_slice %193 {offsets = [1, 0], sizes = [1, 128], strides = [1, 1]} : vector<8x128xf32> to vector<1x128xf32>
      %196 = vector.extract_strided_slice %193 {offsets = [2, 0], sizes = [1, 128], strides = [1, 1]} : vector<8x128xf32> to vector<1x128xf32>
      %197 = vector.extract_strided_slice %193 {offsets = [3, 0], sizes = [1, 128], strides = [1, 1]} : vector<8x128xf32> to vector<1x128xf32>
      %198 = vector.extract_strided_slice %193 {offsets = [4, 0], sizes = [1, 128], strides = [1, 1]} : vector<8x128xf32> to vector<1x128xf32>
      %199 = vector.extract_strided_slice %193 {offsets = [5, 0], sizes = [1, 128], strides = [1, 1]} : vector<8x128xf32> to vector<1x128xf32>
      %200 = vector.extract_strided_slice %193 {offsets = [6, 0], sizes = [1, 128], strides = [1, 1]} : vector<8x128xf32> to vector<1x128xf32>
      %c0_70 = arith.constant 0 : index
      %c0_71 = arith.constant 0 : index
      %201 = vector.load %arg1[%c0_70, %c0_71] : memref<128x128xbf16, #tpu.memory_space<vmem>>, vector<128x128xbf16>
      %c0_72 = arith.constant 0 : index
      %c0_73 = arith.constant 0 : index
      %202 = vector.load %arg2[%c0_72, %c0_73] : memref<128x128xbf16, #tpu.memory_space<vmem>>, vector<128x128xbf16>
      %cst_74 = arith.constant dense<0.000000e+00> : vector<128x128xf32>
      %203 = tpu.matmul %201, %202, %cst_74 {dimension_numbers = #tpu.dot_dimension_numbers<[1], [0], [0], [1], [0, 0, 1, 1], [], []>} : vector<128x128xbf16>, vector<128x128xbf16>, vector<128x128xf32> -> vector<128x128xf32>
      %204 = vector.shape_cast %203 : vector<128x128xf32> to vector<2x64x128xf32>
      %cst_75 = arith.constant dense<0.000000e+00> : vector<2x128xf32>
      %205 = vector.multi_reduction <add>, %204, %cst_75 [1] : vector<2x64x128xf32> to vector<2x128xf32>
      %206 = vector.shape_cast %205 : vector<2x128xf32> to vector<2x1x128xf32>
      %cst_76 = arith.constant 6.400000e+01 : f32
      %207 = vector.broadcast %cst_76 : f32 to vector<2x1x128xf32>
      %208 = arith.divf %206, %207 : vector<2x1x128xf32>
      %209 = vector.broadcast %208 : vector<2x1x128xf32> to vector<2x64x128xf32>
      %210 = arith.subf %204, %209 : vector<2x64x128xf32>
      %211 = arith.mulf %210, %210 : vector<2x64x128xf32>
      %cst_77 = arith.constant dense<0.000000e+00> : vector<2x128xf32>
      %212 = vector.multi_reduction <add>, %211, %cst_77 [1] : vector<2x64x128xf32> to vector<2x128xf32>
      %213 = vector.shape_cast %212 : vector<2x128xf32> to vector<2x1x128xf32>
      %cst_78 = arith.constant 6.400000e+01 : f32
      %214 = vector.broadcast %cst_78 : f32 to vector<2x1x128xf32>
      %215 = arith.divf %213, %214 : vector<2x1x128xf32>
      %216 = vector.broadcast %208 : vector<2x1x128xf32> to vector<2x64x128xf32>
      %217 = arith.subf %204, %216 : vector<2x64x128xf32>
      %cst_79 = arith.constant 9.99999974E-6 : f32
      %218 = vector.broadcast %cst_79 : f32 to vector<2x1x128xf32>
      %219 = arith.addf %215, %218 : vector<2x1x128xf32>
      %220 = math.rsqrt %219 : vector<2x1x128xf32>
      %221 = vector.broadcast %220 : vector<2x1x128xf32> to vector<2x64x128xf32>
      %222 = arith.mulf %217, %221 : vector<2x64x128xf32>
      %223 = vector.shape_cast %222 : vector<2x64x128xf32> to vector<128x128xf32>
      %224 = vector.broadcast %194 : vector<1x128xf32> to vector<128x128xf32>
      %225 = arith.mulf %223, %224 : vector<128x128xf32>
      %226 = vector.broadcast %195 : vector<1x128xf32> to vector<128x128xf32>
      %227 = arith.addf %225, %226 : vector<128x128xf32>
      %cst_80 = arith.constant 5.000000e-01 : f32
      %228 = vector.broadcast %cst_80 : f32 to vector<128x128xf32>
      %229 = arith.mulf %228, %227 : vector<128x128xf32>
      %cst_81 = arith.constant 4.471500e-02 : f32
      %230 = vector.broadcast %cst_81 : f32 to vector<128x128xf32>
      %231 = arith.mulf %230, %227 : vector<128x128xf32>
      %232 = arith.mulf %231, %227 : vector<128x128xf32>
      %233 = arith.mulf %232, %227 : vector<128x128xf32>
      %234 = arith.addf %227, %233 : vector<128x128xf32>
      %cst_82 = arith.constant 0.797884583 : f32
      %235 = vector.broadcast %cst_82 : f32 to vector<128x128xf32>
      %236 = arith.mulf %235, %234 : vector<128x128xf32>
      %237 = math.tanh %236 : vector<128x128xf32>
      %cst_83 = arith.constant 1.000000e+00 : f32
      %238 = vector.broadcast %cst_83 : f32 to vector<128x128xf32>
      %239 = arith.addf %238, %237 : vector<128x128xf32>
      %240 = arith.mulf %229, %239 : vector<128x128xf32>
      %241 = arith.truncf %240 : vector<128x128xf32> to vector<128x128xbf16>
      %c0_84 = arith.constant 0 : index
      %c0_85 = arith.constant 0 : index
      %c0_86 = arith.constant 0 : index
      %242 = vector.load %arg3[%c0_84, %c0_85, %c0_86] : memref<4x32x128xbf16, #tpu.memory_space<vmem>>, vector<4x32x128xbf16>
      %c0_87 = arith.constant 0 : index
      %c0_88 = arith.constant 0 : index
      %c0_89 = arith.constant 0 : index
      %243 = vector.load %arg4[%c0_87, %c0_88, %c0_89] : memref<4x128x128xbf16, #tpu.memory_space<vmem>>, vector<4x128x128xbf16>
      %cst_90 = arith.constant 0.000000e+00 : f32
      %244 = vector.broadcast %cst_90 : f32 to vector<32x128xf32>
      %245 = vector.extract_strided_slice %242 {offsets = [0, 0, 0], sizes = [1, 32, 128], strides = [1, 1, 1]} : vector<4x32x128xbf16> to vector<1x32x128xbf16>
      %246 = vector.shape_cast %245 : vector<1x32x128xbf16> to vector<32x128xbf16>
      %cst_91 = arith.constant dense<0.000000e+00> : vector<32x128xf32>
      %247 = tpu.matmul %246, %241, %cst_91 {dimension_numbers = #tpu.dot_dimension_numbers<[1], [0], [0], [1], [0, 0, 1, 1], [], []>} : vector<32x128xbf16>, vector<128x128xbf16>, vector<32x128xf32> -> vector<32x128xf32>
      %248 = arith.truncf %247 : vector<32x128xf32> to vector<32x128xbf16>
      %249 = vector.extract_strided_slice %243 {offsets = [0, 0, 0], sizes = [1, 128, 128], strides = [1, 1, 1]} : vector<4x128x128xbf16> to vector<1x128x128xbf16>
      %250 = vector.shape_cast %249 : vector<1x128x128xbf16> to vector<128x128xbf16>
      %cst_92 = arith.constant dense<0.000000e+00> : vector<32x128xf32>
      %251 = tpu.matmul %248, %250, %cst_92 {dimension_numbers = #tpu.dot_dimension_numbers<[1], [0], [0], [1], [0, 0, 1, 1], [], []>} : vector<32x128xbf16>, vector<128x128xbf16>, vector<32x128xf32> -> vector<32x128xf32>
      %252 = arith.addf %244, %251 : vector<32x128xf32>
      %253 = vector.extract_strided_slice %242 {offsets = [1, 0, 0], sizes = [1, 32, 128], strides = [1, 1, 1]} : vector<4x32x128xbf16> to vector<1x32x128xbf16>
      %254 = vector.shape_cast %253 : vector<1x32x128xbf16> to vector<32x128xbf16>
      %cst_93 = arith.constant dense<0.000000e+00> : vector<32x128xf32>
      %255 = tpu.matmul %254, %241, %cst_93 {dimension_numbers = #tpu.dot_dimension_numbers<[1], [0], [0], [1], [0, 0, 1, 1], [], []>} : vector<32x128xbf16>, vector<128x128xbf16>, vector<32x128xf32> -> vector<32x128xf32>
      %256 = arith.truncf %255 : vector<32x128xf32> to vector<32x128xbf16>
      %257 = vector.extract_strided_slice %243 {offsets = [1, 0, 0], sizes = [1, 128, 128], strides = [1, 1, 1]} : vector<4x128x128xbf16> to vector<1x128x128xbf16>
      %258 = vector.shape_cast %257 : vector<1x128x128xbf16> to vector<128x128xbf16>
      %cst_94 = arith.constant dense<0.000000e+00> : vector<32x128xf32>
      %259 = tpu.matmul %256, %258, %cst_94 {dimension_numbers = #tpu.dot_dimension_numbers<[1], [0], [0], [1], [0, 0, 1, 1], [], []>} : vector<32x128xbf16>, vector<128x128xbf16>, vector<32x128xf32> -> vector<32x128xf32>
      %260 = arith.addf %252, %259 : vector<32x128xf32>
      %261 = vector.extract_strided_slice %242 {offsets = [2, 0, 0], sizes = [1, 32, 128], strides = [1, 1, 1]} : vector<4x32x128xbf16> to vector<1x32x128xbf16>
      %262 = vector.shape_cast %261 : vector<1x32x128xbf16> to vector<32x128xbf16>
      %cst_95 = arith.constant dense<0.000000e+00> : vector<32x128xf32>
      %263 = tpu.matmul %262, %241, %cst_95 {dimension_numbers = #tpu.dot_dimension_numbers<[1], [0], [0], [1], [0, 0, 1, 1], [], []>} : vector<32x128xbf16>, vector<128x128xbf16>, vector<32x128xf32> -> vector<32x128xf32>
      %264 = arith.truncf %263 : vector<32x128xf32> to vector<32x128xbf16>
      %265 = vector.extract_strided_slice %243 {offsets = [2, 0, 0], sizes = [1, 128, 128], strides = [1, 1, 1]} : vector<4x128x128xbf16> to vector<1x128x128xbf16>
      %266 = vector.shape_cast %265 : vector<1x128x128xbf16> to vector<128x128xbf16>
      %cst_96 = arith.constant dense<0.000000e+00> : vector<32x128xf32>
      %267 = tpu.matmul %264, %266, %cst_96 {dimension_numbers = #tpu.dot_dimension_numbers<[1], [0], [0], [1], [0, 0, 1, 1], [], []>} : vector<32x128xbf16>, vector<128x128xbf16>, vector<32x128xf32> -> vector<32x128xf32>
      %268 = arith.addf %260, %267 : vector<32x128xf32>
      %269 = vector.extract_strided_slice %242 {offsets = [3, 0, 0], sizes = [1, 32, 128], strides = [1, 1, 1]} : vector<4x32x128xbf16> to vector<1x32x128xbf16>
      %270 = vector.shape_cast %269 : vector<1x32x128xbf16> to vector<32x128xbf16>
      %cst_97 = arith.constant dense<0.000000e+00> : vector<32x128xf32>
      %271 = tpu.matmul %270, %241, %cst_97 {dimension_numbers = #tpu.dot_dimension_numbers<[1], [0], [0], [1], [0, 0, 1, 1], [], []>} : vector<32x128xbf16>, vector<128x128xbf16>, vector<32x128xf32> -> vector<32x128xf32>
      %272 = arith.truncf %271 : vector<32x128xf32> to vector<32x128xbf16>
      %273 = vector.extract_strided_slice %243 {offsets = [3, 0, 0], sizes = [1, 128, 128], strides = [1, 1, 1]} : vector<4x128x128xbf16> to vector<1x128x128xbf16>
      %274 = vector.shape_cast %273 : vector<1x128x128xbf16> to vector<128x128xbf16>
      %cst_98 = arith.constant dense<0.000000e+00> : vector<32x128xf32>
      %275 = tpu.matmul %272, %274, %cst_98 {dimension_numbers = #tpu.dot_dimension_numbers<[1], [0], [0], [1], [0, 0, 1, 1], [], []>} : vector<32x128xbf16>, vector<128x128xbf16>, vector<32x128xf32> -> vector<32x128xf32>
      %276 = arith.addf %268, %275 : vector<32x128xf32>
      %cst_99 = arith.constant 5.000000e-01 : f32
      %277 = vector.broadcast %cst_99 : f32 to vector<32x128xf32>
      %278 = arith.mulf %277, %276 : vector<32x128xf32>
      %cst_100 = arith.constant 4.471500e-02 : f32
      %279 = vector.broadcast %cst_100 : f32 to vector<32x128xf32>
      %280 = arith.mulf %279, %276 : vector<32x128xf32>
      %281 = arith.mulf %280, %276 : vector<32x128xf32>
      %282 = arith.mulf %281, %276 : vector<32x128xf32>
      %283 = arith.addf %276, %282 : vector<32x128xf32>
      %cst_101 = arith.constant 0.797884583 : f32
      %284 = vector.broadcast %cst_101 : f32 to vector<32x128xf32>
      %285 = arith.mulf %284, %283 : vector<32x128xf32>
      %286 = math.tanh %285 : vector<32x128xf32>
      %cst_102 = arith.constant 1.000000e+00 : f32
      %287 = vector.broadcast %cst_102 : f32 to vector<32x128xf32>
      %288 = arith.addf %287, %286 : vector<32x128xf32>
      %289 = arith.mulf %278, %288 : vector<32x128xf32>
      %290 = arith.truncf %289 : vector<32x128xf32> to vector<32x128xbf16>
      %c0_103 = arith.constant 0 : index
      %c0_104 = arith.constant 0 : index
      %c0_105 = arith.constant 0 : index
      %291 = vector.load %arg5[%c0_103, %c0_104, %c0_105] : memref<2x16x32xbf16, #tpu.memory_space<vmem>>, vector<2x16x32xbf16>
      %c0_106 = arith.constant 0 : index
      %c0_107 = arith.constant 0 : index
      %c0_108 = arith.constant 0 : index
      %292 = vector.load %arg6[%c0_106, %c0_107, %c0_108] : memref<2x128x128xbf16, #tpu.memory_space<vmem>>, vector<2x128x128xbf16>
      %cst_109 = arith.constant 0.000000e+00 : f32
      %293 = vector.broadcast %cst_109 : f32 to vector<16x128xf32>
      %294 = vector.extract_strided_slice %291 {offsets = [0, 0, 0], sizes = [1, 16, 32], strides = [1, 1, 1]} : vector<2x16x32xbf16> to vector<1x16x32xbf16>
      %295 = vector.shape_cast %294 : vector<1x16x32xbf16> to vector<16x32xbf16>
      %cst_110 = arith.constant dense<0.000000e+00> : vector<16x128xf32>
      %296 = tpu.matmul %295, %290, %cst_110 {dimension_numbers = #tpu.dot_dimension_numbers<[1], [0], [0], [1], [0, 0, 1, 1], [], []>} : vector<16x32xbf16>, vector<32x128xbf16>, vector<16x128xf32> -> vector<16x128xf32>
      %297 = arith.truncf %296 : vector<16x128xf32> to vector<16x128xbf16>
      %298 = vector.extract_strided_slice %292 {offsets = [0, 0, 0], sizes = [1, 128, 128], strides = [1, 1, 1]} : vector<2x128x128xbf16> to vector<1x128x128xbf16>
      %299 = vector.shape_cast %298 : vector<1x128x128xbf16> to vector<128x128xbf16>
      %cst_111 = arith.constant dense<0.000000e+00> : vector<16x128xf32>
      %300 = tpu.matmul %297, %299, %cst_111 {dimension_numbers = #tpu.dot_dimension_numbers<[1], [0], [0], [1], [0, 0, 1, 1], [], []>} : vector<16x128xbf16>, vector<128x128xbf16>, vector<16x128xf32> -> vector<16x128xf32>
      %301 = arith.addf %293, %300 : vector<16x128xf32>
      %302 = vector.extract_strided_slice %291 {offsets = [1, 0, 0], sizes = [1, 16, 32], strides = [1, 1, 1]} : vector<2x16x32xbf16> to vector<1x16x32xbf16>
      %303 = vector.shape_cast %302 : vector<1x16x32xbf16> to vector<16x32xbf16>
      %cst_112 = arith.constant dense<0.000000e+00> : vector<16x128xf32>
      %304 = tpu.matmul %303, %290, %cst_112 {dimension_numbers = #tpu.dot_dimension_numbers<[1], [0], [0], [1], [0, 0, 1, 1], [], []>} : vector<16x32xbf16>, vector<32x128xbf16>, vector<16x128xf32> -> vector<16x128xf32>
      %305 = arith.truncf %304 : vector<16x128xf32> to vector<16x128xbf16>
      %306 = vector.extract_strided_slice %292 {offsets = [1, 0, 0], sizes = [1, 128, 128], strides = [1, 1, 1]} : vector<2x128x128xbf16> to vector<1x128x128xbf16>
      %307 = vector.shape_cast %306 : vector<1x128x128xbf16> to vector<128x128xbf16>
      %cst_113 = arith.constant dense<0.000000e+00> : vector<16x128xf32>
      %308 = tpu.matmul %305, %307, %cst_113 {dimension_numbers = #tpu.dot_dimension_numbers<[1], [0], [0], [1], [0, 0, 1, 1], [], []>} : vector<16x128xbf16>, vector<128x128xbf16>, vector<16x128xf32> -> vector<16x128xf32>
      %309 = arith.addf %301, %308 : vector<16x128xf32>
      %cst_114 = arith.constant 5.000000e-01 : f32
      %310 = vector.broadcast %cst_114 : f32 to vector<16x128xf32>
      %311 = arith.mulf %310, %309 : vector<16x128xf32>
      %cst_115 = arith.constant 4.471500e-02 : f32
      %312 = vector.broadcast %cst_115 : f32 to vector<16x128xf32>
      %313 = arith.mulf %312, %309 : vector<16x128xf32>
      %314 = arith.mulf %313, %309 : vector<16x128xf32>
      %315 = arith.mulf %314, %309 : vector<16x128xf32>
      %316 = arith.addf %309, %315 : vector<16x128xf32>
      %cst_116 = arith.constant 0.797884583 : f32
      %317 = vector.broadcast %cst_116 : f32 to vector<16x128xf32>
      %318 = arith.mulf %317, %316 : vector<16x128xf32>
      %319 = math.tanh %318 : vector<16x128xf32>
      %cst_117 = arith.constant 1.000000e+00 : f32
      %320 = vector.broadcast %cst_117 : f32 to vector<16x128xf32>
      %321 = arith.addf %320, %319 : vector<16x128xf32>
      %322 = arith.mulf %311, %321 : vector<16x128xf32>
      %cst_118 = arith.constant dense<0.000000e+00> : vector<16xf32>
      %323 = vector.multi_reduction <add>, %322, %cst_118 [1] : vector<16x128xf32> to vector<16xf32>
      %324 = vector.shape_cast %323 : vector<16xf32> to vector<16x1xf32>
      %cst_119 = arith.constant 1.280000e+02 : f32
      %325 = vector.broadcast %cst_119 : f32 to vector<16x1xf32>
      %326 = arith.divf %324, %325 : vector<16x1xf32>
      %327 = vector.broadcast %326 : vector<16x1xf32> to vector<16x128xf32>
      %328 = arith.subf %322, %327 : vector<16x128xf32>
      %329 = arith.mulf %328, %328 : vector<16x128xf32>
      %cst_120 = arith.constant dense<0.000000e+00> : vector<16xf32>
      %330 = vector.multi_reduction <add>, %329, %cst_120 [1] : vector<16x128xf32> to vector<16xf32>
      %331 = vector.shape_cast %330 : vector<16xf32> to vector<16x1xf32>
      %cst_121 = arith.constant 1.280000e+02 : f32
      %332 = vector.broadcast %cst_121 : f32 to vector<16x1xf32>
      %333 = arith.divf %331, %332 : vector<16x1xf32>
      %334 = vector.broadcast %326 : vector<16x1xf32> to vector<16x128xf32>
      %335 = arith.subf %322, %334 : vector<16x128xf32>
      %cst_122 = arith.constant 9.99999974E-6 : f32
      %336 = vector.broadcast %cst_122 : f32 to vector<16x1xf32>
      %337 = arith.addf %333, %336 : vector<16x1xf32>
      %338 = math.rsqrt %337 : vector<16x1xf32>
      %339 = vector.broadcast %338 : vector<16x1xf32> to vector<16x128xf32>
      %340 = arith.mulf %335, %339 : vector<16x128xf32>
      %341 = vector.broadcast %196 : vector<1x128xf32> to vector<16x128xf32>
      %342 = arith.mulf %340, %341 : vector<16x128xf32>
      %343 = vector.broadcast %197 : vector<1x128xf32> to vector<16x128xf32>
      %344 = arith.addf %342, %343 : vector<16x128xf32>
      %345 = arith.truncf %344 : vector<16x128xf32> to vector<16x128xbf16>
      %c0_123 = arith.constant 0 : index
      %c0_124 = arith.constant 0 : index
      %346 = vector.load %arg7[%c0_123, %c0_124] : memref<128x128xbf16, #tpu.memory_space<vmem>>, vector<128x128xbf16>
      %cst_125 = arith.constant dense<0.000000e+00> : vector<16x128xf32>
      %347 = tpu.matmul %345, %346, %cst_125 {dimension_numbers = #tpu.dot_dimension_numbers<[1], [0], [0], [1], [0, 0, 1, 1], [], []>} : vector<16x128xbf16>, vector<128x128xbf16>, vector<16x128xf32> -> vector<16x128xf32>
      %348 = vector.broadcast %198 : vector<1x128xf32> to vector<16x128xf32>
      %349 = arith.addf %347, %348 : vector<16x128xf32>
      %cst_126 = arith.constant dense<0.000000e+00> : vector<16xf32>
      %350 = vector.multi_reduction <add>, %349, %cst_126 [1] : vector<16x128xf32> to vector<16xf32>
      %351 = vector.shape_cast %350 : vector<16xf32> to vector<16x1xf32>
      %cst_127 = arith.constant 1.280000e+02 : f32
      %352 = vector.broadcast %cst_127 : f32 to vector<16x1xf32>
      %353 = arith.divf %351, %352 : vector<16x1xf32>
      %354 = vector.broadcast %353 : vector<16x1xf32> to vector<16x128xf32>
      %355 = arith.subf %349, %354 : vector<16x128xf32>
      %356 = arith.mulf %355, %355 : vector<16x128xf32>
      %cst_128 = arith.constant dense<0.000000e+00> : vector<16xf32>
      %357 = vector.multi_reduction <add>, %356, %cst_128 [1] : vector<16x128xf32> to vector<16xf32>
      %358 = vector.shape_cast %357 : vector<16xf32> to vector<16x1xf32>
      %cst_129 = arith.constant 1.280000e+02 : f32
      %359 = vector.broadcast %cst_129 : f32 to vector<16x1xf32>
      %360 = arith.divf %358, %359 : vector<16x1xf32>
      %361 = vector.broadcast %353 : vector<16x1xf32> to vector<16x128xf32>
      %362 = arith.subf %349, %361 : vector<16x128xf32>
      %cst_130 = arith.constant 9.99999974E-6 : f32
      %363 = vector.broadcast %cst_130 : f32 to vector<16x1xf32>
      %364 = arith.addf %360, %363 : vector<16x1xf32>
      %365 = math.rsqrt %364 : vector<16x1xf32>
      %366 = vector.broadcast %365 : vector<16x1xf32> to vector<16x128xf32>
      %367 = arith.mulf %362, %366 : vector<16x128xf32>
      %368 = vector.broadcast %199 : vector<1x128xf32> to vector<16x128xf32>
      %369 = arith.mulf %367, %368 : vector<16x128xf32>
      %370 = vector.broadcast %200 : vector<1x128xf32> to vector<16x128xf32>
      %371 = arith.addf %369, %370 : vector<16x128xf32>
      %c0_131 = arith.constant 0 : index
      %c0_132 = arith.constant 0 : index
      %372 = vector.load %arg20[%c0_131, %c0_132] : memref<16x128xf32, #tpu.memory_space<vmem>>, vector<16x128xf32>
      tpu.vector_store %arg20[%c0_131, %c0_132], %371 {strides = array<i32>} : memref<16x128xf32, #tpu.memory_space<vmem>>, vector<16x128xf32>,
    } else {
    }
    %c0 = arith.constant 0 : index
    %c0_1 = arith.constant 0 : index
    %3 = vector.load %arg20[%c0, %c0_1] : memref<16x128xf32, #tpu.memory_space<vmem>>, vector<16x128xf32>
    %c0_2 = arith.constant 0 : index
    %c0_3 = arith.constant 0 : index
    %c0_4 = arith.constant 0 : index
    %4 = vector.load %arg18[%c0_2, %c0_3, %c0_4] : memref<1x8x128xf32, #tpu.memory_space<vmem>>, vector<1x8x128xf32>
    %5 = vector.shape_cast %4 : vector<1x8x128xf32> to vector<8x128xf32>
    %6 = vector.extract_strided_slice %5 {offsets = [0, 0], sizes = [1, 128], strides = [1, 1]} : vector<8x128xf32> to vector<1x128xf32>
    %7 = vector.extract_strided_slice %5 {offsets = [1, 0], sizes = [1, 128], strides = [1, 1]} : vector<8x128xf32> to vector<1x128xf32>
    %8 = vector.extract_strided_slice %5 {offsets = [2, 0], sizes = [1, 128], strides = [1, 1]} : vector<8x128xf32> to vector<1x128xf32>
    %9 = vector.extract_strided_slice %5 {offsets = [3, 0], sizes = [1, 128], strides = [1, 1]} : vector<8x128xf32> to vector<1x128xf32>
    %10 = vector.extract_strided_slice %5 {offsets = [4, 0], sizes = [1, 128], strides = [1, 1]} : vector<8x128xf32> to vector<1x128xf32>
    %11 = vector.extract_strided_slice %5 {offsets = [5, 0], sizes = [1, 128], strides = [1, 1]} : vector<8x128xf32> to vector<1x128xf32>
    %12 = arith.truncf %3 : vector<16x128xf32> to vector<16x128xbf16>
    %c0_5 = arith.constant 0 : index
    %c0_6 = arith.constant 0 : index
    %c0_7 = arith.constant 0 : index
    %13 = vector.load %arg12[%c0_5, %c0_6, %c0_7] : memref<1x128x384xbf16, #tpu.memory_space<vmem>>, vector<1x128x384xbf16>
    %14 = vector.shape_cast %13 : vector<1x128x384xbf16> to vector<128x384xbf16>
    %cst = arith.constant dense<0.000000e+00> : vector<16x384xf32>
    %15 = tpu.matmul %12, %14, %cst {dimension_numbers = #tpu.dot_dimension_numbers<[1], [0], [0], [1], [0, 0, 1, 1], [], []>} : vector<16x128xbf16>, vector<128x384xbf16>, vector<16x384xf32> -> vector<16x384xf32>
    %c0_8 = arith.constant 0 : index
    %c0_9 = arith.constant 0 : index
    %c0_10 = arith.constant 0 : index
    %16 = vector.load %arg13[%c0_8, %c0_9, %c0_10] : memref<1x1x384xf32, #tpu.memory_space<vmem>>, vector<1x1x384xf32>
    %17 = vector.shape_cast %16 : vector<1x1x384xf32> to vector<1x384xf32>
    %18 = vector.broadcast %17 : vector<1x384xf32> to vector<16x384xf32>
    %19 = arith.addf %15, %18 : vector<16x384xf32>
    %20 = vector.extract_strided_slice %19 {offsets = [0, 0], sizes = [16, 128], strides = [1, 1]} : vector<16x384xf32> to vector<16x128xf32>
    %21 = vector.extract_strided_slice %19 {offsets = [0, 128], sizes = [16, 128], strides = [1, 1]} : vector<16x384xf32> to vector<16x128xf32>
    %22 = vector.extract_strided_slice %19 {offsets = [0, 256], sizes = [16, 128], strides = [1, 1]} : vector<16x384xf32> to vector<16x128xf32>
    %c0_11 = arith.constant 0 : index
    %c0_12 = arith.constant 0 : index
    %23 = vector.load %arg9[%c0_11, %c0_12] : memref<4x128xf32, #tpu.memory_space<vmem>>, vector<4x128xf32>
    %c0_13 = arith.constant 0 : index
    %c0_14 = arith.constant 0 : index
    %24 = vector.load %arg10[%c0_13, %c0_14] : memref<16x16xf32, #tpu.memory_space<vmem>>, vector<16x16xf32>
    %cst_15 = arith.constant 0.000000e+00 : f32
    %25 = vector.broadcast %cst_15 : f32 to vector<16x128xf32>
    %26 = vector.extract_strided_slice %23 {offsets = [0, 0], sizes = [1, 128], strides = [1, 1]} : vector<4x128xf32> to vector<1x128xf32>
    %27 = vector.broadcast %26 : vector<1x128xf32> to vector<16x128xf32>
    %28 = arith.mulf %20, %27 : vector<16x128xf32>
    %cst_16 = arith.constant dense<0.000000e+00> : vector<16x16xf32>
    %29 = tpu.matmul %28, %21, %cst_16 {dimension_numbers = #tpu.dot_dimension_numbers<[1], [1], [0], [0], [0, 0, 1, 0], [], []>} : vector<16x128xf32>, vector<16x128xf32>, vector<16x16xf32> -> vector<16x16xf32>
    %cst_17 = arith.constant 0.176776692 : f32
    %30 = vector.broadcast %cst_17 : f32 to vector<16x16xf32>
    %31 = arith.mulf %29, %30 : vector<16x16xf32>
    %32 = arith.addf %31, %24 : vector<16x16xf32>
    %cst_18 = arith.constant dense<0xFF800000> : vector<16xf32>
    %33 = vector.multi_reduction <maximumf>, %32, %cst_18 [1] : vector<16x16xf32> to vector<16xf32>
    %34 = vector.shape_cast %33 : vector<16xf32> to vector<16x1xf32>
    %35 = vector.broadcast %34 : vector<16x1xf32> to vector<16x16xf32>
    %36 = arith.subf %32, %35 : vector<16x16xf32>
    %37 = math.exp %36 : vector<16x16xf32>
    %cst_19 = arith.constant dense<0.000000e+00> : vector<16xf32>
    %38 = vector.multi_reduction <add>, %37, %cst_19 [1] : vector<16x16xf32> to vector<16xf32>
    %39 = vector.shape_cast %38 : vector<16xf32> to vector<16x1xf32>
    %40 = tpu.reciprocal %39 {approx = true} : vector<16x1xf32> -> vector<16x1xf32>
    %41 = vector.broadcast %40 : vector<16x1xf32> to vector<16x16xf32>
    %42 = arith.mulf %37, %41 : vector<16x16xf32>
    %43 = vector.broadcast %26 : vector<1x128xf32> to vector<16x128xf32>
    %44 = arith.mulf %22, %43 : vector<16x128xf32>
    %cst_20 = arith.constant dense<0.000000e+00> : vector<16x128xf32>
    %45 = tpu.matmul %42, %44, %cst_20 {dimension_numbers = #tpu.dot_dimension_numbers<[1], [0], [0], [1], [0, 0, 1, 1], [], []>} : vector<16x16xf32>, vector<16x128xf32>, vector<16x128xf32> -> vector<16x128xf32>
    %46 = arith.addf %25, %45 : vector<16x128xf32>
    %47 = vector.extract_strided_slice %23 {offsets = [1, 0], sizes = [1, 128], strides = [1, 1]} : vector<4x128xf32> to vector<1x128xf32>
    %48 = vector.broadcast %47 : vector<1x128xf32> to vector<16x128xf32>
    %49 = arith.mulf %20, %48 : vector<16x128xf32>
    %cst_21 = arith.constant dense<0.000000e+00> : vector<16x16xf32>
    %50 = tpu.matmul %49, %21, %cst_21 {dimension_numbers = #tpu.dot_dimension_numbers<[1], [1], [0], [0], [0, 0, 1, 0], [], []>} : vector<16x128xf32>, vector<16x128xf32>, vector<16x16xf32> -> vector<16x16xf32>
    %cst_22 = arith.constant 0.176776692 : f32
    %51 = vector.broadcast %cst_22 : f32 to vector<16x16xf32>
    %52 = arith.mulf %50, %51 : vector<16x16xf32>
    %53 = arith.addf %52, %24 : vector<16x16xf32>
    %cst_23 = arith.constant dense<0xFF800000> : vector<16xf32>
    %54 = vector.multi_reduction <maximumf>, %53, %cst_23 [1] : vector<16x16xf32> to vector<16xf32>
    %55 = vector.shape_cast %54 : vector<16xf32> to vector<16x1xf32>
    %56 = vector.broadcast %55 : vector<16x1xf32> to vector<16x16xf32>
    %57 = arith.subf %53, %56 : vector<16x16xf32>
    %58 = math.exp %57 : vector<16x16xf32>
    %cst_24 = arith.constant dense<0.000000e+00> : vector<16xf32>
    %59 = vector.multi_reduction <add>, %58, %cst_24 [1] : vector<16x16xf32> to vector<16xf32>
    %60 = vector.shape_cast %59 : vector<16xf32> to vector<16x1xf32>
    %61 = tpu.reciprocal %60 {approx = true} : vector<16x1xf32> -> vector<16x1xf32>
    %62 = vector.broadcast %61 : vector<16x1xf32> to vector<16x16xf32>
    %63 = arith.mulf %58, %62 : vector<16x16xf32>
    %64 = vector.broadcast %47 : vector<1x128xf32> to vector<16x128xf32>
    %65 = arith.mulf %22, %64 : vector<16x128xf32>
    %cst_25 = arith.constant dense<0.000000e+00> : vector<16x128xf32>
    %66 = tpu.matmul %63, %65, %cst_25 {dimension_numbers = #tpu.dot_dimension_numbers<[1], [0], [0], [1], [0, 0, 1, 1], [], []>} : vector<16x16xf32>, vector<16x128xf32>, vector<16x128xf32> -> vector<16x128xf32>
    %67 = arith.addf %46, %66 : vector<16x128xf32>
    %68 = vector.extract_strided_slice %23 {offsets = [2, 0], sizes = [1, 128], strides = [1, 1]} : vector<4x128xf32> to vector<1x128xf32>
    %69 = vector.broadcast %68 : vector<1x128xf32> to vector<16x128xf32>
    %70 = arith.mulf %20, %69 : vector<16x128xf32>
    %cst_26 = arith.constant dense<0.000000e+00> : vector<16x16xf32>
    %71 = tpu.matmul %70, %21, %cst_26 {dimension_numbers = #tpu.dot_dimension_numbers<[1], [1], [0], [0], [0, 0, 1, 0], [], []>} : vector<16x128xf32>, vector<16x128xf32>, vector<16x16xf32> -> vector<16x16xf32>
    %cst_27 = arith.constant 0.176776692 : f32
    %72 = vector.broadcast %cst_27 : f32 to vector<16x16xf32>
    %73 = arith.mulf %71, %72 : vector<16x16xf32>
    %74 = arith.addf %73, %24 : vector<16x16xf32>
    %cst_28 = arith.constant dense<0xFF800000> : vector<16xf32>
    %75 = vector.multi_reduction <maximumf>, %74, %cst_28 [1] : vector<16x16xf32> to vector<16xf32>
    %76 = vector.shape_cast %75 : vector<16xf32> to vector<16x1xf32>
    %77 = vector.broadcast %76 : vector<16x1xf32> to vector<16x16xf32>
    %78 = arith.subf %74, %77 : vector<16x16xf32>
    %79 = math.exp %78 : vector<16x16xf32>
    %cst_29 = arith.constant dense<0.000000e+00> : vector<16xf32>
    %80 = vector.multi_reduction <add>, %79, %cst_29 [1] : vector<16x16xf32> to vector<16xf32>
    %81 = vector.shape_cast %80 : vector<16xf32> to vector<16x1xf32>
    %82 = tpu.reciprocal %81 {approx = true} : vector<16x1xf32> -> vector<16x1xf32>
    %83 = vector.broadcast %82 : vector<16x1xf32> to vector<16x16xf32>
    %84 = arith.mulf %79, %83 : vector<16x16xf32>
    %85 = vector.broadcast %68 : vector<1x128xf32> to vector<16x128xf32>
    %86 = arith.mulf %22, %85 : vector<16x128xf32>
    %cst_30 = arith.constant dense<0.000000e+00> : vector<16x128xf32>
    %87 = tpu.matmul %84, %86, %cst_30 {dimension_numbers = #tpu.dot_dimension_numbers<[1], [0], [0], [1], [0, 0, 1, 1], [], []>} : vector<16x16xf32>, vector<16x128xf32>, vector<16x128xf32> -> vector<16x128xf32>
    %88 = arith.addf %67, %87 : vector<16x128xf32>
    %89 = vector.extract_strided_slice %23 {offsets = [3, 0], sizes = [1, 128], strides = [1, 1]} : vector<4x128xf32> to vector<1x128xf32>
    %90 = vector.broadcast %89 : vector<1x128xf32> to vector<16x128xf32>
    %91 = arith.mulf %20, %90 : vector<16x128xf32>
    %cst_31 = arith.constant dense<0.000000e+00> : vector<16x16xf32>
    %92 = tpu.matmul %91, %21, %cst_31 {dimension_numbers = #tpu.dot_dimension_numbers<[1], [1], [0], [0], [0, 0, 1, 0], [], []>} : vector<16x128xf32>, vector<16x128xf32>, vector<16x16xf32> -> vector<16x16xf32>
    %cst_32 = arith.constant 0.176776692 : f32
    %93 = vector.broadcast %cst_32 : f32 to vector<16x16xf32>
    %94 = arith.mulf %92, %93 : vector<16x16xf32>
    %95 = arith.addf %94, %24 : vector<16x16xf32>
    %cst_33 = arith.constant dense<0xFF800000> : vector<16xf32>
    %96 = vector.multi_reduction <maximumf>, %95, %cst_33 [1] : vector<16x16xf32> to vector<16xf32>
    %97 = vector.shape_cast %96 : vector<16xf32> to vector<16x1xf32>
    %98 = vector.broadcast %97 : vector<16x1xf32> to vector<16x16xf32>
    %99 = arith.subf %95, %98 : vector<16x16xf32>
    %100 = math.exp %99 : vector<16x16xf32>
    %cst_34 = arith.constant dense<0.000000e+00> : vector<16xf32>
    %101 = vector.multi_reduction <add>, %100, %cst_34 [1] : vector<16x16xf32> to vector<16xf32>
    %102 = vector.shape_cast %101 : vector<16xf32> to vector<16x1xf32>
    %103 = tpu.reciprocal %102 {approx = true} : vector<16x1xf32> -> vector<16x1xf32>
    %104 = vector.broadcast %103 : vector<16x1xf32> to vector<16x16xf32>
    %105 = arith.mulf %100, %104 : vector<16x16xf32>
    %106 = vector.broadcast %89 : vector<1x128xf32> to vector<16x128xf32>
    %107 = arith.mulf %22, %106 : vector<16x128xf32>
    %cst_35 = arith.constant dense<0.000000e+00> : vector<16x128xf32>
    %108 = tpu.matmul %105, %107, %cst_35 {dimension_numbers = #tpu.dot_dimension_numbers<[1], [0], [0], [1], [0, 0, 1, 1], [], []>} : vector<16x16xf32>, vector<16x128xf32>, vector<16x128xf32> -> vector<16x128xf32>
    %109 = arith.addf %88, %108 : vector<16x128xf32>
    %110 = arith.truncf %109 : vector<16x128xf32> to vector<16x128xbf16>
    %c0_36 = arith.constant 0 : index
    %c0_37 = arith.constant 0 : index
    %c0_38 = arith.constant 0 : index
    %111 = vector.load %arg14[%c0_36, %c0_37, %c0_38] : memref<1x128x128xbf16, #tpu.memory_space<vmem>>, vector<1x128x128xbf16>
    %112 = vector.shape_cast %111 : vector<1x128x128xbf16> to vector<128x128xbf16>
    %cst_39 = arith.constant dense<0.000000e+00> : vector<16x128xf32>
    %113 = tpu.matmul %110, %112, %cst_39 {dimension_numbers = #tpu.dot_dimension_numbers<[1], [0], [0], [1], [0, 0, 1, 1], [], []>} : vector<16x128xbf16>, vector<128x128xbf16>, vector<16x128xf32> -> vector<16x128xf32>
    %114 = vector.broadcast %6 : vector<1x128xf32> to vector<16x128xf32>
    %115 = arith.addf %113, %114 : vector<16x128xf32>
    %116 = arith.addf %3, %115 : vector<16x128xf32>
    %cst_40 = arith.constant dense<0.000000e+00> : vector<16xf32>
    %117 = vector.multi_reduction <add>, %116, %cst_40 [1] : vector<16x128xf32> to vector<16xf32>
    %118 = vector.shape_cast %117 : vector<16xf32> to vector<16x1xf32>
    %cst_41 = arith.constant 1.280000e+02 : f32
    %119 = vector.broadcast %cst_41 : f32 to vector<16x1xf32>
    %120 = arith.divf %118, %119 : vector<16x1xf32>
    %121 = vector.broadcast %120 : vector<16x1xf32> to vector<16x128xf32>
    %122 = arith.subf %116, %121 : vector<16x128xf32>
    %123 = arith.mulf %122, %122 : vector<16x128xf32>
    %cst_42 = arith.constant dense<0.000000e+00> : vector<16xf32>
    %124 = vector.multi_reduction <add>, %123, %cst_42 [1] : vector<16x128xf32> to vector<16xf32>
    %125 = vector.shape_cast %124 : vector<16xf32> to vector<16x1xf32>
    %cst_43 = arith.constant 1.280000e+02 : f32
    %126 = vector.broadcast %cst_43 : f32 to vector<16x1xf32>
    %127 = arith.divf %125, %126 : vector<16x1xf32>
    %128 = vector.broadcast %120 : vector<16x1xf32> to vector<16x128xf32>
    %129 = arith.subf %116, %128 : vector<16x128xf32>
    %cst_44 = arith.constant 9.99999974E-6 : f32
    %130 = vector.broadcast %cst_44 : f32 to vector<16x1xf32>
    %131 = arith.addf %127, %130 : vector<16x1xf32>
    %132 = math.rsqrt %131 : vector<16x1xf32>
    %133 = vector.broadcast %132 : vector<16x1xf32> to vector<16x128xf32>
    %134 = arith.mulf %129, %133 : vector<16x128xf32>
    %135 = vector.broadcast %7 : vector<1x128xf32> to vector<16x128xf32>
    %136 = arith.mulf %134, %135 : vector<16x128xf32>
    %137 = vector.broadcast %8 : vector<1x128xf32> to vector<16x128xf32>
    %138 = arith.addf %136, %137 : vector<16x128xf32>
    %139 = arith.truncf %138 : vector<16x128xf32> to vector<16x128xbf16>
    %c0_45 = arith.constant 0 : index
    %c0_46 = arith.constant 0 : index
    %c0_47 = arith.constant 0 : index
    %140 = vector.load %arg15[%c0_45, %c0_46, %c0_47] : memref<1x128x256xbf16, #tpu.memory_space<vmem>>, vector<1x128x256xbf16>
    %141 = vector.shape_cast %140 : vector<1x128x256xbf16> to vector<128x256xbf16>
    %cst_48 = arith.constant dense<0.000000e+00> : vector<16x256xf32>
    %142 = tpu.matmul %139, %141, %cst_48 {dimension_numbers = #tpu.dot_dimension_numbers<[1], [0], [0], [1], [0, 0, 1, 1], [], []>} : vector<16x128xbf16>, vector<128x256xbf16>, vector<16x256xf32> -> vector<16x256xf32>
    %c0_49 = arith.constant 0 : index
    %c0_50 = arith.constant 0 : index
    %c0_51 = arith.constant 0 : index
    %143 = vector.load %arg16[%c0_49, %c0_50, %c0_51] : memref<1x1x256xf32, #tpu.memory_space<vmem>>, vector<1x1x256xf32>
    %144 = vector.shape_cast %143 : vector<1x1x256xf32> to vector<1x256xf32>
    %145 = vector.broadcast %144 : vector<1x256xf32> to vector<16x256xf32>
    %146 = arith.addf %142, %145 : vector<16x256xf32>
    %cst_52 = arith.constant 5.000000e-01 : f32
    %147 = vector.broadcast %cst_52 : f32 to vector<16x256xf32>
    %148 = arith.mulf %147, %146 : vector<16x256xf32>
    %cst_53 = arith.constant 4.471500e-02 : f32
    %149 = vector.broadcast %cst_53 : f32 to vector<16x256xf32>
    %150 = arith.mulf %149, %146 : vector<16x256xf32>
    %151 = arith.mulf %150, %146 : vector<16x256xf32>
    %152 = arith.mulf %151, %146 : vector<16x256xf32>
    %153 = arith.addf %146, %152 : vector<16x256xf32>
    %cst_54 = arith.constant 0.797884583 : f32
    %154 = vector.broadcast %cst_54 : f32 to vector<16x256xf32>
    %155 = arith.mulf %154, %153 : vector<16x256xf32>
    %156 = math.tanh %155 : vector<16x256xf32>
    %cst_55 = arith.constant 1.000000e+00 : f32
    %157 = vector.broadcast %cst_55 : f32 to vector<16x256xf32>
    %158 = arith.addf %157, %156 : vector<16x256xf32>
    %159 = arith.mulf %148, %158 : vector<16x256xf32>
    %160 = arith.truncf %159 : vector<16x256xf32> to vector<16x256xbf16>
    %c0_56 = arith.constant 0 : index
    %c0_57 = arith.constant 0 : index
    %c0_58 = arith.constant 0 : index
    %161 = vector.load %arg17[%c0_56, %c0_57, %c0_58] : memref<1x256x128xbf16, #tpu.memory_space<vmem>>, vector<1x256x128xbf16>
    %162 = vector.shape_cast %161 : vector<1x256x128xbf16> to vector<256x128xbf16>
    %cst_59 = arith.constant dense<0.000000e+00> : vector<16x128xf32>
    %163 = tpu.matmul %160, %162, %cst_59 {dimension_numbers = #tpu.dot_dimension_numbers<[1], [0], [0], [1], [0, 0, 1, 1], [], []>} : vector<16x256xbf16>, vector<256x128xbf16>, vector<16x128xf32> -> vector<16x128xf32>
    %164 = vector.broadcast %9 : vector<1x128xf32> to vector<16x128xf32>
    %165 = arith.addf %163, %164 : vector<16x128xf32>
    %166 = arith.addf %138, %165 : vector<16x128xf32>
    %cst_60 = arith.constant dense<0.000000e+00> : vector<16xf32>
    %167 = vector.multi_reduction <add>, %166, %cst_60 [1] : vector<16x128xf32> to vector<16xf32>
    %168 = vector.shape_cast %167 : vector<16xf32> to vector<16x1xf32>
    %cst_61 = arith.constant 1.280000e+02 : f32
    %169 = vector.broadcast %cst_61 : f32 to vector<16x1xf32>
    %170 = arith.divf %168, %169 : vector<16x1xf32>
    %171 = vector.broadcast %170 : vector<16x1xf32> to vector<16x128xf32>
    %172 = arith.subf %166, %171 : vector<16x128xf32>
    %173 = arith.mulf %172, %172 : vector<16x128xf32>
    %cst_62 = arith.constant dense<0.000000e+00> : vector<16xf32>
    %174 = vector.multi_reduction <add>, %173, %cst_62 [1] : vector<16x128xf32> to vector<16xf32>
    %175 = vector.shape_cast %174 : vector<16xf32> to vector<16x1xf32>
    %cst_63 = arith.constant 1.280000e+02 : f32
    %176 = vector.broadcast %cst_63 : f32 to vector<16x1xf32>
    %177 = arith.divf %175, %176 : vector<16x1xf32>
    %178 = vector.broadcast %170 : vector<16x1xf32> to vector<16x128xf32>
    %179 = arith.subf %166, %178 : vector<16x128xf32>
    %cst_64 = arith.constant 9.99999974E-6 : f32
    %180 = vector.broadcast %cst_64 : f32 to vector<16x1xf32>
    %181 = arith.addf %177, %180 : vector<16x1xf32>
    %182 = math.rsqrt %181 : vector<16x1xf32>
    %183 = vector.broadcast %182 : vector<16x1xf32> to vector<16x128xf32>
    %184 = arith.mulf %179, %183 : vector<16x128xf32>
    %185 = vector.broadcast %10 : vector<1x128xf32> to vector<16x128xf32>
    %186 = arith.mulf %184, %185 : vector<16x128xf32>
    %187 = vector.broadcast %11 : vector<1x128xf32> to vector<16x128xf32>
    %188 = arith.addf %186, %187 : vector<16x128xf32>
    %c0_65 = arith.constant 0 : index
    %c0_66 = arith.constant 0 : index
    %189 = vector.load %arg20[%c0_65, %c0_66] : memref<16x128xf32, #tpu.memory_space<vmem>>, vector<16x128xf32>
    tpu.vector_store %arg20[%c0_65, %c0_66], %188 {strides = array<i32>} : memref<16x128xf32, #tpu.memory_space<vmem>>, vector<16x128xf32>,
    %c1_i32 = arith.constant 1 : i32
    %190 = arith.cmpi eq, %arg0, %c1_i32 : i32
    %191 = arith.extui %190 : i1 to i32
    %c0_i32_67 = arith.constant 0 : i32
    %192 = arith.cmpi ne, %191, %c0_i32_67 : i32
    scf.if %192 {
      %c0_68 = arith.constant 0 : index
      %c0_69 = arith.constant 0 : index
      %193 = vector.load %arg11[%c0_68, %c0_69] : memref<2x16xf32, #tpu.memory_space<vmem>>, vector<2x16xf32>
      %cst_70 = arith.constant dense<0.000000e+00> : vector<2x128xf32>
      %194 = tpu.matmul %193, %188, %cst_70 {dimension_numbers = #tpu.dot_dimension_numbers<[1], [0], [0], [1], [0, 0, 1, 1], [], []>} : vector<2x16xf32>, vector<16x128xf32>, vector<2x128xf32> -> vector<2x128xf32>
      %c0_71 = arith.constant 0 : index
      %c0_72 = arith.constant 0 : index
      %195 = vector.load %arg19[%c0_71, %c0_72] : memref<2x128xf32, #tpu.memory_space<vmem>>, vector<2x128xf32>
      tpu.vector_store %arg19[%c0_71, %c0_72], %194 {strides = array<i32>} : memref<2x128xf32, #tpu.memory_space<vmem>>, vector<2x128xf32>,
    } else {
    }
    return
  }
  func.func @transform_0(%arg0: i32) -> (i32, i32) {
    %c0_i32 = arith.constant 0 : i32
    %c0_i32_0 = arith.constant 0 : i32
    %c0_i32_1 = arith.constant 0 : i32
    return %c0_i32, %c0_i32_0 : i32, i32
  }
  func.func @transform_1(%arg0: i32) -> (i32, i32) {
    %c0_i32 = arith.constant 0 : i32
    %c0_i32_0 = arith.constant 0 : i32
    %c0_i32_1 = arith.constant 0 : i32
    return %c0_i32, %c0_i32_0 : i32, i32
  }
  func.func @transform_2(%arg0: i32) -> (i32, i32, i32) {
    %c0_i32 = arith.constant 0 : i32
    %c0_i32_0 = arith.constant 0 : i32
    %c0_i32_1 = arith.constant 0 : i32
    %c0_i32_2 = arith.constant 0 : i32
    return %c0_i32, %c0_i32_0, %c0_i32_1 : i32, i32, i32
  }
  func.func @transform_3(%arg0: i32) -> (i32, i32, i32) {
    %c0_i32 = arith.constant 0 : i32
    %c0_i32_0 = arith.constant 0 : i32
    %c0_i32_1 = arith.constant 0 : i32
    %c0_i32_2 = arith.constant 0 : i32
    return %c0_i32, %c0_i32_0, %c0_i32_1 : i32, i32, i32
  }
  func.func @transform_4(%arg0: i32) -> (i32, i32, i32) {
    %c0_i32 = arith.constant 0 : i32
    %c0_i32_0 = arith.constant 0 : i32
    %c0_i32_1 = arith.constant 0 : i32
    %c0_i32_2 = arith.constant 0 : i32
    return %c0_i32, %c0_i32_0, %c0_i32_1 : i32, i32, i32
  }
  func.func @transform_5(%arg0: i32) -> (i32, i32, i32) {
    %c0_i32 = arith.constant 0 : i32
    %c0_i32_0 = arith.constant 0 : i32
    %c0_i32_1 = arith.constant 0 : i32
    %c0_i32_2 = arith.constant 0 : i32
    return %c0_i32, %c0_i32_0, %c0_i32_1 : i32, i32, i32
  }
  func.func @transform_6(%arg0: i32) -> (i32, i32) {
    %c0_i32 = arith.constant 0 : i32
    %c0_i32_0 = arith.constant 0 : i32
    %c0_i32_1 = arith.constant 0 : i32
    return %c0_i32, %c0_i32_0 : i32, i32
  }
  func.func @transform_7(%arg0: i32) -> (i32, i32) {
    %c0_i32 = arith.constant 0 : i32
    %c0_i32_0 = arith.constant 0 : i32
    %c0_i32_1 = arith.constant 0 : i32
    return %c0_i32, %c0_i32_0 : i32, i32
  }
  func.func @transform_8(%arg0: i32) -> (i32, i32) {
    %c0_i32 = arith.constant 0 : i32
    %c0_i32_0 = arith.constant 0 : i32
    %c0_i32_1 = arith.constant 0 : i32
    return %c0_i32, %c0_i32_0 : i32, i32
  }
  func.func @transform_9(%arg0: i32) -> (i32, i32) {
    %c0_i32 = arith.constant 0 : i32
    %c0_i32_0 = arith.constant 0 : i32
    %c0_i32_1 = arith.constant 0 : i32
    return %c0_i32, %c0_i32_0 : i32, i32
  }
  func.func @transform_10(%arg0: i32) -> (i32, i32) {
    %c0_i32 = arith.constant 0 : i32
    %c0_i32_0 = arith.constant 0 : i32
    %c0_i32_1 = arith.constant 0 : i32
    return %c0_i32, %c0_i32_0 : i32, i32
  }
  func.func @transform_11(%arg0: i32) -> (i32, i32, i32) {
    %c0_i32 = arith.constant 0 : i32
    %c0_i32_0 = arith.constant 0 : i32
    %c0_i32_1 = arith.constant 0 : i32
    return %arg0, %c0_i32, %c0_i32_0 : i32, i32, i32
  }
  func.func @transform_12(%arg0: i32) -> (i32, i32, i32) {
    %c0_i32 = arith.constant 0 : i32
    %c0_i32_0 = arith.constant 0 : i32
    %c0_i32_1 = arith.constant 0 : i32
    return %arg0, %c0_i32, %c0_i32_0 : i32, i32, i32
  }
  func.func @transform_13(%arg0: i32) -> (i32, i32, i32) {
    %c0_i32 = arith.constant 0 : i32
    %c0_i32_0 = arith.constant 0 : i32
    %c0_i32_1 = arith.constant 0 : i32
    return %arg0, %c0_i32, %c0_i32_0 : i32, i32, i32
  }
  func.func @transform_14(%arg0: i32) -> (i32, i32, i32) {
    %c0_i32 = arith.constant 0 : i32
    %c0_i32_0 = arith.constant 0 : i32
    %c0_i32_1 = arith.constant 0 : i32
    return %arg0, %c0_i32, %c0_i32_0 : i32, i32, i32
  }
  func.func @transform_15(%arg0: i32) -> (i32, i32, i32) {
    %c0_i32 = arith.constant 0 : i32
    %c0_i32_0 = arith.constant 0 : i32
    %c0_i32_1 = arith.constant 0 : i32
    return %arg0, %c0_i32, %c0_i32_0 : i32, i32, i32
  }
  func.func @transform_16(%arg0: i32) -> (i32, i32, i32) {
    %c0_i32 = arith.constant 0 : i32
    %c0_i32_0 = arith.constant 0 : i32
    %c0_i32_1 = arith.constant 0 : i32
    return %arg0, %c0_i32, %c0_i32_0 : i32, i32, i32
  }
  func.func @transform_17(%arg0: i32) -> (i32, i32, i32) {
    %c0_i32 = arith.constant 0 : i32
    %c0_i32_0 = arith.constant 0 : i32
    %c0_i32_1 = arith.constant 0 : i32
    return %arg0, %c0_i32, %c0_i32_0 : i32, i32, i32
  }
  func.func @transform_18(%arg0: i32) -> (i32, i32) {
    %c0_i32 = arith.constant 0 : i32
    %c0_i32_0 = arith.constant 0 : i32
    %c0_i32_1 = arith.constant 0 : i32
    return %c0_i32, %c0_i32_0 : i32, i32
  }
}

</mosaic_0001>

<bundles_post_ra>
// kernel: distilhubert_forward.1
= control target key start
LH: loop header
LB: loop body
LE: loop exit
PB: predicated region body
PF: predicated region fallthrough
CT: control target
= control target key end

     0   :  { %s6197_s0 = inlined_call_operand.vmem [shape: bf16[128,128], index: 0, kind: input, shape index: {}]   ;;  %s6198_s1 = inlined_call_operand.vmem [shape: bf16[128,128], index: 1, kind: input, shape index: {}]   ;;  %s6199_s2 = inlined_call_operand.hbm [shape: bf16[4,32,128], index: 2, kind: input, shape index: {}]   ;;  %s6200_s3 = inlined_call_operand.hbm [shape: bf16[4,128,128], index: 3, kind: input, shape index: {}]   ;;  %s6201_s4 = inlined_call_operand.vmem [shape: bf16[2,16,32], index: 4, kind: input, shape index: {}]   ;;  %s6202_s5 = inlined_call_operand.vmem [shape: bf16[2,128,128], index: 5, kind: input, shape index: {}]   ;;  %s6203_s6 = inlined_call_operand.hbm [shape: bf16[128,128], index: 6, kind: input, shape index: {}]   ;;  %s6204_s7 = inlined_call_operand.vmem [shape: f32[8,128], index: 7, kind: input, shape index: {}]   ;;  %s6205_s8 = inlined_call_operand.hbm [shape: f32[4,128], index: 8, kind: input, shape index: {}]   ;;  %s6206_s9 = inlined_call_operand.hbm [shape: f32[16,16], index: 9, kind: input, shape index: {}]   ;;  %s6207_s10 = inlined_call_operand.hbm [shape: f32[2,16], index: 10, kind: input, shape index: {}]   ;;  %s6208_s11 = inlined_call_operand.hbm [shape: bf16[2,128,384], index: 11, kind: input, shape index: {}]   ;;  %s6209_s12 = inlined_call_operand.hbm [shape: f32[2,1,384], index: 12, kind: input, shape index: {}]   ;;  %s6210_s13 = inlined_call_operand.hbm [shape: bf16[2,128,128], index: 13, kind: input, shape index: {}]   ;;  %s6211_s14 = inlined_call_operand.hbm [shape: bf16[2,128,256], index: 14, kind: input, shape index: {}]   ;;  %s6212_s15 = inlined_call_operand.hbm [shape: f32[2,1,256], index: 15, kind: input, shape index: {}]   ;;  %s6213_s16 = inlined_call_operand.hbm [shape: bf16[2,256,128], index: 16, kind: input, shape index: {}]   ;;  %s6214_s17 = inlined_call_operand.hbm [shape: f32[2,8,128], index: 17, kind: input, shape index: {}]   ;;  %s6215_s18 = inlined_call_operand.hbm [shape: f32[2,128], index: 18, kind: output, shape index: {}]  }
   0x1   :  { %6238 = sst [smem:[#allocation35_spill]] %s6197_s0 }
   0x2   :  { %6239 = sst [smem:[#allocation36_spill]] %s6198_s1 }
   0x3   :  { %6240 = sst [smem:[#allocation37_spill]] %s6199_s2 }
   0x4   :  { %6241 = sst [smem:[#allocation38_spill]] %s6201_s4 }
   0x5   :  { %6242 = sst [smem:[#allocation39_spill]] %s6202_s5 }
   0x6   :  { %6243 = sst [smem:[#allocation40_spill]] %s6203_s6 }
   0x7   :  { %6244 = sst [smem:[#allocation41_spill]] %s6204_s7 }
   0x8   :  { %6245 = sst [smem:[#allocation42_spill]] %s6206_s9 }
   0x9   :  { %6246 = sst [smem:[#allocation43_spill]] %s6207_s10 }
   0xa   :  { %6247 = sst [smem:[#allocation44_spill]] %s6208_s11 }
   0xb   :  { %6248 = sst [smem:[#allocation45_spill]] %s6214_s17 }
   0xc   :  { %6249 = sst [smem:[#allocation46_spill]] %s6215_s18 }
   0xd   :  { %23 = vsyncpa [#allocation4], 0 }
   0xe   :  { %24 = vsyncpa [#allocation7], 0 }
   0xf   :  { %25 = vsyncpa [#allocation10], 0 }
  0x10   :  { %26 = vsyncpa [#allocation13], 0 }
  0x11   :  { %27 = vsyncpa [#allocation5], 0  ;;  %s5299_s27 = smov 0   ;;  %s5301_s28 = smov 0  }
  0x12   :  { %s5303_s29 = smov 0   ;;  %s5305_s30 = smov 0  }
  0x13 LB: > { %6250 = sst [smem:[#allocation28_spill]] %s5178_s28  ;;  %s5318_s0 = sadd.s32 4294967295, %s5186_s30   ;;  %s5186_s30 = sphi %s5305_s30, %s6287_s30   ;;  %s5182_s29 = sphi %s5303_s29, %s6290_s29   ;;  %s5178_s28 = sphi %s5301_s28, %s6289_s28   ;;  %s5174_s27 = sphi %s5299_s27, %s6288_s27  }
  0x14   : > { %6251 = sst [smem:[#allocation29_spill]] %s5182_s29  ;;  %p284_p0 = scmp.ne.s32.totalorder %s5178_s28, %s5174_s27 }
  0x15   : > { %6252 = sst [smem:[#allocation30_spill]] %s5318_s0  ;;  %p285_p1 = scmp.eq.s32.totalorder %s5318_s0, 0 }
  0x16   : > { %p3667_p2 = scmp.ge.s32.totalorder %s5186_s30, 1  ;;  %p472_p3 = scmp.lt.s32.totalorder %s5186_s30, 3 }
  0x17   : > { %p5327_p5 = por %p285_p1, %p284_p0  ;;  %s6255_s21 = sld [smem:[#allocation37_spill]] }
  0x18   : > { %p5334_p6 = pnand %p3667_p2, %p472_p3  ;;  %s5188_s23 = smov [#allocation3]  }
  0x19   : > { %s6253_s19 = scalar_select %p5327_p5, 1, 0 }
  0x1a   : > { %s6256_s2 = scalar_select %p5334_p6, 1, 0 }
  0x1b   : > { %6254 = sst [smem:[#allocation31_spill]] %s6253_s19  ;;  %p4499_p7 = pneg %p5334_p6 }
  0x1c   : > { %6257 = sst [smem:[#allocation32_spill]] %s6256_s2  ;;  %s491_s24 = sshll.u32 %s5188_s23, 4  ;;  %s492_s24 = int_to_ptr.vmem [resolvable:$true] %s491_s24 }
  0x1d   : > { %s489_s22 = sshll.u32 %s6255_s21, 4  ;;  %p5342_p8 = pnand %p4499_p7, %p285_p1  ;;  %s490_s22 = int_to_ptr.hbm [resolvable:$true] %s489_s22 }
  0x1e   : > { %s5347_s26 = sadd.s32 1, %s5186_s30   ;;  %s6221_s27 = smov 64  }
  0x1f   : > { %6259 = sst [smem:[#allocation33_spill]] %s5347_s26  ;;  %s6223_s1 = smov 4  }
  0x20   : > { %4502 = dma.hbm_to_vmem [thread:$0]  (!%p5342_p8), %s490_s22, 1024, %s492_s24, [#allocation4], %s6221_s27, %s6221_s27, %s6223_s1  }
  0x21   : > { %s268_s20 = ssub.s32 %s5186_s30, %s5347_s26  ;;  %s271_s21 = sadd.s32 1, %s5182_s29 }
  0x22   : > { %p269_p9 = scmp.eq.s32.totalorder %s268_s20, 0  ;;  %p278_p10 = scmp.ne.s32.totalorder %s5182_s29, %s5178_s28 }
  0x23   : > { %p279_p11 = scmp.eq.s32.totalorder %s5186_s30, 0  ;;  %p4546_p12 = scmp.lt.s32.totalorder %s5186_s30, 2 }
  0x24   : > { %s5362_s23 = scalar_select %p269_p9, %s5182_s29, %s271_s21  }
  0x25   : > { %p280_p13 = por %p279_p11, %p278_p10  ;;  %s580_s18 = sand.u32 1, %s5186_s30  }
  0x26   : > { %6260 = sst [smem:[#allocation34_spill]] %s5362_s23  ;;  %s5366_s4 = sand.u32 1, %s5182_s29  }
  0x27   : > { %s4451_s5 = smul.u32 192, %s5366_s4  ;;  %p5369_p0 = pnand %p4546_p12, %p280_p13 }
  0x28   : > { %s4452_s22 = smul.u32 192, %s5186_s30  ;;  %s6262_s11 = sld [smem:[#allocation44_spill]] }
  0x29   : > { %s584_s1 = scalar_lea.vmem [#allocation14], %s4451_s5  ;;  %s5377_s23 = scalar_lea.sflag [#allocation4], %s580_s18 }
  0x2a   : > { %s592_s26 = sshll.u32 %s584_s1, 4  ;;  %p5381_p3 = pneg %p5369_p0  ;;  %s593_s26 = int_to_ptr.vmem [resolvable:$true] %s592_s26 }
  0x2e   : > { %s589_s20 = scalar_lea.hbm %s6262_s11, %s4452_s22  ;;  %s4751_s1 = scalar_lea.hbm %s6262_s11, 384 }
  0x2f   : > { %s590_s21 = sshll.u32 %s589_s20, 4  ;;  %s591_s21 = int_to_ptr.hbm [resolvable:$true] %s590_s21 }
  0x30   : > { %s4744_s29 = sshra.s32 %s591_s21, 4  ;;  %s4745_s29 = int_to_ptr.hbm [resolvable:$true] %s4744_s29 }
  0x31   : > { %s4746_s19 = scalar_lea.hbm %s4745_s29, 192  ;;  %p4752_p10 = scmp.lt.s32.totalorder %s4745_s29, %s6262_s11 }
  0x32   : > { %p4747_p2 = scmp.ne.s32.totalorder %s4745_s29, %s4746_s19  ;;  %p4753_p11 = scmp.lt.s32.totalorder %s4751_s1, %s4746_s19 }
  0x34   : > { %p4749_p7 = pnand %p5381_p3, %p4747_p2  ;;  %p4754_p12 = por %p4753_p11, %p4752_p10 }
  0x36   : > { %p4750_p9 = pneg %p4749_p7 }
  0x38   : > { %p4755_p13 = pnand %p4754_p12, %p4750_p9 }
  0x3a   : > { %4758 = shalt.err (!%p4755_p13)
}
  0x3b   : > { %s5191_s24 = smov 192   ;;  %s5192_s20 = smov 12  }
  0x3c   : > { %4521 = dma.hbm_to_vmem [thread:$0]  (!%p5369_p0), %s591_s21, 3072, %s593_s26, %s5377_s23, %s5191_s24, %s5191_s24, %s5192_s20  }
  0x3d   : > { %s4453_s5 = smul.u32 3, %s5366_s4  ;;  %s3676_s27 = sshll.u32 %s5366_s4, 6 }
  0x3e   : > { %s4454_s0 = smul.u32 3, %s5186_s30  ;;  %s4302_s22 = sshll.u32 %s5186_s30, 6 }
  0x3f   : > { %s606_s18 = scalar_lea.vmem [#allocation15], %s4453_s5  ;;  %s630_s9 = scalar_lea.hbm %s6210_s13, %s4302_s22 }
  0x40   : > { %s610_s1 = scalar_lea.hbm %s6209_s12, %s4454_s0  ;;  %s614_s11 = sshll.u32 %s606_s18, 4  ;;  %s615_s11 = int_to_ptr.vmem [resolvable:$true] %s614_s11 }
  0x41   : > { %s612_s2 = sshll.u32 %s610_s1, 4  ;;  %s4781_s0 = scalar_lea.hbm %s6209_s12, 6  ;;  %s613_s2 = int_to_ptr.hbm [resolvable:$true] %s612_s2 }
  0x42   : > { %s4774_s6 = sshra.s32 %s613_s2, 4  ;;  %s4775_s6 = int_to_ptr.hbm [resolvable:$true] %s4774_s6 }
  0x43   : > { %s4776_s26 = scalar_lea.hbm %s4775_s6, 3  ;;  %p4782_p10 = scmp.lt.s32.totalorder %s4775_s6, %s6209_s12 }
  0x44   : > { %p4777_p2 = scmp.ne.s32.totalorder %s4775_s6, %s4776_s26  ;;  %p4783_p11 = scmp.lt.s32.totalorder %s4781_s0, %s4776_s26 }
  0x46   : > { %p4779_p7 = pnand %p4777_p2, %p5381_p3  ;;  %p4784_p12 = por %p4783_p11, %p4782_p10 }
  0x48   : > { %p4780_p9 = pneg %p4779_p7 }
  0x4a   : > { %p4785_p13 = pnand %p4784_p12, %p4780_p9 }
  0x4c   : > { %4788 = shalt.err (!%p4785_p13)
}
  0x4d   : > { %4524 = dma.hbm_to_vmem [thread:$0]  (!%p5369_p0), %s613_s2, 48, %s615_s11, %s5377_s23  }
  0x4e   : > { %s631_s10 = sshll.u32 %s630_s9, 4  ;;  %s625_s17 = scalar_lea.vmem [#allocation16], %s3676_s27  ;;  %s632_s10 = int_to_ptr.hbm [resolvable:$true] %s631_s10 }
  0x4f   : > { %s633_s22 = sshll.u32 %s625_s17, 4  ;;  %s4804_s29 = sshra.s32 %s632_s10, 4  ;;  %s634_s22 = int_to_ptr.vmem [resolvable:$true] %s633_s22  ;;  %s4805_s29 = int_to_ptr.hbm [resolvable:$true] %s4804_s29 }
  0x50   : > { %s4806_s19 = scalar_lea.hbm %s4805_s29, 64  ;;  %s4811_s18 = scalar_lea.hbm %s6210_s13, 128 }
  0x51   : > { %p4807_p2 = scmp.ne.s32.totalorder %s4805_s29, %s4806_s19  ;;  %p4812_p9 = scmp.lt.s32.totalorder %s4805_s29, %s6210_s13 }
  0x52   : > { %p4813_p10 = scmp.lt.s32.totalorder %s4811_s18, %s4806_s19 }
  0x53   : > { %p4809_p7 = pnand %p4807_p2, %p5381_p3 }
  0x54   : > { %p4814_p11 = por %p4813_p10, %p4812_p9 }
  0x55   : > { %p4810_p4 = pneg %p4809_p7 }
  0x57   : > { %p4815_p12 = pnand %p4814_p11, %p4810_p4 }
  0x59   : > { %4818 = shalt.err (!%p4815_p12)
}
  0x5a   : > { %s6264_s9 = smov 4   ;;  %s6265_s11 = smov 64  }
  0x5b   : > { %4527 = dma.hbm_to_vmem [thread:$0]  (!%p5369_p0), %s632_s10, 1024, %s634_s22, %s5377_s23, %s6265_s11, %s6265_s11, %s6264_s9  }
  0x5c   : > { %s6235_s2 = sshll.u32 %s5366_s4, 7  ;;  %s4303_s27 = sshll.u32 %s5186_s30, 7 }
  0x5d   : > { %s652_s20 = scalar_lea.hbm %s6211_s14, %s4303_s27  ;;  %s647_s17 = scalar_lea.vmem [#allocation17], %s6235_s2 }
  0x5e   : > { %s653_s5 = sshll.u32 %s652_s20, 4  ;;  %s655_s29 = sshll.u32 %s647_s17, 4  ;;  %s654_s5 = int_to_ptr.hbm [resolvable:$true] %s653_s5  ;;  %s656_s29 = int_to_ptr.vmem [resolvable:$true] %s655_s29 }
  0x5f   : > { %s4834_s19 = sshra.s32 %s654_s5, 4  ;;  %s4841_s1 = scalar_lea.hbm %s6211_s14, 256  ;;  %s4835_s19 = int_to_ptr.hbm [resolvable:$true] %s4834_s19 }
  0x60   : > { %s4836_s6 = scalar_lea.hbm %s4835_s19, 128  ;;  %p4842_p7 = scmp.lt.s32.totalorder %s4835_s19, %s6211_s14 }
  0x61   : > { %p4837_p4 = scmp.ne.s32.totalorder %s4835_s19, %s4836_s6  ;;  %p4843_p9 = scmp.lt.s32.totalorder %s4841_s1, %s4836_s6 }
  0x63   : > { %p4839_p13 = pnand %p4837_p4, %p5381_p3  ;;  %p4844_p10 = por %p4843_p9, %p4842_p7 }
  0x65   : > { %p4840_p2 = pneg %p4839_p13 }
  0x67   : > { %p4845_p11 = pnand %p4844_p10, %p4840_p2 }
  0x69   : > { %4848 = shalt.err (!%p4845_p11)
}
  0x6a   : > { %s6236_s21 = smov 128   ;;  %s6237_s24 = smov 8  }
  0x6b   : > { %4530 = dma.hbm_to_vmem [thread:$0]  (!%p5369_p0), %s654_s5, 2048, %s656_s29, %s5377_s23, %s6236_s21, %s6236_s21, %s6237_s24  }
  0x6c   : > { %s3682_s0 = sshll.u32 %s5366_s4, 1  ;;  %s3683_s20 = sshll.u32 %s5186_s30, 1 }
  0x6d   : > { %s673_s6 = scalar_lea.hbm %s6212_s15, %s3683_s20  ;;  %s669_s22 = scalar_lea.vmem [#allocation18], %s3682_s0 }
  0x6e   : > { %s675_s10 = sshll.u32 %s673_s6, 4  ;;  %s677_s1 = sshll.u32 %s669_s22, 4  ;;  %s676_s10 = int_to_ptr.hbm [resolvable:$true] %s675_s10  ;;  %s678_s1 = int_to_ptr.vmem [resolvable:$true] %s677_s1 }
  0x6f   : > { %s4864_s18 = sshra.s32 %s676_s10, 4  ;;  %s4871_s29 = scalar_lea.hbm %s6212_s15, 4  ;;  %s4865_s18 = int_to_ptr.hbm [resolvable:$true] %s4864_s18 }
  0x70   : > { %s4866_s26 = scalar_lea.hbm %s4865_s18, 2  ;;  %p4872_p2 = scmp.lt.s32.totalorder %s4865_s18, %s6212_s15 }
  0x71   : > { %p4867_p12 = scmp.ne.s32.totalorder %s4865_s18, %s4866_s26  ;;  %p4873_p7 = scmp.lt.s32.totalorder %s4871_s29, %s4866_s26 }
  0x73   : > { %p4869_p4 = pnand %p4867_p12, %p5381_p3  ;;  %p4874_p9 = por %p4873_p7, %p4872_p2 }
  0x75   : > { %p4870_p13 = pneg %p4869_p4 }
  0x77   : > { %p4875_p10 = pnand %p4874_p9, %p4870_p13 }
  0x79   : > { %4878 = shalt.err (!%p4875_p10)
}
  0x7a   : > { %4533 = dma.hbm_to_vmem [thread:$0]  (!%p5369_p0), %s676_s10, 32, %s678_s1, %s5377_s23  }
  0x7b   : > { %s503_s2 = sshll.u32 %s6200_s3, 4  ;;  %s5195_s17 = smov [#allocation6]   ;;  %s504_s2 = int_to_ptr.hbm [resolvable:$true] %s503_s2 }
  0x7c   : > { %s505_s21 = sshll.u32 %s5195_s17, 4  ;;  %s541_s6 = sshll.u32 %s6205_s8, 4  ;;  %s506_s21 = int_to_ptr.vmem [resolvable:$true] %s505_s21  ;;  %s542_s6 = int_to_ptr.hbm [resolvable:$true] %s541_s6 }
  0x7d   : > { %4505 = dma.hbm_to_vmem [thread:$0]  (!%p5342_p8), %s504_s2, 4096, %s506_s21, [#allocation7], %s6265_s11, %s6265_s11, %s6264_s9  }
  0x7e   : > { %s5196_s10 = smov [#allocation9]   ;;  %s693_s26 = scalar_lea.hbm %s6213_s16, %s4303_s27 }
  0x7f   : > { %s543_s22 = sshll.u32 %s5196_s10, 4  ;;  %s694_s5 = sshll.u32 %s693_s26, 4  ;;  %s544_s22 = int_to_ptr.vmem [resolvable:$true] %s543_s22  ;;  %s695_s5 = int_to_ptr.hbm [resolvable:$true] %s694_s5 }
  0x80   : > { %4511 = dma.hbm_to_vmem [thread:$0]  (!%p5342_p8), %s542_s6, 64, %s544_s22, [#allocation10]  }
  0x81   : > { %s6266_s29 = sshll.u32 %s5366_s4, 7  ;;  %s4954_s17 = sshra.s32 %s695_s5, 4  ;;  %s4955_s17 = int_to_ptr.hbm [resolvable:$true] %s4954_s17 }
  0x82   : > { %s688_s0 = scalar_lea.vmem [#allocation19], %s6266_s29  ;;  %s4956_s2 = scalar_lea.hbm %s4955_s17, 128 }
  0x83   : > { %s696_s20 = sshll.u32 %s688_s0, 4  ;;  %p4957_p11 = scmp.ne.s32.totalorder %s4955_s17, %s4956_s2  ;;  %s697_s20 = int_to_ptr.vmem [resolvable:$true] %s696_s20 }
  0x84   : > { %s4961_s19 = scalar_lea.hbm %s6213_s16, 256  ;;  %p4962_p13 = scmp.lt.s32.totalorder %s4955_s17, %s6213_s16 }
  0x85   : > { %p4959_p12 = pnand %p4957_p11, %p5381_p3  ;;  %p4963_p2 = scmp.lt.s32.totalorder %s4961_s19, %s4956_s2 }
  0x87   : > { %p4960_p4 = pneg %p4959_p12  ;;  %p4964_p7 = por %p4963_p2, %p4962_p13 }
  0x89   : > { %p4965_p9 = pnand %p4964_p7, %p4960_p4 }
  0x8b   : > { %4968 = shalt.err (!%p4965_p9)
}
  0x8c   : > { %4536 = dma.hbm_to_vmem [thread:$0]  (!%p5369_p0), %s695_s5, 2048, %s697_s20, %s5377_s23, %s6265_s11, %s6265_s11, %s6264_s9  }
  0x8d   : > { %s6267_s1 = sld [smem:[#allocation40_spill]]  ;;  %s5197_s26 = smov [#allocation8]  }
  0x8e   : > { %s525_s29 = sshll.u32 %s5197_s26, 4  ;;  %s6268_s2 = sld [smem:[#allocation42_spill]]  ;;  %s526_s29 = int_to_ptr.vmem [resolvable:$true] %s525_s29 }
  0x8f   : > { %s5198_s5 = smov [#allocation11]   ;;  %s6269_s27 = sld [smem:[#allocation43_spill]] }
  0x90   : > { %s554_s20 = sshll.u32 %s5198_s5, 4  ;;  %s6270_s6 = smov 8   ;;  %s555_s20 = int_to_ptr.vmem [resolvable:$true] %s554_s20 }
  0x91   : > { %s6271_s22 = smov 128   ;;  %s5199_s26 = smov [#allocation12]  }
  0x92   : > { %s569_s0 = sshll.u32 %s5199_s26, 4  ;;  %s570_s0 = int_to_ptr.vmem [resolvable:$true] %s569_s0 }
  0x93   : > { %s523_s18 = sshll.u32 %s6267_s1, 4  ;;  %s3687_s1 = sshll.u32 %s5366_s4, 3  ;;  %s524_s18 = int_to_ptr.hbm [resolvable:$true] %s523_s18 }
  0x94   : > { %s552_s21 = sshll.u32 %s6268_s2, 4  ;;  %s710_s5 = scalar_lea.vmem [#allocation20], %s3687_s1  ;;  %s553_s21 = int_to_ptr.hbm [resolvable:$true] %s552_s21 }
  0x95   : > { %4508 = dma.hbm_to_vmem [thread:$0]  (!%p5342_p8), %s524_s18, 1024, %s526_s29, [#allocation7], %s6265_s11, %s6265_s11, %s6264_s9  }
  0x96   : > { %s567_s10 = sshll.u32 %s6269_s27, 4  ;;  %s3688_s9 = sshll.u32 %s5186_s30, 3  ;;  %s568_s10 = int_to_ptr.hbm [resolvable:$true] %s567_s10 }
  0x97   : > { %4514 = dma.hbm_to_vmem [thread:$0]  (!%p5342_p8), %s553_s21, 256, %s555_s20, [#allocation10], %s6271_s22, %s6271_s22, %s6270_s6  }
  0x98   : > { %4517 = dma.hbm_to_vmem [thread:$0]  (!%p5342_p8), %s568_s10, 32, %s570_s0, [#allocation13]  }
  0x99   : > { %s6272_s29 = sld [smem:[#allocation45_spill]]  ;;  %s718_s24 = sshll.u32 %s710_s5, 4  ;;  %s719_s24 = int_to_ptr.vmem [resolvable:$true] %s718_s24 }
  0x9f   : > { %s6273_s17 = smov %s6272_s29  ;;  %s714_s2 = scalar_lea.hbm %s6272_s29, %s3688_s9 }
  0xa0   : > { %s716_s19 = sshll.u32 %s714_s2, 4  ;;  %s5081_s25 = scalar_lea.hbm %s6273_s17, 16  ;;  %s717_s19 = int_to_ptr.hbm [resolvable:$true] %s716_s19 }
  0xa1   : > { %s5074_s27 = sshra.s32 %s717_s19, 4  ;;  %s5075_s27 = int_to_ptr.hbm [resolvable:$true] %s5074_s27 }
  0xa2   : > { %s5076_s21 = scalar_lea.hbm %s5075_s27, 8  ;;  %p5082_p8 = scmp.lt.s32.totalorder %s5075_s27, %s6273_s17 }
  0xa3   : > { %p5077_p10 = scmp.ne.s32.totalorder %s5075_s27, %s5076_s21  ;;  %p5083_p4 = scmp.lt.s32.totalorder %s5081_s25, %s5076_s21 }
  0xa5   : > { %p5079_p11 = pnand %p5077_p10, %p5381_p3  ;;  %p5084_p13 = por %p5083_p4, %p5082_p8 }
  0xa7   : > { %p5080_p12 = pneg %p5079_p11 }
  0xa9   : > { %p5085_p2 = pnand %p5084_p13, %p5080_p12 }
  0xab   : > { %5088 = shalt.err (!%p5085_p2)
}
  0xac   : > { %4539 = dma.hbm_to_vmem [thread:$0]  (!%p5369_p0), %s717_s19, 128, %s719_s24, %s5377_s23  }
  0xad   : > { %727 = sbr.rel (%p5334_p6) target bundleno = 4348 (0x10fc), region = 92  ;;  %s6275_s28 = sld [smem:[#allocation30_spill]] (!%p5334_p6) }
  0xb2   : > { %5149 = dma.done.wait (%p285_p1), [#allocation4], 1024  }
  0xb3   : > { %5151 = vsyncadd (%p285_p1), [#allocation4], 4294966272 }
  0xb4   : > { %5153 = dma.done.wait (%p285_p1), [#allocation7], 5120  }
  0xb5   : > { %5155 = vsyncadd (%p285_p1), [#allocation7], 4294962176 }
  0xb6   : > { %5157 = dma.done.wait (%p285_p1), [#allocation10], 320  }
  0xb7   : > { %5159 = vsyncadd (%p285_p1), [#allocation10], 4294966976 }
  0xb8   : > { %5161 = dma.done.wait (%p285_p1), [#allocation13], 32  }
  0xb9   : > { %5163 = vsyncadd (%p285_p1), [#allocation13], 4294967264  ;;  %s6276_s7 = sld [smem:[#allocation28_spill]]  ;;  %s759_s22 = sand.u32 1, %s6275_s28  }
  0xba   : > { %s760_s0 = scalar_lea.sflag [#allocation4], %s759_s22 }
  0xbf   : > { %s761_s1 = sand.u32 1, %s6276_s7  }
  0xc0   : > { %s4455_s26 = smul.u32 192, %s761_s1 }
  0xc2   : > { %s5561_s9 = scalar_lea.vmem [#allocation14], %s4455_s26 }
  0xc3   : > { %5165 = dma.done.wait (%p5327_p5), %s760_s0, 8400  }
  0xc4   : > { %5167 = vsyncadd (%p5327_p5), %s760_s0, 4294958896  ;;  %s4456_s11 = smul.u32 3, %s761_s1  ;;  %s3696_s18 = sshll.u32 %s761_s1, 6 }
  0xc5   : > { %s3697_s29 = sshll.u32 %s761_s1, 7  ;;  %s3698_s2 = sshll.u32 %s761_s1, 1 }
  0xc6   : > { %s3700_s5 = sshll.u32 %s761_s1, 3  ;;  %s5567_s24 = scalar_lea.vmem [#allocation15], %s4456_s11 }
  0xc7   : > { %s5569_s19 = scalar_lea.vmem [#allocation16], %s3696_s18  ;;  %s5571_s27 = scalar_lea.vmem [#allocation17], %s3697_s29 }
  0xc8   : > { %s5573_s21 = scalar_lea.vmem [#allocation18], %s3698_s2  ;;  %s5575_s4 = scalar_lea.vmem [#allocation19], %s3697_s29 }
  0xc9   : > { %s5577_s30 = scalar_lea.vmem [#allocation20], %s3700_s5  ;;  %p6278_p1 = scmp.ne.s32.totalorder %s6275_s28, 0 }
  0xca   : > { %s6279_s10 = sld [smem:[#allocation36_spill]] (!%p6278_p1) }
  0xcb   : > { %906 = sbr.rel (%p6278_p1) target bundleno = 2102 (0x836), region = 148  ;;  %s6280_s7 = sld [smem:[#allocation35_spill]] (!%p6278_p1) }
  0xcc   : > { %s6281_s1 = sld [smem:[#allocation41_spill]] (!%p6278_p1) }
  0xcd   : > { %s6282_s0 = sld [smem:[#allocation39_spill]] (!%p6278_p1) }
  0xce   : > { %s6283_s23 = sld [smem:[#allocation38_spill]] (!%p6278_p1) }
  0xd0   : > { %v4320_v0 = vld [vmem:[%s6279_s10 + $0x38] sm:$0xff]  ;;  %v4319_v1 = vld [vmem:[%s6279_s10 + $0x30] sm:$0xff]  ;;  %v4318_v2 = vld [vmem:[%s6279_s10 + $0x28] sm:$0xff]  ;;  %v5200_v27 = vmov 64.0   ;;  %vm1971_vm7 = vcmask 261120  }
  0xd1   : > { %1036 = vmatpush.bf16.msra.mxu0 %v4320_v0  ;;  %v4317_v3 = vld [vmem:[%s6279_s10 + $0x20] sm:$0xff]  ;;  %v4316_v4 = vld [vmem:[%s6279_s10 + $0x18] sm:$0xff]  ;;  %v4315_v5 = vld [vmem:[%s6279_s10 + $0x10] sm:$0xff]  ;;  %4603 = vrcp.f32 %v5200_v27 }
  0xd2   : > { %v4314_v6 = vld [vmem:[%s6279_s10 + $0x8] sm:$0xff]  ;;  %v4313_v7 = vld [vmem:[%s6279_s10] sm:$0xff]  ;;  %v4307_v10 = vld [vmem:[%s6280_s7 + $0x10] sm:$0xff] }
  0xd3   : > { %v4305_v8 = vld [vmem:[%s6280_s7] sm:$0xff]  ;;  %v4306_v9 = vld [vmem:[%s6280_s7 + $0x8] sm:$0xff]  ;;  %v4308_v11 = vld [vmem:[%s6280_s7 + $0x18] sm:$0xff] }
  0xd4   : > { %v4309_v12 = vld [vmem:[%s6280_s7 + $0x20] sm:$0xff]  ;;  %v4310_v13 = vld [vmem:[%s6280_s7 + $0x28] sm:$0xff]  ;;  %v4311_v14 = vld [vmem:[%s6280_s7 + $0x30] sm:$0xff] }
  0xd5   : > { %1037 = vmatpush.bf16.msra.mxu0 %v4319_v1  ;;  %v4312_v15 = vld [vmem:[%s6280_s7 + $0x38] sm:$0xff] }
  0xd7   : > { %v4604_v29 = vpop.eup %4603 }
  0xd8   : > { %v1112_v31 = vmul.f32 64.0, %v4604_v29  ;;  %vm1116_vm0 = vweird.f32 %v4604_v29 }
  0xd9   : > { %1038 = vmatpush.bf16.msra.mxu0 %v4318_v2 }
  0xda   : > { %v1113_v33 = vsub.f32 1.0, %v1112_v31 }
  0xdc   : > { %v1114_v36 = vmul.f32 %v4604_v29, %v1113_v33 }
  0xdd   : > { %1039 = vmatpush.bf16.msra.mxu0 %v4317_v3 }
  0xde   : > { %v1115_v39 = vadd.f32 %v4604_v29, %v1114_v36 }
  0xe0   : > { %v5631_v43 = vsel %vm1116_vm0, %v4604_v29, %v1115_v39  ;;  %v907_v29 = vld [vmem:[%s6281_s1] sm:$0xff] }
  0xe1   : > { %1040 = vmatpush.bf16.msra.mxu0 %v4316_v4  ;;  %v5662_v36 = vperm.slane %v907_v29, 1 }
  0xe5   : > { %1041 = vmatpush.bf16.msra.mxu0 %v4315_v5 }
  0xe9   : > { %1042 = vmatpush.bf16.msra.mxu0 %v4314_v6 }
  0xed   : > { %1043 = vmatpush.bf16.msra.mxu0 %v4313_v7 }
  0xf0   : > { %1044 = vmatmul.bf16.vlgmr.msra.gmra.mxu0 %v4305_v8 }
 0x100   : > { %1049 = vmatmul.bf16.gmra.mxu0 %v4306_v9 }
 0x110   : > { %1054 = vmatmul.bf16.gmra.mxu0 %v4307_v10 }
 0x120   : > { %1059 = vmatmul.bf16.gmra.mxu0 %v4308_v11 }
 0x130   : > { %1064 = vmatmul.bf16.gmra.mxu0 %v4309_v12 }
 0x140   : > { %1069 = vmatmul.bf16.gmra.mxu0 %v4310_v13 }
 0x150   : > { %1074 = vmatmul.bf16.gmra.mxu0 %v4311_v14 }
 0x160   : > { %1079 = vmatmul.bf16.gmra.mxu0 %v4312_v15 }
 0x16d   : > { %v1045_v16 = vpop.f32.mrf.mxu0 }
 0x175   : > { %v1047_v17 = vpop.f32.mrf.mxu0 }
 0x176   : > { %v1085_v18 = vadd.f32 %v1047_v17, %v1045_v16 }
 0x17d   : > { %v1050_v19 = vpop.f32.mrf.mxu0 }
 0x17e   : > { %v1086_v20 = vadd.f32 %v1085_v18, %v1050_v19 }
 0x185   : > { %v1052_v21 = vpop.f32.mrf.mxu0 }
 0x186   : > { %v1087_v22 = vadd.f32 %v1086_v20, %v1052_v21 }
 0x18d   : > { %v1055_v23 = vpop.f32.mrf.mxu0 }
 0x18e   : > { %v1088_v24 = vadd.f32 %v1087_v22, %v1055_v23 }
 0x195   : > { %v1057_v25 = vpop.f32.mrf.mxu0 }
 0x196   : > { %v1089_v26 = vadd.f32 %v1088_v24, %v1057_v25 }
 0x19d   : > { %v1060_v28 = vpop.f32.mrf.mxu0 }
 0x19e   : > { %v1090_v30 = vadd.f32 %v1089_v26, %v1060_v28 }
 0x1a5   : > { %v1062_v32 = vpop.f32.mrf.mxu0 }
 0x1a6   : > { %v1091_v34 = vadd.f32 %v1090_v30, %v1062_v32 }
 0x1a8   : > { %v1092_v35 = vrot.slane %v1091_v34, 4 }
 0x1aa   : > { %v1093_v37 = vadd.f32 %v1092_v35, %v1091_v34  ;;  %v5660_v34 = vperm.slane %v907_v29, 0 }
 0x1ac   : > { %v1094_v38 = vrot.slane %v1093_v37, 2 }
 0x1ad   : > { %v5629_v40 = vpop.f32.mrf.mxu0 }
 0x1ae   : > { %v1095_v41 = vadd.f32 %v1094_v38, %v1093_v37 }
 0x1b0   : > { %v1096_v42 = vrot.slane %v1095_v41, 1 }
 0x1b2   : > { %v1097_v44 = vadd.f32 %v1096_v42, %v1095_v41 }
 0x1b4   : > { %v1118_v45 = vmul.f32 %v5631_v43, %v1097_v44 }
 0x1b5   : > { %v5634_v46 = vpop.f32.mrf.mxu0 }
 0x1b6   : > { %v1120_v47 = vsub.f32 %v1045_v16, %v1118_v45  ;;  %v1121_v48 = vsub.f32 %v1047_v17, %v1118_v45  ;;  %v1122_v49 = vsub.f32 %v1050_v19, %v1118_v45  ;;  %v1123_v50 = vsub.f32 %v1052_v21, %v1118_v45 }
 0x1b7   : > { %v1124_v51 = vsub.f32 %v1055_v23, %v1118_v45  ;;  %v1125_v52 = vsub.f32 %v1057_v25, %v1118_v45  ;;  %v1126_v53 = vsub.f32 %v1060_v28, %v1118_v45  ;;  %v1127_v54 = vsub.f32 %v1062_v32, %v1118_v45 }
 0x1b8   : > { %v1136_v55 = vmul.f32 %v1120_v47, %v1120_v47  ;;  %v1137_v56 = vmul.f32 %v1121_v48, %v1121_v48  ;;  %v1138_v57 = vmul.f32 %v1122_v49, %v1122_v49  ;;  %v1139_v59 = vmul.f32 %v1123_v50, %v1123_v50 }
 0x1b9   : > { %v1140_v62 = vmul.f32 %v1124_v51, %v1124_v51  ;;  %v1141_v0 = vmul.f32 %v1125_v52, %v1125_v52  ;;  %v1142_v2 = vmul.f32 %v1126_v53, %v1126_v53  ;;  %v1143_v4 = vmul.f32 %v1127_v54, %v1127_v54 }
 0x1ba   : > { %v1152_v58 = vadd.f32 %v1137_v56, %v1136_v55  ;;  %v1098_v18 = vadd.f32 %v5634_v46, %v5629_v40 }
 0x1bc   : > { %v1153_v60 = vadd.f32 %v1152_v58, %v1138_v57 }
 0x1bd   : > { %v5636_v61 = vpop.f32.mrf.mxu0 }
 0x1be   : > { %v1154_v63 = vadd.f32 %v1153_v60, %v1139_v59  ;;  %v1099_v19 = vadd.f32 %v1098_v18, %v5636_v61 }
 0x1c0   : > { %v1155_v1 = vadd.f32 %v1154_v63, %v1140_v62 }
 0x1c2   : > { %v1156_v3 = vadd.f32 %v1155_v1, %v1141_v0 }
 0x1c4   : > { %v1157_v5 = vadd.f32 %v1156_v3, %v1142_v2 }
 0x1c5   : > { %v5638_v6 = vpop.f32.mrf.mxu0 }
 0x1c6   : > { %v1158_v7 = vadd.f32 %v1157_v5, %v1143_v4  ;;  %v1100_v22 = vadd.f32 %v1099_v19, %v5638_v6 }
 0x1c8   : > { %v1159_v8 = vrot.slane %v1158_v7, 4 }
 0x1ca   : > { %v1160_v9 = vadd.f32 %v1159_v8, %v1158_v7 }
 0x1cc   : > { %v1161_v10 = vrot.slane %v1160_v9, 2 }
 0x1cd   : > { %v5640_v11 = vpop.f32.mrf.mxu0 }
 0x1ce   : > { %v1162_v12 = vadd.f32 %v1161_v10, %v1160_v9  ;;  %v1101_v24 = vadd.f32 %v1100_v22, %v5640_v11 }
 0x1d0   : > { %v1163_v13 = vrot.slane %v1162_v12, 1 }
 0x1d2   : > { %v1164_v14 = vadd.f32 %v1163_v13, %v1162_v12 }
 0x1d4   : > { %v1178_v15 = vmul.f32 %v1164_v14, %v5631_v43 }
 0x1d5   : > { %v5643_v16 = vpop.f32.mrf.mxu0 }
 0x1d6   : > { %v1180_v17 = vadd.f32 1e-05, %v1178_v15  ;;  %v1102_v26 = vadd.f32 %v1101_v24, %v5643_v16 }
 0x1d8   : > { %4605 = vrsqrt.f32 %v1180_v17  ;;  %vm1188_vm2 = vweird.f32 %v1180_v17 }
 0x1dd   : > { %v5648_v20 = vpop.f32.mrf.mxu0 }
 0x1de   : > { %v4606_v21 = vpop.eup %4605  ;;  %v1103_v28 = vadd.f32 %v1102_v26, %v5648_v20 }
 0x1df   : > { %v1183_v23 = vmul.f32 %v4606_v21, %v1180_v17  ;;  %vm1189_vm1 = vweird.f32 %v4606_v21 }
 0x1e0   : > { %vm1190_vm3 = vmor %vm1188_vm2, %vm1189_vm1 }
 0x1e1   : > { %v1184_v25 = vmul.f32 %v4606_v21, %v1183_v23 }
 0x1e3   : > { %v1185_v27 = vmul.f32 0.5, %v1184_v25 }
 0x1e5   : > { %v1186_v30 = vsub.f32 1.5, %v1185_v27  ;;  %v5657_v31 = vpop.f32.mrf.mxu0 }
 0x1e6   : > { %v1104_v32 = vadd.f32 %v1103_v28, %v5657_v31 }
 0x1e7   : > { %v1187_v33 = vmul.f32 %v4606_v21, %v1186_v30 }
 0x1e8   : > { %v1105_v37 = vrot.slane %v1104_v32, 4 }
 0x1e9   : > { %v1191_v35 = vsel %vm1190_vm3, %v4606_v21, %v1187_v33 }
 0x1ea   : > { %v1202_v38 = vmul.f32 %v1191_v35, %v1120_v47  ;;  %v1203_v39 = vmul.f32 %v1191_v35, %v1121_v48  ;;  %v1204_v41 = vmul.f32 %v1191_v35, %v1122_v49  ;;  %v1205_v42 = vmul.f32 %v1191_v35, %v1123_v50 }
 0x1eb   : > { %v1206_v44 = vmul.f32 %v1191_v35, %v1124_v51  ;;  %v1207_v45 = vmul.f32 %v1191_v35, %v1125_v52  ;;  %v1208_v55 = vmul.f32 %v1191_v35, %v1126_v53  ;;  %v1209_v56 = vmul.f32 %v1191_v35, %v1127_v54 }
 0x1ec   : > { %v1221_v57 = vmul.f32 %v5660_v34, %v1204_v41  ;;  %v1222_v58 = vmul.f32 %v5660_v34, %v1205_v42  ;;  %v1106_v48 = vadd.f32 %v1105_v37, %v1104_v32  ;;  %v1219_v19 = vmul.f32 %v5660_v34, %v1202_v38 }
 0x1ed   : > { %v1223_v59 = vmul.f32 %v5660_v34, %v1206_v44  ;;  %v1224_v60 = vmul.f32 %v5660_v34, %v1207_v45  ;;  %v1225_v62 = vmul.f32 %v5660_v34, %v1208_v55  ;;  %v1226_v63 = vmul.f32 %v5660_v34, %v1209_v56 }
 0x1ee   : > { %v5671_v47 = vadd.f32 %v5662_v36, %v1222_v58  ;;  %v1238_v49 = vadd.f32 %v5662_v36, %v1221_v57  ;;  %v1107_v54 = vrot.slane %v1106_v48, 2  ;;  %v1220_v28 = vmul.f32 %v5660_v34, %v1203_v39 }
 0x1ef   : > { %v5675_v50 = vadd.f32 %v5662_v36, %v1223_v59  ;;  %v5678_v51 = vadd.f32 %v5662_v36, %v1224_v60  ;;  %v5681_v52 = vadd.f32 %v5662_v36, %v1225_v62  ;;  %v5684_v53 = vadd.f32 %v5662_v36, %v1226_v63 }
 0x1f0   : > { %v1270_v0 = vmul.f32 0.044715, %v1238_v49  ;;  %v1108_v3 = vadd.f32 %v1107_v54, %v1106_v48  ;;  %v1271_v9 = vmul.f32 0.044715, %v5671_v47  ;;  %v5719_v44 = vadd.f32 %v5662_v36, %v1219_v19 }
 0x1f1   : > { %v1274_v1 = vmul.f32 0.044715, %v5681_v52  ;;  %v1275_v2 = vmul.f32 0.044715, %v5684_v53  ;;  %v1272_v4 = vmul.f32 0.044715, %v5675_v50 }
 0x1f2   : > { %v1273_v8 = vmul.f32 0.044715, %v5678_v51  ;;  %v1109_v10 = vrot.slane %v1108_v3, 1  ;;  %v1286_v13 = vmul.f32 %v1270_v0, %v1238_v49  ;;  %v1287_v18 = vmul.f32 %v1271_v9, %v5671_v47 }
 0x1f3   : > { %v1290_v5 = vmul.f32 %v1274_v1, %v5681_v52  ;;  %v1291_v7 = vmul.f32 %v1275_v2, %v5684_v53  ;;  %v1288_v12 = vmul.f32 %v1272_v4, %v5675_v50  ;;  %v1268_v63 = vmul.f32 0.044715, %v5719_v44 }
 0x1f4   : > { %v1289_v17 = vmul.f32 %v1273_v8, %v5678_v51  ;;  %v1110_v21 = vadd.f32 %v1109_v10, %v1108_v3  ;;  %v1302_v23 = vmul.f32 %v1286_v13, %v1238_v49  ;;  %v1303_v27 = vmul.f32 %v1287_v18, %v5671_v47 }
 0x1f5   : > { %v1306_v14 = vmul.f32 %v1290_v5, %v5681_v52  ;;  %v1307_v15 = vmul.f32 %v1291_v7, %v5684_v53  ;;  %v1304_v22 = vmul.f32 %v1288_v12, %v5675_v50  ;;  %v1254_v0 = vmul.f32 0.5, %v1238_v49 }
 0x1f6   : > { %v1305_v26 = vmul.f32 %v1289_v17, %v5678_v51  ;;  %v1119_v29 = vmul.f32 %v5631_v43, %v1110_v21  ;;  %v1318_v42 = vadd.f32 %v1302_v23, %v1238_v49  ;;  %v1319_v39 = vadd.f32 %v1303_v27, %v5671_v47 }
 0x1f7   : > { %v1322_v24 = vadd.f32 %v1306_v14, %v5681_v52  ;;  %v1323_v25 = vadd.f32 %v1307_v15, %v5684_v53  ;;  %v1320_v32 = vadd.f32 %v1304_v22, %v5675_v50  ;;  %v1284_v1 = vmul.f32 %v1268_v63, %v5719_v44 }
 0x1f8   : > { %v5708_v33 = vsub.f32 %v5629_v40, %v1119_v29  ;;  %v5711_v35 = vsub.f32 %v5634_v46, %v1119_v29  ;;  %v5714_v37 = vsub.f32 %v5636_v61, %v1119_v29  ;;  %v1321_v38 = vadd.f32 %v1305_v26, %v5678_v51 }
 0x1f9   : > { %v1338_v30 = vmul.f32 0.7978846, %v1322_v24  ;;  %v1339_v41 = vmul.f32 0.7978846, %v1323_v25  ;;  %v5722_v45 = vsub.f32 %v5638_v6, %v1119_v29  ;;  %v5729_v61 = vadd.f32 %v5662_v36, %v1220_v28 }
 0x1fa   : > { %v1144_v40 = vmul.f32 %v5708_v33, %v5708_v33  ;;  %v1145_v46 = vmul.f32 %v5711_v35, %v5711_v35  ;;  %v5732_v55 = vsub.f32 %v5640_v11, %v1119_v29  ;;  %v5735_v56 = vsub.f32 %v5643_v16, %v1119_v29 }
 0x1fb   : > { %v1146_v57 = vmul.f32 %v5714_v37, %v5714_v37  ;;  %4607 = vtanh.f32 %v1338_v30  ;;  %v1336_v58 = vmul.f32 0.7978846, %v1320_v32  ;;  %v1337_v59 = vmul.f32 0.7978846, %v1321_v38 }
 0x1fc   : > { %v1165_v6 = vadd.f32 %v1145_v46, %v1144_v40  ;;  %4609 = vtanh.f32 %v1339_v41  ;;  %v1334_v60 = vmul.f32 0.7978846, %v1318_v42  ;;  %v1335_v62 = vmul.f32 0.7978846, %v1319_v39 }
 0x1fd   : > { %v1147_v48 = vmul.f32 %v5722_v45, %v5722_v45  ;;  %4611 = vtanh.f32 %v1336_v58  ;;  %v1269_v16 = vmul.f32 0.044715, %v5729_v61  ;;  %v5744_v54 = vsub.f32 %v5648_v20, %v1119_v29 }
 0x1fe   : > { %v1166_v11 = vadd.f32 %v1165_v6, %v1146_v57  ;;  %4613 = vtanh.f32 %v1337_v59  ;;  %v1148_v2 = vmul.f32 %v5732_v55, %v5732_v55  ;;  %v5751_v5 = vsub.f32 %v5657_v31, %v1119_v29 }
 0x1ff   : > { %4615 = vtanh.f32 %v1334_v60  ;;  %v1285_v4 = vmul.f32 %v1269_v16, %v5729_v61  ;;  %v1258_v7 = vmul.f32 0.5, %v5681_v52  ;;  %v1300_v20 = vmul.f32 %v1284_v1, %v5719_v44 }
 0x200   : > { %v1167_v3 = vadd.f32 %v1166_v11, %v1147_v48  ;;  %4617 = vtanh.f32 %v1335_v62  ;;  %v1149_v49 = vmul.f32 %v5735_v56, %v5735_v56  ;;  %v1259_v10 = vmul.f32 0.5, %v5684_v53 }
 0x201   : > { %v4608_v8 = vpop.eup %4607  ;;  %v1301_v12 = vmul.f32 %v1285_v4, %v5729_v61  ;;  %v1256_v15 = vmul.f32 0.5, %v5675_v50  ;;  %v1257_v31 = vmul.f32 0.5, %v5678_v51  ;;  %v1316_v52 = vadd.f32 %v1300_v20, %v5719_v44 }
 0x202   : > { %v1168_v9 = vadd.f32 %v1167_v3, %v1148_v2  ;;  %v4610_v13 = vpop.eup %4609  ;;  %v1370_v14 = vadd.f32 1.0, %v4608_v8  ;;  %v1150_v18 = vmul.f32 %v5744_v54, %v5744_v54  ;;  %v1151_v53 = vmul.f32 %v5751_v5, %v5751_v5 }
 0x203   : > { %v4612_v17 = vpop.eup %4611  ;;  %v1371_v21 = vadd.f32 1.0, %v4610_v13  ;;  %v1317_v22 = vadd.f32 %v1301_v12, %v5729_v61  ;;  %v1332_v26 = vmul.f32 0.7978846, %v1316_v52  ;;  %v1255_v38 = vmul.f32 0.5, %v5671_v47 }
 0x204   : > { %v1169_v19 = vadd.f32 %v1168_v9, %v1149_v49  ;;  %v4614_v23 = vpop.eup %4613  ;;  %v1386_v24 = vmul.f32 %v1370_v14, %v1258_v7  ;;  %v1368_v25 = vadd.f32 1.0, %v4612_v17  ;;  %v1252_v47 = vmul.f32 0.5, %v5719_v44 }
 0x205   : > { %v4616_v50 = vpop.eup %4615  ;;  %v1387_v51 = vmul.f32 %v1371_v21, %v1259_v10  ;;  %v1369_v28 = vadd.f32 1.0, %v4614_v23  ;;  %v1333_v29 = vmul.f32 0.7978846, %v1317_v22  ;;  %4619 = vtanh.f32 %v1332_v26 }
 0x206   : > { %v1170_v27 = vadd.f32 %v1169_v19, %v1150_v18  ;;  %v4618_v30 = vpop.eup %4617  ;;  %v1384_v32 = vmul.f32 %v1368_v25, %v1256_v15  ;;  %v1366_v41 = vadd.f32 1.0, %v4616_v50  ;;  %v1253_v2 = vmul.f32 0.5, %v5729_v61 }
 0x207   : > { %v5768_v39 = vpack.c.bf16 %v1387_v51, %v1386_v24  ;;  %v1385_v40 = vmul.f32 %v1369_v28, %v1257_v31  ;;  %v1367_v46 = vadd.f32 1.0, %v4618_v30  ;;  %4621 = vtanh.f32 %v1333_v29 }
 0x208   : > { %v1171_v42 = vadd.f32 %v1170_v27, %v1151_v53  ;;  %v1382_v57 = vmul.f32 %v1366_v41, %v1254_v0 }
 0x209   : > { %v5770_v58 = vpack.c.bf16 %v1385_v40, %v1384_v32  ;;  %v1383_v59 = vmul.f32 %v1367_v46, %v1255_v38 }
 0x20a   : > { %v1172_v6 = vrot.slane %v1171_v42, 4 }
 0x20b   : > { %v5772_v62 = vpack.c.bf16 %v1383_v59, %v1382_v57  ;;  %v4620_v63 = vpop.eup %4619 }
 0x20c   : > { %v1173_v60 = vadd.f32 %v1172_v6, %v1171_v42  ;;  %v1364_v11 = vadd.f32 1.0, %v4620_v63 }
 0x20d   : > { %v4622_v16 = vpop.eup %4621 }
 0x20e   : > { %v1174_v48 = vrot.slane %v1173_v60, 2  ;;  %v1365_v3 = vadd.f32 1.0, %v4622_v16  ;;  %v1380_v4 = vmul.f32 %v1364_v11, %v1252_v47 }
 0x210   : > { %v1175_v1 = vadd.f32 %v1174_v48, %v1173_v60  ;;  %v1381_v7 = vmul.f32 %v1365_v3, %v1253_v2 }
 0x212   : > { %v1176_v0 = vrot.slane %v1175_v1, 1  ;;  %v5776_v8 = vpack.c.bf16 %v1381_v7, %v1380_v4 }
 0x214   : > { %v1177_v20 = vadd.f32 %v1176_v0, %v1175_v1 }
 0x216   : > { %v1179_v49 = vmul.f32 %v1177_v20, %v5631_v43 }
 0x218   : > { %v1181_v9 = vadd.f32 1e-05, %v1179_v49 }
 0x21a   : > { %4623 = vrsqrt.f32 %v1181_v9  ;;  %vm1198_vm5 = vweird.f32 %v1181_v9 }
 0x220   : > { %v4624_v10 = vpop.eup %4623 }
 0x221   : > { %v1193_v12 = vmul.f32 %v4624_v10, %v1181_v9  ;;  %vm1199_vm4 = vweird.f32 %v4624_v10 }
 0x222   : > { %vm1200_vm6 = vmor %vm1198_vm5, %vm1199_vm4 }
 0x223   : > { %v1194_v13 = vmul.f32 %v4624_v10, %v1193_v12 }
 0x225   : > { %v1195_v44 = vmul.f32 0.5, %v1194_v13 }
 0x227   : > { %v1196_v14 = vsub.f32 1.5, %v1195_v44 }
 0x229   : > { %v1197_v15 = vmul.f32 %v4624_v10, %v1196_v14 }
 0x22b   : > { %v1201_v61 = vsel %vm1200_vm6, %v4624_v10, %v1197_v15 }
 0x22c   : > { %v1210_v31 = vmul.f32 %v1201_v61, %v5708_v33  ;;  %v1211_v52 = vmul.f32 %v1201_v61, %v5711_v35  ;;  %v1212_v17 = vmul.f32 %v1201_v61, %v5714_v37  ;;  %v1213_v43 = vmul.f32 %v1201_v61, %v5722_v45 }
 0x22d   : > { %v1214_v18 = vmul.f32 %v1201_v61, %v5732_v55  ;;  %v1215_v19 = vmul.f32 %v1201_v61, %v5735_v56  ;;  %v1216_v21 = vmul.f32 %v1201_v61, %v5744_v54  ;;  %v1217_v22 = vmul.f32 %v1201_v61, %v5751_v5 }
 0x22e   : > { %v1229_v23 = vmul.f32 %v5660_v34, %v1212_v17  ;;  %v1230_v53 = vmul.f32 %v5660_v34, %v1213_v43  ;;  %v1227_v55 = vmul.f32 %v5660_v34, %v1210_v31  ;;  %v1228_v56 = vmul.f32 %v5660_v34, %v1211_v52 }
 0x22f   : > { %v1231_v33 = vmul.f32 %v5660_v34, %v1214_v18  ;;  %v1232_v35 = vmul.f32 %v5660_v34, %v1215_v19  ;;  %v1233_v37 = vmul.f32 %v5660_v34, %v1216_v21  ;;  %v1234_v45 = vmul.f32 %v5660_v34, %v1217_v22 }
 0x230   : > { %v5796_v54 = vadd.f32 %v5662_v36, %v1230_v53  ;;  %v5799_v5 = vadd.f32 %v5662_v36, %v1229_v23  ;;  %v5814_v32 = vadd.f32 %v5662_v36, %v1227_v55  ;;  %v5817_v38 = vadd.f32 %v5662_v36, %v1228_v56 }
 0x231   : > { %v5802_v24 = vadd.f32 %v5662_v36, %v1231_v33  ;;  %v5805_v25 = vadd.f32 %v5662_v36, %v1232_v35  ;;  %v1250_v26 = vadd.f32 %v5662_v36, %v1233_v37  ;;  %v1251_v50 = vadd.f32 %v5662_v36, %v1234_v45 }
 0x232   : > { %v1278_v27 = vmul.f32 0.044715, %v5799_v5  ;;  %v1279_v34 = vmul.f32 0.044715, %v5796_v54  ;;  %v1276_v11 = vmul.f32 0.044715, %v5814_v32 }
 0x233   : > { %v1283_v51 = vmul.f32 0.044715, %v1251_v50  ;;  %v1282_v28 = vmul.f32 0.044715, %v1250_v26  ;;  %v1280_v29 = vmul.f32 0.044715, %v5802_v24 }
 0x234   : > { %v1281_v30 = vmul.f32 0.044715, %v5805_v25  ;;  %v1294_v40 = vmul.f32 %v1278_v27, %v5799_v5  ;;  %v1295_v46 = vmul.f32 %v1279_v34, %v5796_v54  ;;  %v1277_v16 = vmul.f32 0.044715, %v5817_v38 }
 0x235   : > { %v1298_v41 = vmul.f32 %v1282_v28, %v1250_v26  ;;  %v1299_v42 = vmul.f32 %v1283_v51, %v1251_v50  ;;  %v1296_v57 = vmul.f32 %v1280_v29, %v5802_v24  ;;  %v1292_v20 = vmul.f32 %v1276_v11, %v5814_v32 }
 0x236   : > { %v1297_v6 = vmul.f32 %v1281_v30, %v5805_v25  ;;  %v1310_v63 = vmul.f32 %v1294_v40, %v5799_v5  ;;  %v1311_v48 = vmul.f32 %v1295_v46, %v5796_v54  ;;  %v1293_v49 = vmul.f32 %v1277_v16, %v5817_v38  ;;  %v4335_v16 = vld [vmem:[#allocation6 + $0x30] sm:$0xff] }
 0x237   : > { %v1314_v59 = vmul.f32 %v1298_v41, %v1250_v26  ;;  %v1315_v60 = vmul.f32 %v1299_v42, %v1251_v50  ;;  %v1312_v47 = vmul.f32 %v1296_v57, %v5802_v24  ;;  %v1308_v44 = vmul.f32 %v1292_v20, %v5814_v32  ;;  %v4330_v20 = vld [vmem:[#allocation6 + $0x8] sm:$0xff] }
 0x238   : > { %v1313_v36 = vmul.f32 %v1297_v6, %v5805_v25  ;;  %v1326_v3 = vadd.f32 %v1310_v63, %v5799_v5  ;;  %v1327_v4 = vadd.f32 %v1311_v48, %v5796_v54  ;;  %v1309_v15 = vmul.f32 %v1293_v49, %v5817_v38  ;;  %v4329_v49 = vld [vmem:[#allocation6] sm:$0xff] }
 0x239   : > { %v1330_v1 = vadd.f32 %v1314_v59, %v1250_v26  ;;  %v1331_v2 = vadd.f32 %v1315_v60, %v1251_v50  ;;  %v1328_v0 = vadd.f32 %v1312_v47, %v5802_v24  ;;  %v1324_v31 = vadd.f32 %v1308_v44, %v5814_v32  ;;  %v4341_v44 = vld [vmem:[#allocation6 + $0x60] sm:$0xff] }
 0x23a   : > { %v1329_v7 = vadd.f32 %v1313_v36, %v5805_v25  ;;  %v1342_v14 = vmul.f32 0.7978846, %v1326_v3  ;;  %v1343_v61 = vmul.f32 0.7978846, %v1327_v4  ;;  %v1325_v52 = vadd.f32 %v1309_v15, %v5817_v38  ;;  %v4332_v3 = vld [vmem:[#allocation6 + $0x18] sm:$0xff]  ;;  %v4322_v4 = vld [vmem:[#allocation3 + $0x8] sm:$0xff] }
 0x23b   : > { %v1346_v9 = vmul.f32 0.7978846, %v1330_v1  ;;  %v1347_v10 = vmul.f32 0.7978846, %v1331_v2  ;;  %v1344_v12 = vmul.f32 0.7978846, %v1328_v0 }
 0x23c   : > { %v1345_v13 = vmul.f32 0.7978846, %v1329_v7  ;;  %v1340_v17 = vmul.f32 0.7978846, %v1324_v31  ;;  %v1341_v43 = vmul.f32 0.7978846, %v1325_v52 }
 0x23d   : > { %4625 = vtanh.f32 %v1346_v9  ;;  %v1266_v21 = vmul.f32 0.5, %v1250_v26  ;;  %v1267_v53 = vmul.f32 0.5, %v1251_v50  ;;  %v1264_v27 = vmul.f32 0.5, %v5802_v24  ;;  %v4334_v1 = vld [vmem:[#allocation6 + $0x28] sm:$0xff]  ;;  %v4333_v2 = vld [vmem:[#allocation6 + $0x20] sm:$0xff]  ;;  %v4324_v0 = vld [vmem:[#allocation3 + $0x18] sm:$0xff] }
 0x23e   : > { %4627 = vtanh.f32 %v1347_v10  ;;  %v1265_v34 = vmul.f32 0.5, %v5805_v25  ;;  %v1262_v46 = vmul.f32 0.5, %v5799_v5  ;;  %v1263_v24 = vmul.f32 0.5, %v5796_v54  ;;  %v4336_v54 = vld [vmem:[#allocation6 + $0x38] sm:$0xff]  ;;  %v4331_v7 = vld [vmem:[#allocation6 + $0x10] sm:$0xff]  ;;  %v4338_v31 = vld [vmem:[#allocation6 + $0x48] sm:$0xff] }
 0x23f   : > { %4629 = vtanh.f32 %v1344_v12  ;;  %v1260_v63 = vmul.f32 0.5, %v5814_v32  ;;  %v1261_v48 = vmul.f32 0.5, %v5817_v38  ;;  %v4321_v32 = vld [vmem:[#allocation3] sm:$0xff]  ;;  %v4323_v38 = vld [vmem:[#allocation3 + $0x10] sm:$0xff]  ;;  %v4344_v9 = vld [vmem:[#allocation6 + $0x78] sm:$0xff] }
 0x240   : > { %4631 = vtanh.f32 %v1345_v13  ;;  %1598 = vmatpush.bf16.msra.mxu3 %v4344_v9  ;;  %v4343_v10 = vld [vmem:[#allocation6 + $0x70] sm:$0xff]  ;;  %v4325_v12 = vld [vmem:[#allocation3 + $0x20] sm:$0xff]  ;;  %v4342_v13 = vld [vmem:[#allocation6 + $0x68] sm:$0xff] }
 0x241   : > { %4633 = vtanh.f32 %v1342_v14  ;;  %v4326_v14 = vld [vmem:[#allocation3 + $0x28] sm:$0xff]  ;;  %v4340_v15 = vld [vmem:[#allocation6 + $0x58] sm:$0xff]  ;;  %v4337_v52 = vld [vmem:[#allocation6 + $0x40] sm:$0xff] }
 0x242   : > { %4635 = vtanh.f32 %v1343_v61  ;;  %v4339_v61 = vld [vmem:[#allocation6 + $0x50] sm:$0xff] }
 0x243   : > { %v4626_v18 = vpop.eup %4625  ;;  %4637 = vtanh.f32 %v1340_v17  ;;  %v4352_v17 = vld [vmem:[#allocation6 + $0xb8] sm:$0xff] }
 0x244   : > { %v4628_v19 = vpop.eup %4627  ;;  %v1378_v22 = vadd.f32 1.0, %v4626_v18  ;;  %4639 = vtanh.f32 %v1341_v43  ;;  %1599 = vmatpush.bf16.msra.mxu3 %v4343_v10  ;;  %v4351_v43 = vld [vmem:[#allocation6 + $0xb0] sm:$0xff] }
 0x245   : > { %v4630_v23 = vpop.eup %4629  ;;  %v1379_v33 = vadd.f32 1.0, %v4628_v19  ;;  %v4347_v19 = vld [vmem:[#allocation6 + $0x90] sm:$0xff] }
 0x246   : > { %v4632_v35 = vpop.eup %4631  ;;  %v1394_v37 = vmul.f32 %v1378_v22, %v1266_v21  ;;  %v1376_v45 = vadd.f32 1.0, %v4630_v23  ;;  %v4346_v23 = vld [vmem:[#allocation6 + $0x88] sm:$0xff] }
 0x247   : > { %v4634_v55 = vpop.eup %4633  ;;  %v1395_v56 = vmul.f32 %v1379_v33, %v1267_v53  ;;  %v1377_v51 = vadd.f32 1.0, %v4632_v35  ;;  %v4345_v35 = vld [vmem:[#allocation6 + $0x80] sm:$0xff] }
 0x248   : > { %v4636_v28 = vpop.eup %4635  ;;  %v1374_v29 = vadd.f32 1.0, %v4634_v55  ;;  %v1392_v26 = vmul.f32 %v1376_v45, %v1264_v27  ;;  %1600 = vmatpush.bf16.msra.mxu3 %v4342_v13 }
 0x249   : > { %v4638_v30 = vpop.eup %4637  ;;  %v5841_v41 = vpack.c.bf16 %v1395_v56, %v1394_v37  ;;  %v1393_v42 = vmul.f32 %v1377_v51, %v1265_v34  ;;  %v1375_v40 = vadd.f32 1.0, %v4636_v28  ;;  %v4327_v28 = vld [vmem:[#allocation3 + $0x30] sm:$0xff] }
 0x24a   : > { %v4640_v50 = vpop.eup %4639  ;;  %v1390_v57 = vmul.f32 %v1374_v29, %v1262_v46  ;;  %v1372_v59 = vadd.f32 1.0, %v4638_v30  ;;  %v4359_v46 = vld [vmem:[#allocation6 + $0xf0] sm:$0xff] }
 0x24b   : > { %1496 = vmatpush.bf16.msra.mxu1 %v5841_v41  ;;  %1529 = vmatpush.bf16.msra.mxu2 %v5841_v41  ;;  %v1402_v25 = vpack.c.bf16 %v1393_v42, %v1392_v26  ;;  %v1391_v6 = vmul.f32 %v1375_v40, %v1263_v24  ;;  %v1373_v60 = vadd.f32 1.0, %v4640_v50  ;;  %v4328_v26 = vld [vmem:[#allocation3 + $0x38] sm:$0xff]  ;;  %v4358_v24 = vld [vmem:[#allocation6 + $0xe8] sm:$0xff] }
 0x24c   : > { %v1388_v36 = vmul.f32 %v1372_v59, %v1260_v63  ;;  %1601 = vmatpush.bf16.msra.mxu3 %v4341_v44  ;;  %v4360_v50 = vld [vmem:[#allocation6 + $0xf8] sm:$0xff]  ;;  %v4355_v59 = vld [vmem:[#allocation6 + $0xd0] sm:$0xff] }
 0x24d   : > { %v1401_v47 = vpack.c.bf16 %v1391_v6, %v1390_v57  ;;  %v1389_v5 = vmul.f32 %v1373_v60, %v1261_v48  ;;  %v4357_v57 = vld [vmem:[#allocation6 + $0xe0] sm:$0xff]  ;;  %v4354_v60 = vld [vmem:[#allocation6 + $0xc8] sm:$0xff] }
 0x24e   : > { %v4353_v48 = vld [vmem:[#allocation6 + $0xc0] sm:$0xff] }
 0x24f   : > { %1497 = vmatpush.bf16.msra.mxu1 %v1402_v25  ;;  %1530 = vmatpush.bf16.msra.mxu2 %v1402_v25  ;;  %v1400_v11 = vpack.c.bf16 %v1389_v5, %v1388_v36 }
 0x250   : > { %1602 = vmatpush.bf16.msra.mxu3 %v4340_v15 }
 0x253   : > { %1498 = vmatpush.bf16.msra.mxu1 %v1401_v47  ;;  %1531 = vmatpush.bf16.msra.mxu2 %v1401_v47 }
 0x254   : > { %1603 = vmatpush.bf16.msra.mxu3 %v4339_v61 }
 0x257   : > { %1499 = vmatpush.bf16.msra.mxu1 %v1400_v11  ;;  %1532 = vmatpush.bf16.msra.mxu2 %v1400_v11 }
 0x258   : > { %1604 = vmatpush.bf16.msra.mxu3 %v4338_v31 }
 0x25b   : > { %1500 = vmatpush.bf16.msra.mxu1 %v5768_v39  ;;  %1533 = vmatpush.bf16.msra.mxu2 %v5768_v39 }
 0x25c   : > { %1605 = vmatpush.bf16.msra.mxu3 %v4337_v52 }
 0x25f   : > { %1501 = vmatpush.bf16.msra.mxu1 %v5770_v58  ;;  %1534 = vmatpush.bf16.msra.mxu2 %v5770_v58 }
 0x260   : > { %1765 = vmatpush.bf16.msrb.mxu3 %v4352_v17 }
 0x263   : > { %1502 = vmatpush.bf16.msra.mxu1 %v5772_v62  ;;  %1535 = vmatpush.bf16.msra.mxu2 %v5772_v62 }
 0x264   : > { %1766 = vmatpush.bf16.msrb.mxu3 %v4351_v43 }
 0x267   : > { %1503 = vmatpush.bf16.msra.mxu1 %v5776_v8  ;;  %1536 = vmatpush.bf16.msra.mxu2 %v5776_v8 }
 0x26a   : > { %1504 = vmatmul.bf16.vlgmr.msra.gmra.mxu1 %v4321_v32  ;;  %1537 = vmatmul.bf16.vlgmr.msra.gmra.mxu2 %v4323_v38 }
 0x26b   : > { %1665 = vmatpush.bf16.msrb.mxu1 %v4336_v54  ;;  %1696 = vmatpush.bf16.msrb.mxu2 %v5841_v41 }
 0x26f   : > { %1666 = vmatpush.bf16.msrb.mxu1 %v4335_v16  ;;  %1697 = vmatpush.bf16.msrb.mxu2 %v1402_v25 }
 0x273   : > { %1667 = vmatpush.bf16.msrb.mxu1 %v4334_v1  ;;  %1698 = vmatpush.bf16.msrb.mxu2 %v1401_v47 }
 0x277   : > { %1668 = vmatpush.bf16.msrb.mxu1 %v4333_v2  ;;  %1699 = vmatpush.bf16.msrb.mxu2 %v1400_v11 }
 0x27a   : > { %1509 = vmatmul.bf16.gmra.mxu1 %v4322_v4  ;;  %1542 = vmatmul.bf16.gmra.mxu2 %v4324_v0 }
 0x27b   : > { %1669 = vmatpush.bf16.msrb.mxu1 %v4332_v3  ;;  %1700 = vmatpush.bf16.msrb.mxu2 %v5768_v39 }
 0x27f   : > { %1670 = vmatpush.bf16.msrb.mxu1 %v4331_v7  ;;  %1701 = vmatpush.bf16.msrb.mxu2 %v5770_v58 }
 0x283   : > { %1671 = vmatpush.bf16.msrb.mxu1 %v4330_v20  ;;  %1702 = vmatpush.bf16.msrb.mxu2 %v5772_v62 }
 0x287   : > { %1672 = vmatpush.bf16.msrb.mxu1 %v4329_v49  ;;  %1703 = vmatpush.bf16.msrb.mxu2 %v5776_v8 }
 0x28a   : > { %1704 = vmatmul.bf16.vlgmr.msrb.gmra.mxu2 %v4325_v12 }
 0x28b   : > { %1800 = vmatpush.bf16.msra.mxu1 %v5841_v41  ;;  %1869 = vmatpush.bf16.msra.mxu2 %v4360_v50 }
 0x28f   : > { %1801 = vmatpush.bf16.msra.mxu1 %v1402_v25  ;;  %1870 = vmatpush.bf16.msra.mxu2 %v4359_v46  ;;  %v4356_v25 = vld [vmem:[#allocation6 + $0xd8] sm:$0xff] }
 0x293   : > { %1802 = vmatpush.bf16.msra.mxu1 %v1401_v47  ;;  %1871 = vmatpush.bf16.msra.mxu2 %v4358_v24 }
 0x297   : > { %1803 = vmatpush.bf16.msra.mxu1 %v1400_v11  ;;  %1872 = vmatpush.bf16.msra.mxu2 %v4357_v57 }
 0x29a   : > { %1709 = vmatmul.bf16.gmra.mxu2 %v4326_v14 }
 0x29b   : > { %1804 = vmatpush.bf16.msra.mxu1 %v5768_v39  ;;  %v4350_v39 = vld [vmem:[#allocation6 + $0xa8] sm:$0xff]  ;;  %1873 = vmatpush.bf16.msra.mxu2 %v4356_v25 }
 0x29c   : > { %1767 = vmatpush.bf16.msrb.mxu3 %v4350_v39 }
 0x29f   : > { %1805 = vmatpush.bf16.msra.mxu1 %v5770_v58  ;;  %v4349_v58 = vld [vmem:[#allocation6 + $0xa0] sm:$0xff]  ;;  %1874 = vmatpush.bf16.msra.mxu2 %v4355_v59 }
 0x2a0   : > { %1768 = vmatpush.bf16.msrb.mxu3 %v4349_v58 }
 0x2a3   : > { %1806 = vmatpush.bf16.msra.mxu1 %v5772_v62  ;;  %v4348_v62 = vld [vmem:[#allocation6 + $0x98] sm:$0xff]  ;;  %1875 = vmatpush.bf16.msra.mxu2 %v4354_v60 }
 0x2a4   : > { %1769 = vmatpush.bf16.msrb.mxu3 %v4348_v62 }
 0x2a7   : > { %1807 = vmatpush.bf16.msra.mxu1 %v5776_v8  ;;  %1876 = vmatpush.bf16.msra.mxu2 %v4353_v48  ;;  %v4378_v48 = vld [vmem:[%s6282_s0 + $0x78] sm:$0xff] }
 0x2a8   : > { %1770 = vmatpush.bf16.msrb.mxu3 %v4347_v19 }
 0x2ac   : > { %1771 = vmatpush.bf16.msrb.mxu3 %v4346_v23 }
 0x2b0   : > { %1772 = vmatpush.bf16.msrb.mxu3 %v4345_v35 }
 0x2e7   : > { %v1505_v18 = vpop.f32.mrf.mxu1 }
 0x2ed   : > { %v1538_v8 = vpop.f32.mrf.mxu2 }
 0x2ef   : > { %v1507_v21 = vpop.f32.mrf.mxu1 }
 0x2f0   : > { %v1515_v22 = vpack.c.bf16 %v1507_v21, %v1505_v18 }
 0x2f2   : > { %1673 = vmatmul.bf16.vlgmr.msrb.gmra.mxu1 %v1515_v22 }
 0x2f3   : > { %2061 = vmatpush.bf16.msrb.mxu1 %v4378_v48 }
 0x2f5   : > { %v1540_v53 = vpop.f32.mrf.mxu2 }
 0x2f6   : > { %v1548_v33 = vpack.c.bf16 %v1540_v53, %v1538_v8 }
 0x2f7   : > { %v1510_v37 = vpop.f32.mrf.mxu1 }
 0x2f8   : > { %1606 = vmatmul.bf16.vlgmr.msra.gmra.mxu3 %v1548_v33 }
 0x2fd   : > { %v1543_v45 = vpop.f32.mrf.mxu2 }
 0x2ff   : > { %v1512_v55 = vpop.f32.mrf.mxu1 }
 0x300   : > { %v1516_v56 = vpack.c.bf16 %v1512_v55, %v1510_v37 }
 0x302   : > { %1678 = vmatmul.bf16.gmra.mxu1 %v1516_v56 }
 0x305   : > { %v1545_v27 = vpop.f32.mrf.mxu2 }
 0x306   : > { %v1549_v34 = vpack.c.bf16 %v1545_v27, %v1543_v45 }
 0x308   : > { %1611 = vmatmul.bf16.gmra.mxu3 %v1549_v34 }
 0x30d   : > { %v1705_v51 = vpop.f32.mrf.mxu2 }
 0x312   : > { %1808 = vmatmul.bf16.vlgmr.msra.gmra.mxu1 %v4327_v28 }
 0x315   : > { %v1707_v29 = vpop.f32.mrf.mxu2 }
 0x316   : > { %v1715_v30 = vpack.c.bf16 %v1707_v29, %v1705_v51 }
 0x318   : > { %1773 = vmatmul.bf16.vlgmr.msrb.gmra.mxu3 %v1715_v30 }
 0x31d   : > { %v1710_v41 = vpop.f32.mrf.mxu2 }
 0x322   : > { %1813 = vmatmul.bf16.gmra.mxu1 %v4328_v26 }
 0x325   : > { %v1712_v42 = vpop.f32.mrf.mxu2 }
 0x326   : > { %v1716_v40 = vpack.c.bf16 %v1712_v42, %v1710_v41 }
 0x328   : > { %1778 = vmatmul.bf16.gmra.mxu3 %v1716_v40 }
 0x36f   : > { %v1674_v6 = vpop.f32.mrf.mxu1 }
 0x377   : > { %v1676_v63 = vpop.f32.mrf.mxu1 }
 0x37b   : > { %v1607_v1 = vpop.f32.mrf.mxu3 }
 0x37c   : > { %v1675_v7 = vadd.f32 %v1674_v6, %v1607_v1  ;;  %v4368_v1 = vld [vmem:[%s6282_s0 + $0x28] sm:$0xff] }
 0x37f   : > { %v1679_v47 = vpop.f32.mrf.mxu1 }
 0x383   : > { %v1609_v2 = vpop.f32.mrf.mxu3 }
 0x384   : > { %v1677_v13 = vadd.f32 %v1676_v63, %v1609_v2  ;;  %v4370_v63 = vld [vmem:[%s6282_s0 + $0x38] sm:$0xff] }
 0x385   : > { %2123 = vmatpush.bf16.msrb.mxu2 %v4370_v63 }
 0x387   : > { %v1681_v36 = vpop.f32.mrf.mxu1 }
 0x38b   : > { %v1612_v3 = vpop.f32.mrf.mxu3 }
 0x38c   : > { %v1680_v39 = vadd.f32 %v1679_v47, %v1612_v3  ;;  %v4361_v3 = vld [vmem:[%s6283_s23] sm:$0xff] }
 0x38f   : > { %v1809_v5 = vpop.f32.mrf.mxu1 }
 0x393   : > { %v1614_v4 = vpop.f32.mrf.mxu3 }
 0x394   : > { %v1682_v35 = vadd.f32 %v1681_v36, %v1614_v4  ;;  %v4362_v4 = vld [vmem:[%s6283_s23 + $0x8] sm:$0xff] }
 0x397   : > { %v1811_v11 = vpop.f32.mrf.mxu1 }
 0x398   : > { %v1819_v54 = vpack.c.bf16 %v1811_v11, %v1809_v5  ;;  %v4369_v5 = vld [vmem:[%s6282_s0 + $0x30] sm:$0xff] }
 0x399   : > { %2124 = vmatpush.bf16.msrb.mxu2 %v4369_v5 }
 0x39a   : > { %1877 = vmatmul.bf16.vlgmr.msra.gmra.mxu2 %v1819_v54 }
 0x39b   : > { %v1774_v0 = vpop.f32.mrf.mxu3 }
 0x39c   : > { %v1784_v20 = vadd.f32 %v1774_v0, %v1675_v7  ;;  %v4377_v0 = vld [vmem:[%s6282_s0 + $0x70] sm:$0xff]  ;;  %v4367_v7 = vld [vmem:[%s6282_s0 + $0x20] sm:$0xff] }
 0x39d   : > { %2125 = vmatpush.bf16.msrb.mxu2 %v4368_v1  ;;  %2062 = vmatpush.bf16.msrb.mxu1 %v4377_v0  ;;  %v4383_v1 = vld [vmem:[#allocation8 + $0x20] sm:$0xff] }
 0x39f   : > { %v1814_v32 = vpop.f32.mrf.mxu1 }
 0x3a1   : > { %2126 = vmatpush.bf16.msrb.mxu2 %v4367_v7  ;;  %v4381_v7 = vld [vmem:[#allocation8 + $0x10] sm:$0xff] }
 0x3a3   : > { %v1776_v49 = vpop.f32.mrf.mxu3 }
 0x3a4   : > { %v1785_v14 = vadd.f32 %v1776_v49, %v1677_v13  ;;  %v4366_v49 = vld [vmem:[%s6282_s0 + $0x18] sm:$0xff]  ;;  %v4364_v13 = vld [vmem:[%s6282_s0 + $0x8] sm:$0xff] }
 0x3a5   : > { %2127 = vmatpush.bf16.msrb.mxu2 %v4366_v49 }
 0x3a7   : > { %v1816_v38 = vpop.f32.mrf.mxu1 }
 0x3a8   : > { %v1820_v16 = vpack.c.bf16 %v1816_v38, %v1814_v32 }
 0x3aa   : > { %1882 = vmatmul.bf16.gmra.mxu2 %v1820_v16 }
 0x3ab   : > { %v1779_v17 = vpop.f32.mrf.mxu3 }
 0x3ac   : > { %v1786_v62 = vadd.f32 %v1779_v17, %v1680_v39 }
 0x3b3   : > { %v1781_v33 = vpop.f32.mrf.mxu3 }
 0x3b4   : > { %v1787_v55 = vadd.f32 %v1781_v33, %v1682_v35 }
 0x41d   : > { %v1878_v9 = vpop.f32.mrf.mxu2 }
 0x41e   : > { %v1888_v10 = vadd.f32 %v1878_v9, %v1784_v20  ;;  %v4376_v20 = vld [vmem:[%s6282_s0 + $0x68] sm:$0xff]  ;;  %v4375_v9 = vld [vmem:[%s6282_s0 + $0x60] sm:$0xff] }
 0x41f   : > { %2063 = vmatpush.bf16.msrb.mxu1 %v4376_v20  ;;  %v4380_v20 = vld [vmem:[#allocation8 + $0x8] sm:$0xff] }
 0x420   : > { %v1896_v12 = vmul.f32 0.044715, %v1888_v10  ;;  %v1892_v41 = vmul.f32 0.5, %v1888_v10 }
 0x422   : > { %v1900_v44 = vmul.f32 %v1896_v12, %v1888_v10  ;;  %v4374_v12 = vld [vmem:[%s6282_s0 + $0x58] sm:$0xff] }
 0x423   : > { %2064 = vmatpush.bf16.msrb.mxu1 %v4375_v9 }
 0x424   : > { %v1904_v15 = vmul.f32 %v1900_v44, %v1888_v10  ;;  %v4373_v44 = vld [vmem:[%s6282_s0 + $0x50] sm:$0xff] }
 0x425   : > { %v1880_v61 = vpop.f32.mrf.mxu2 }
 0x426   : > { %v1889_v31 = vadd.f32 %v1880_v61, %v1785_v14  ;;  %v1908_v52 = vadd.f32 %v1904_v15, %v1888_v10  ;;  %v4365_v10 = vld [vmem:[%s6282_s0 + $0x10] sm:$0xff]  ;;  %v4363_v14 = vld [vmem:[%s6282_s0] sm:$0xff]  ;;  %v4372_v15 = vld [vmem:[%s6282_s0 + $0x48] sm:$0xff] }
 0x427   : > { %2128 = vmatpush.bf16.msrb.mxu2 %v4365_v10  ;;  %2065 = vmatpush.bf16.msrb.mxu1 %v4374_v12  ;;  %v4371_v61 = vld [vmem:[%s6282_s0 + $0x40] sm:$0xff] }
 0x428   : > { %v1897_v43 = vmul.f32 0.044715, %v1889_v31  ;;  %v1912_v18 = vmul.f32 0.7978846, %v1908_v52  ;;  %v1893_v26 = vmul.f32 0.5, %v1889_v31 }
 0x42a   : > { %v1901_v58 = vmul.f32 %v1897_v43, %v1889_v31  ;;  %4641 = vtanh.f32 %v1912_v18 }
 0x42b   : > { %2129 = vmatpush.bf16.msrb.mxu2 %v4364_v13  ;;  %2066 = vmatpush.bf16.msrb.mxu1 %v4373_v44  ;;  %v4379_v13 = vld [vmem:[#allocation8] sm:$0xff] }
 0x42c   : > { %v1905_v8 = vmul.f32 %v1901_v58, %v1889_v31 }
 0x42d   : > { %v1883_v19 = vpop.f32.mrf.mxu2 }
 0x42e   : > { %v1890_v21 = vadd.f32 %v1883_v19, %v1786_v62  ;;  %v1909_v22 = vadd.f32 %v1905_v8, %v1889_v31 }
 0x42f   : > { %2130 = vmatpush.bf16.msrb.mxu2 %v4363_v14  ;;  %2067 = vmatpush.bf16.msrb.mxu1 %v4372_v15 }
 0x430   : > { %v1898_v23 = vmul.f32 0.044715, %v1890_v21  ;;  %v1913_v53 = vmul.f32 0.7978846, %v1909_v22  ;;  %v4642_v45 = vpop.eup %4641  ;;  %v1894_v11 = vmul.f32 0.5, %v1890_v21 }
 0x431   : > { %v1920_v28 = vadd.f32 1.0, %v4642_v45 }
 0x432   : > { %v1902_v37 = vmul.f32 %v1898_v23, %v1890_v21  ;;  %4643 = vtanh.f32 %v1913_v53 }
 0x433   : > { %v1924_v46 = vmul.f32 %v1920_v28, %v1892_v41  ;;  %2068 = vmatpush.bf16.msrb.mxu1 %v4371_v61 }
 0x434   : > { %v1906_v56 = vmul.f32 %v1902_v37, %v1890_v21 }
 0x435   : > { %v1885_v27 = vpop.f32.mrf.mxu2 }
 0x436   : > { %v1910_v34 = vadd.f32 %v1906_v56, %v1890_v21  ;;  %v1891_v51 = vadd.f32 %v1885_v27, %v1787_v55 }
 0x438   : > { %v4644_v29 = vpop.eup %4643  ;;  %v1899_v30 = vmul.f32 0.044715, %v1891_v51  ;;  %v1914_v40 = vmul.f32 0.7978846, %v1910_v34  ;;  %v1895_v54 = vmul.f32 0.5, %v1891_v51 }
 0x439   : > { %v1921_v42 = vadd.f32 1.0, %v4644_v29 }
 0x43a   : > { %v1903_v50 = vmul.f32 %v1899_v30, %v1891_v51  ;;  %4645 = vtanh.f32 %v1914_v40 }
 0x43b   : > { %v1925_v24 = vmul.f32 %v1921_v42, %v1893_v26 }
 0x43c   : > { %v1907_v57 = vmul.f32 %v1903_v50, %v1891_v51  ;;  %v5201_v50 = vmov 128.0  }
 0x43d   : > { %v1928_v25 = vpack.c.bf16 %v1925_v24, %v1924_v46 }
 0x43e   : > { %v1911_v6 = vadd.f32 %v1907_v57, %v1891_v51 }
 0x440   : > { %v1915_v59 = vmul.f32 0.7978846, %v1911_v6  ;;  %v4646_v60 = vpop.eup %4645 }
 0x441   : > { %v1922_v47 = vadd.f32 1.0, %v4646_v60 }
 0x442   : > { %4647 = vtanh.f32 %v1915_v59 }
 0x443   : > { %v1926_v38 = vmul.f32 %v1922_v47, %v1894_v11 }
 0x448   : > { %v4648_v36 = vpop.eup %4647 }
 0x449   : > { %v1923_v32 = vadd.f32 1.0, %v4648_v36 }
 0x44b   : > { %v1927_v16 = vmul.f32 %v1923_v32, %v1895_v54  ;;  %v4386_v32 = vld [vmem:[#allocation8 + $0x38] sm:$0xff] }
 0x44d   : > { %v1929_v2 = vpack.c.bf16 %v1927_v16, %v1926_v38  ;;  %v4385_v38 = vld [vmem:[#allocation8 + $0x30] sm:$0xff]  ;;  %v4384_v16 = vld [vmem:[#allocation8 + $0x28] sm:$0xff] }
 0x44f   : > { %1981 = vmatpush.bf16.msra.mxu3 %v1929_v2 }
 0x453   : > { %1982 = vmatpush.bf16.msra.mxu3 %v1928_v25 }
 0x456   : > { %3930 = vmatmul.msk.bf16.vlgmr.msra.gmra.mxu3 %vm1971_vm7, %v4361_v3 }
 0x457   : > { %2004 = vmatpush.bf16.msrb.mxu3 %v1929_v2  ;;  %v4382_v2 = vld [vmem:[#allocation8 + $0x18] sm:$0xff] }
 0x45b   : > { %2005 = vmatpush.bf16.msrb.mxu3 %v1928_v25 }
 0x45f   : > { %2274 = vmatpush.bf16.msra.mxu3 %v4386_v32 }
 0x463   : > { %2275 = vmatpush.bf16.msra.mxu3 %v4385_v38 }
 0x466   : > { %3935 = vmatmul.msk.bf16.vlgmr.msrb.gmra.mxu3 %vm1971_vm7, %v4362_v4 }
 0x467   : > { %2276 = vmatpush.bf16.msra.mxu3 %v4384_v16 }
 0x46b   : > { %2277 = vmatpush.bf16.msra.mxu3 %v4383_v1 }
 0x46f   : > { %2278 = vmatpush.bf16.msra.mxu3 %v4382_v2 }
 0x473   : > { %2279 = vmatpush.bf16.msra.mxu3 %v4381_v7 }
 0x477   : > { %2280 = vmatpush.bf16.msra.mxu3 %v4380_v20 }
 0x47b   : > { %2281 = vmatpush.bf16.msra.mxu3 %v4379_v13 }
 0x4d9   : > { %v1984_v31 = vpop.f32.mrf.mxu3 }
 0x4e1   : > { %v1986_v52 = vpop.f32.mrf.mxu3 }
 0x4e2   : > { %v1989_v17 = vpack.c.bf16 %v1986_v52, %v1984_v31 }
 0x4e4   : > { %2131 = vmatmul.bf16.vlgmr.msrb.gmra.mxu2 %v1989_v17 }
 0x4e9   : > { %v2007_v43 = vpop.f32.mrf.mxu3 }
 0x4f1   : > { %v2009_v39 = vpop.f32.mrf.mxu3 }
 0x4f2   : > { %v2012_v58 = vpack.c.bf16 %v2009_v39, %v2007_v43 }
 0x4f4   : > { %2069 = vmatmul.bf16.vlgmr.msrb.gmra.mxu1 %v2012_v58 }
 0x567   : > { %v2132_v18 = vpop.f32.mrf.mxu2 }
 0x56f   : > { %v2134_v23 = vpop.f32.mrf.mxu2 }
 0x571   : > { %v2070_v62 = vpop.f32.mrf.mxu1 }
 0x572   : > { %v2133_v8 = vadd.f32 %v2132_v18, %v2070_v62 }
 0x574   : > { %v2139_v19 = vmul.f32 0.044715, %v2133_v8  ;;  %v2137_v28 = vmul.f32 0.5, %v2133_v8 }
 0x576   : > { %v2141_v21 = vmul.f32 %v2139_v19, %v2133_v8 }
 0x578   : > { %v2143_v22 = vmul.f32 %v2141_v21, %v2133_v8 }
 0x579   : > { %v2072_v53 = vpop.f32.mrf.mxu1 }
 0x57a   : > { %v2135_v33 = vadd.f32 %v2134_v23, %v2072_v53  ;;  %v2145_v35 = vadd.f32 %v2143_v22, %v2133_v8  ;;  %v5930_v8 = vld [vmem:[%s6281_s1] sm:$0xff] }
 0x57b   : > { %v2202_v19 = vperm.slane %v5930_v8, 2  ;;  %v2328_v16 = vperm.slane %v5930_v8, 5 }
 0x57c   : > { %v2147_v37 = vmul.f32 0.7978846, %v2145_v35  ;;  %v2140_v45 = vmul.f32 0.044715, %v2135_v33  ;;  %v2138_v26 = vmul.f32 0.5, %v2135_v33 }
 0x57e   : > { %4649 = vtanh.f32 %v2147_v37  ;;  %v2142_v55 = vmul.f32 %v2140_v45, %v2135_v33 }
 0x580   : > { %v2144_v56 = vmul.f32 %v2142_v55, %v2135_v33 }
 0x582   : > { %v2146_v27 = vadd.f32 %v2144_v56, %v2135_v33  ;;  %v2205_v33 = vperm.slane %v5930_v8, 3  ;;  %v2225_v56 = vperm.slane %v5930_v8, 4 }
 0x584   : > { %v4650_v34 = vpop.eup %4649  ;;  %v2148_v51 = vmul.f32 0.7978846, %v2146_v27 }
 0x585   : > { %v2151_v29 = vadd.f32 1.0, %v4650_v34 }
 0x586   : > { %4651 = vtanh.f32 %v2148_v51 }
 0x587   : > { %v2153_v30 = vmul.f32 %v2151_v29, %v2137_v28  ;;  %4653 = vrcp.f32 %v5201_v50 }
 0x589   : > { %2155 = vadd.xlane.f32.xlu0 %v2153_v30 }
 0x58c   : > { %v4652_v41 = vpop.eup %4651 }
 0x58d   : > { %v2152_v42 = vadd.f32 1.0, %v4652_v41  ;;  %v4654_v46 = vpop.eup %4653 }
 0x58e   : > { %v2160_v24 = vmul.f32 128.0, %v4654_v46  ;;  %vm2164_vm8 = vweird.f32 %v4654_v46 }
 0x58f   : > { %v2154_v40 = vmul.f32 %v2152_v42, %v2138_v26 }
 0x590   : > { %v2161_v57 = vsub.f32 1.0, %v2160_v24 }
 0x591   : > { %2157 = vadd.xlane.f32.xlu0 %v2154_v40 }
 0x592   : > { %v2162_v25 = vmul.f32 %v4654_v46, %v2161_v57 }
 0x594   : > { %v2163_v6 = vadd.f32 %v4654_v46, %v2162_v25 }
 0x596   : > { %v5921_v59 = vsel %vm2164_vm8, %v4654_v46, %v2163_v6 }
 0x5fc   : > { %v2156_v60 = vpop.xlane.xlu0 %2155 }
 0x5fd   : > { %v2166_v63 = vmul.f32 %v5921_v59, %v2156_v60 }
 0x5ff   : > { %v2168_v48 = vsub.f32 %v2153_v30, %v2166_v63 }
 0x601   : > { %v2170_v47 = vmul.f32 %v2168_v48, %v2168_v48 }
 0x603   : > { %2172 = vadd.xlane.f32.xlu1 %v2170_v47 }
 0x604   : > { %v2158_v36 = vpop.xlane.xlu0 %2157 }
 0x605   : > { %v2167_v5 = vmul.f32 %v5921_v59, %v2158_v36 }
 0x607   : > { %v2169_v11 = vsub.f32 %v2154_v40, %v2167_v5 }
 0x609   : > { %v2171_v54 = vmul.f32 %v2169_v11, %v2169_v11 }
 0x60b   : > { %2174 = vadd.xlane.f32.xlu1 %v2171_v54 }
 0x676   : > { %v2173_v3 = vpop.xlane.xlu1 %2172 }
 0x677   : > { %v2176_v4 = vmul.f32 %v2173_v3, %v5921_v59  ;;  %v2331_v3 = vperm.slane %v5930_v8, 6 }
 0x679   : > { %v2178_v0 = vadd.f32 1e-05, %v2176_v4 }
 0x67b   : > { %4655 = vrsqrt.f32 %v2178_v0  ;;  %vm2186_vm10 = vweird.f32 %v2178_v0 }
 0x67e   : > { %v2175_v49 = vpop.xlane.xlu1 %2174 }
 0x67f   : > { %v2177_v9 = vmul.f32 %v2175_v49, %v5921_v59 }
 0x681   : > { %v4656_v10 = vpop.eup %4655  ;;  %v2179_v12 = vadd.f32 1e-05, %v2177_v9 }
 0x682   : > { %v2181_v44 = vmul.f32 %v4656_v10, %v2178_v0  ;;  %vm2187_vm9 = vweird.f32 %v4656_v10 }
 0x683   : > { %4657 = vrsqrt.f32 %v2179_v12  ;;  %vm2188_vm11 = vmor %vm2186_vm10, %vm2187_vm9  ;;  %vm2196_vm13 = vweird.f32 %v2179_v12 }
 0x684   : > { %v2182_v14 = vmul.f32 %v4656_v10, %v2181_v44 }
 0x686   : > { %v2183_v15 = vmul.f32 0.5, %v2182_v14 }
 0x688   : > { %v2184_v61 = vsub.f32 1.5, %v2183_v15 }
 0x689   : > { %v4658_v31 = vpop.eup %4657 }
 0x68a   : > { %v2185_v52 = vmul.f32 %v4656_v10, %v2184_v61  ;;  %v2191_v17 = vmul.f32 %v4658_v31, %v2179_v12  ;;  %vm2197_vm12 = vweird.f32 %v4658_v31 }
 0x68b   : > { %vm2198_vm14 = vmor %vm2196_vm13, %vm2197_vm12 }
 0x68c   : > { %v2192_v43 = vmul.f32 %v4658_v31, %v2191_v17  ;;  %v2189_v39 = vsel %vm2188_vm11, %v4656_v10, %v2185_v52 }
 0x68d   : > { %v2200_v62 = vmul.f32 %v2189_v39, %v2168_v48 }
 0x68e   : > { %v2193_v58 = vmul.f32 0.5, %v2192_v43 }
 0x68f   : > { %v2203_v53 = vmul.f32 %v2202_v19, %v2200_v62 }
 0x690   : > { %v2194_v18 = vsub.f32 1.5, %v2193_v58 }
 0x691   : > { %v2206_v37 = vadd.f32 %v2205_v33, %v2203_v53 }
 0x692   : > { %v2195_v21 = vmul.f32 %v4658_v31, %v2194_v18 }
 0x694   : > { %v2199_v22 = vsel %vm2198_vm14, %v4658_v31, %v2195_v21 }
 0x695   : > { %v2201_v23 = vmul.f32 %v2199_v22, %v2169_v11 }
 0x697   : > { %v2204_v35 = vmul.f32 %v2202_v19, %v2201_v23 }
 0x699   : > { %v2207_v45 = vadd.f32 %v2205_v33, %v2204_v35 }
 0x69b   : > { %v2208_v55 = vpack.c.bf16 %v2207_v45, %v2206_v37 }
 0x69d   : > { %2282 = vmatmul.bf16.vlgmr.msra.gmra.mxu3 %v2208_v55 }
 0x720   : > { %v2283_v27 = vpop.f32.mrf.mxu3 }
 0x721   : > { %v2284_v34 = vadd.f32 %v2283_v27, %v2225_v56 }
 0x723   : > { %2288 = vadd.xlane.f32.xlu2 %v2284_v34 }
 0x728   : > { %v2285_v51 = vpop.f32.mrf.mxu3 }
 0x729   : > { %v2286_v28 = vadd.f32 %v2285_v51, %v2225_v56 }
 0x72b   : > { %2290 = vadd.xlane.f32.xlu2 %v2286_v28 }
 0x796   : > { %v2289_v29 = vpop.xlane.xlu2 %2288 }
 0x797   : > { %v2292_v30 = vmul.f32 %v2289_v29, %v5921_v59 }
 0x799   : > { %v2294_v41 = vsub.f32 %v2284_v34, %v2292_v30 }
 0x79b   : > { %v2296_v26 = vmul.f32 %v2294_v41, %v2294_v41 }
 0x79d   : > { %2298 = vadd.xlane.f32.xlu0 %v2296_v26 }
 0x79e   : > { %v2291_v42 = vpop.xlane.xlu2 %2290 }
 0x79f   : > { %v2293_v40 = vmul.f32 %v2291_v42, %v5921_v59 }
 0x7a1   : > { %v2295_v50 = vsub.f32 %v2286_v28, %v2293_v40 }
 0x7a3   : > { %v2297_v46 = vmul.f32 %v2295_v50, %v2295_v50 }
 0x7a5   : > { %2300 = vadd.xlane.f32.xlu1 %v2297_v46 }
 0x810   : > { %v2299_v24 = vpop.xlane.xlu0 %2298 }
 0x811   : > { %v2302_v57 = vmul.f32 %v2299_v24, %v5921_v59 }
 0x813   : > { %v2304_v25 = vadd.f32 1e-05, %v2302_v57 }
 0x815   : > { %4659 = vrsqrt.f32 %v2304_v25  ;;  %vm2312_vm0 = vweird.f32 %v2304_v25 }
 0x818   : > { %v2301_v6 = vpop.xlane.xlu1 %2300 }
 0x819   : > { %v2303_v60 = vmul.f32 %v2301_v6, %v5921_v59 }
 0x81b   : > { %v4660_v63 = vpop.eup %4659  ;;  %v2305_v48 = vadd.f32 1e-05, %v2303_v60 }
 0x81c   : > { %v2307_v47 = vmul.f32 %v4660_v63, %v2304_v25  ;;  %vm2313_vm15 = vweird.f32 %v4660_v63 }
 0x81d   : > { %4661 = vrsqrt.f32 %v2305_v48  ;;  %vm2314_vm1 = vmor %vm2312_vm0, %vm2313_vm15  ;;  %vm2322_vm3 = vweird.f32 %v2305_v48 }
 0x81e   : > { %v2308_v36 = vmul.f32 %v4660_v63, %v2307_v47 }
 0x820   : > { %v2309_v5 = vmul.f32 0.5, %v2308_v36 }
 0x822   : > { %v2310_v11 = vsub.f32 1.5, %v2309_v5 }
 0x823   : > { %v4662_v54 = vpop.eup %4661 }
 0x824   : > { %v2311_v32 = vmul.f32 %v4660_v63, %v2310_v11  ;;  %v2317_v38 = vmul.f32 %v4662_v54, %v2305_v48  ;;  %vm2323_vm2 = vweird.f32 %v4662_v54 }
 0x825   : > { %vm2324_vm4 = vmor %vm2322_vm3, %vm2323_vm2 }
 0x826   : > { %v2315_v1 = vsel %vm2314_vm1, %v4660_v63, %v2311_v32  ;;  %v2318_v2 = vmul.f32 %v4662_v54, %v2317_v38 }
 0x827   : > { %v2326_v59 = vmul.f32 %v2315_v1, %v2294_v41 }
 0x828   : > { %v2319_v4 = vmul.f32 0.5, %v2318_v2 }
 0x829   : > { %v2329_v0 = vmul.f32 %v2328_v16, %v2326_v59 }
 0x82a   : > { %v2320_v7 = vsub.f32 1.5, %v2319_v4 }
 0x82b   : > { %v2332_v20 = vadd.f32 %v2331_v3, %v2329_v0 }
 0x82c   : > { %v2321_v49 = vmul.f32 %v4662_v54, %v2320_v7 }
 0x82d   : > { %2334 = vst [vmem:[#allocation2] sm:$0xff] %v2332_v20 }
 0x82e   : > { %v2325_v9 = vsel %vm2324_vm4, %v4662_v54, %v2321_v49 }
 0x82f   : > { %v2327_v10 = vmul.f32 %v2325_v9, %v2295_v50 }
 0x831   : > { %v2330_v12 = vmul.f32 %v2328_v16, %v2327_v10 }
 0x833   : > { %v2333_v13 = vadd.f32 %v2331_v3, %v2330_v12 }
 0x835   : > { %2335 = vst [vmem:[#allocation2 + $0x8] sm:$0xff] %v2333_v13 }
 0x836 PF: > { %v4408_v44 = vld [vmem:[%s5561_s9 + $0xac] sm:$0xf]  ;;  %v4120_v14 = vld [vmem:[%s5561_s9 + $0xb4] sm:$0xf0]  ;;  %v4405_v15 = vld [vmem:[%s5561_s9 + $0x94] sm:$0xf] }
 0x837   : > { %v4123_v61 = vor.u32 %v4408_v44, %v4120_v14  ;;  %v4108_v31 = vld [vmem:[%s5561_s9 + $0x9c] sm:$0xf0]  ;;  %v4118_v52 = vld [vmem:[%s5561_s9 + $0xa8] sm:$0xf]  ;;  %v4409_v17 = vld [vmem:[%s5561_s9 + $0xb0] sm:$0xf0] }
 0x838   : > { %v4119_v43 = vor.u32 %v4409_v17, %v4118_v52  ;;  %v4106_v39 = vld [vmem:[%s5561_s9 + $0x90] sm:$0xf]  ;;  %v4111_v58 = vor.u32 %v4405_v15, %v4108_v31  ;;  %v4402_v18 = vld [vmem:[%s5561_s9 + $0x7c] sm:$0xf]  ;;  %v4096_v8 = vld [vmem:[%s5561_s9 + $0x84] sm:$0xf0] }
 0x839   : > { %2522 = vmatpush.bf16.msra.mxu1 %v4123_v61  ;;  %v4406_v62 = vld [vmem:[%s5561_s9 + $0x98] sm:$0xf0]  ;;  %v4126_v21 = vld [vmem:[%s5561_s9 + $0xb0] sm:$0xf]  ;;  %v4094_v53 = vld [vmem:[%s5561_s9 + $0x78] sm:$0xf]  ;;  %v4099_v45 = vor.u32 %v4402_v18, %v4096_v8 }
 0x83a   : > { %2508 = vmatpush.bf16.msra.mxu0 %v4119_v43  ;;  %v4107_v19 = vor.u32 %v4406_v62, %v4106_v39  ;;  %v4410_v22 = vld [vmem:[%s5561_s9 + $0xb8] sm:$0xf0]  ;;  %v4403_v33 = vld [vmem:[%s5561_s9 + $0x80] sm:$0xf0]  ;;  %v4114_v35 = vld [vmem:[%s5561_s9 + $0x98] sm:$0xf] }
 0x83b   : > { %v4127_v23 = vor.u32 %v4410_v22, %v4126_v21  ;;  %v4407_v37 = vld [vmem:[%s5561_s9 + $0xa0] sm:$0xf0]  ;;  %v4084_v27 = vld [vmem:[%s5561_s9 + $0x6c] sm:$0xf0]  ;;  %v4095_v34 = vor.u32 %v4403_v33, %v4094_v53  ;;  %v4102_v51 = vld [vmem:[%s5561_s9 + $0x80] sm:$0xf] }
 0x83c   : > { %v4399_v55 = vld [vmem:[%s5561_s9 + $0x64] sm:$0xf]  ;;  %v4115_v56 = vor.u32 %v4407_v37, %v4114_v35  ;;  %v4404_v28 = vld [vmem:[%s5561_s9 + $0x88] sm:$0xf0]  ;;  %v4082_v29 = vld [vmem:[%s5561_s9 + $0x60] sm:$0xf] }
 0x83d   : > { %2523 = vmatpush.bf16.msra.mxu1 %v4111_v58  ;;  %2536 = vmatpush.bf16.msra.mxu2 %v4127_v23  ;;  %v4400_v30 = vld [vmem:[%s5561_s9 + $0x68] sm:$0xf0]  ;;  %v4087_v41 = vor.u32 %v4399_v55, %v4084_v27  ;;  %v4103_v42 = vor.u32 %v4404_v28, %v4102_v51  ;;  %v4072_v40 = vld [vmem:[%s5561_s9 + $0x54] sm:$0xf0]  ;;  %v4090_v46 = vld [vmem:[%s5561_s9 + $0x68] sm:$0xf] }
 0x83e   : > { %2509 = vmatpush.bf16.msra.mxu0 %v4107_v19  ;;  %v4396_v26 = vld [vmem:[%s5561_s9 + $0x4c] sm:$0xf]  ;;  %v4083_v50 = vor.u32 %v4400_v30, %v4082_v29  ;;  %v4401_v24 = vld [vmem:[%s5561_s9 + $0x70] sm:$0xf0]  ;;  %v4070_v57 = vld [vmem:[%s5561_s9 + $0x48] sm:$0xf] }
 0x83f   : > { %v4397_v25 = vld [vmem:[%s5561_s9 + $0x50] sm:$0xf0]  ;;  %v4075_v6 = vor.u32 %v4396_v26, %v4072_v40  ;;  %v4091_v63 = vor.u32 %v4401_v24, %v4090_v46  ;;  %v4060_v48 = vld [vmem:[%s5561_s9 + $0x3c] sm:$0xf0]  ;;  %v4078_v36 = vld [vmem:[%s5561_s9 + $0x50] sm:$0xf] }
 0x840   : > { %v4393_v60 = vld [vmem:[%s5561_s9 + $0x34] sm:$0xf]  ;;  %v4071_v47 = vor.u32 %v4397_v25, %v4070_v57  ;;  %v4398_v5 = vld [vmem:[%s5561_s9 + $0x58] sm:$0xf0]  ;;  %v4058_v11 = vld [vmem:[%s5561_s9 + $0x30] sm:$0xf] }
 0x841   : > { %2524 = vmatpush.bf16.msra.mxu1 %v4099_v45  ;;  %2537 = vmatpush.bf16.msra.mxu2 %v4115_v56  ;;  %v4394_v54 = vld [vmem:[%s5561_s9 + $0x38] sm:$0xf0]  ;;  %v4063_v32 = vor.u32 %v4393_v60, %v4060_v48  ;;  %v4079_v16 = vor.u32 %v4398_v5, %v4078_v36  ;;  %v4048_v1 = vld [vmem:[%s5561_s9 + $0x24] sm:$0xf0]  ;;  %v4066_v3 = vld [vmem:[%s5561_s9 + $0x38] sm:$0xf] }
 0x842   : > { %2510 = vmatpush.bf16.msra.mxu0 %v4095_v34  ;;  %v4390_v38 = vld [vmem:[%s5561_s9 + $0x1c] sm:$0xf]  ;;  %v4059_v2 = vor.u32 %v4394_v54, %v4058_v11  ;;  %v4395_v59 = vld [vmem:[%s5561_s9 + $0x40] sm:$0xf0]  ;;  %v4046_v4 = vld [vmem:[%s5561_s9 + $0x18] sm:$0xf] }
 0x843   : > { %v4391_v0 = vld [vmem:[%s5561_s9 + $0x20] sm:$0xf0]  ;;  %v4051_v7 = vor.u32 %v4390_v38, %v4048_v1  ;;  %v4067_v49 = vor.u32 %v4395_v59, %v4066_v3  ;;  %v4036_v9 = vld [vmem:[%s5561_s9 + $0xc] sm:$0xf0]  ;;  %v4054_v12 = vld [vmem:[%s5561_s9 + $0x20] sm:$0xf] }
 0x844   : > { %v4387_v20 = vld [vmem:[%s5561_s9 + $0x4] sm:$0xf]  ;;  %v4047_v10 = vor.u32 %v4391_v0, %v4046_v4  ;;  %v4392_v13 = vld [vmem:[%s5561_s9 + $0x28] sm:$0xf0]  ;;  %v4034_v44 = vld [vmem:[%s5561_s9] sm:$0xf] }
 0x845   : > { %2525 = vmatpush.bf16.msra.mxu1 %v4087_v41  ;;  %2538 = vmatpush.bf16.msra.mxu2 %v4103_v42  ;;  %v4388_v14 = vld [vmem:[%s5561_s9 + $0x8] sm:$0xf0]  ;;  %v4039_v15 = vor.u32 %v4387_v20, %v4036_v9  ;;  %v5987_v61 = vld [vmem:[#allocation2] sm:$0xff]  ;;  %v5989_v31 = vld [vmem:[#allocation2 + $0x8] sm:$0xff]  ;;  %v4055_v52 = vor.u32 %v4392_v13, %v4054_v12  ;;  %vm2583_vm5 = vcmask 130048  }
 0x846   : > { %2511 = vmatpush.bf16.msra.mxu0 %v4083_v50  ;;  %v4035_v17 = vor.u32 %v4388_v14, %v4034_v44  ;;  %v4042_v43 = vld [vmem:[%s5561_s9 + $0x8] sm:$0xf]  ;;  %v4389_v39 = vld [vmem:[%s5561_s9 + $0x10] sm:$0xf0]  ;;  %v2339_v58 = vpack.c.bf16 %v5989_v31, %v5987_v61  ;;  %v2372_v8 = vld [vmem:[%s5567_s24] sm:$0x7] }
 0x847   : > { %v4043_v18 = vor.u32 %v4389_v39, %v4042_v43  ;;  %v2374_v19 = vperm.slane %v2372_v8, 0  ;;  %v2375_v21 = vperm.slane %v2372_v8, 1  ;;  %v5996_v23 = vld [vmem:[#allocation9] sm:$0xf]  ;;  %v2376_v51 = vperm.slane %v2372_v8, 2  ;;  %v6022_v60 = vld [vmem:[#allocation11] sm:$0xff] }
 0x848   : > { %v6001_v45 = vperm.slane %v5996_v23, 0  ;;  %v6004_v55 = vperm.slane %v5996_v23, 2  ;;  %v2608_v26 = vperm.slane %v5996_v23, 1  ;;  %v6026_v5 = vld [vmem:[#allocation11 + $0x8] sm:$0xff]  ;;  %v2805_v44 = vperm.slane %v5996_v23, 3  ;;  %s6284_s9 = sld [smem:[#allocation30_spill]] }
 0x849   : > { %2526 = vmatpush.bf16.msra.mxu1 %v4075_v6  ;;  %2539 = vmatpush.bf16.msra.mxu2 %v4091_v63 }
 0x84a   : > { %2512 = vmatpush.bf16.msra.mxu0 %v4071_v47 }
 0x84d   : > { %2527 = vmatpush.bf16.msra.mxu1 %v4063_v32  ;;  %2540 = vmatpush.bf16.msra.mxu2 %v4079_v16 }
 0x84e   : > { %2513 = vmatpush.bf16.msra.mxu0 %v4059_v2  ;;  %p4296_p5 = scmp.ne.s32.totalorder %s6284_s9, 1 }
 0x851   : > { %2528 = vmatpush.bf16.msra.mxu1 %v4051_v7  ;;  %2541 = vmatpush.bf16.msra.mxu2 %v4067_v49 }
 0x852   : > { %2514 = vmatpush.bf16.msra.mxu0 %v4047_v10 }
 0x855   : > { %2529 = vmatpush.bf16.msra.mxu1 %v4039_v15  ;;  %2542 = vmatpush.bf16.msra.mxu2 %v4055_v52 }
 0x856   : > { %2515 = vmatpush.bf16.msra.mxu0 %v4035_v17 }
 0x858   : > { %2530 = vmatmul.bf16.vlgmr.msra.gmra.mxu1 %v2339_v58 }
 0x859   : > { %2516 = vmatmul.bf16.vlgmr.msra.gmra.mxu0 %v2339_v58  ;;  %2543 = vmatpush.bf16.msra.mxu2 %v4043_v18 }
 0x85c   : > { %2544 = vmatmul.bf16.vlgmr.msra.gmra.mxu2 %v2339_v58 }
 0x8d5   : > { %v2531_v62 = vpop.f32.mrf.mxu1 }
 0x8d6   : > { %v2517_v22 = vpop.f32.mrf.mxu0  ;;  %v2532_v56 = vadd.f32 %v2531_v62, %v2375_v21 }
 0x8d7   : > { %v5998_v35 = vadd.f32 %v2517_v22, %v2374_v19 }
 0x8d9   : > { %v2554_v27 = vmul.f32 %v6001_v45, %v5998_v35  ;;  %v2721_v34 = vmul.f32 %v6004_v55, %v5998_v35  ;;  %v2609_v57 = vmul.f32 %v2608_v26, %v5998_v35 }
 0x8dd   : > { %v2533_v53 = vpop.f32.mrf.mxu1 }
 0x8de   : > { %v2534_v33 = vadd.f32 %v2533_v53, %v2375_v21  ;;  %v2519_v28 = vpop.f32.mrf.mxu0 }
 0x8df   : > { %v2545_v37 = vpop.f32.mrf.mxu2  ;;  %v6013_v42 = vadd.f32 %v2519_v28, %v2374_v19 }
 0x8e0   : > { %2570 = vmatpush.xpose.msra.mxu3 %v2534_v33  ;;  %2737 = vmatpush.xpose.msrb.mxu2 %v2534_v33  ;;  %v6010_v29 = vadd.f32 %v2545_v37, %v2376_v51 }
 0x8e1   : > { %v2555_v46 = vmul.f32 %v6001_v45, %v6013_v42  ;;  %v2722_v24 = vmul.f32 %v6004_v55, %v6013_v42  ;;  %v2610_v25 = vmul.f32 %v2608_v26, %v6013_v42 }
 0x8e2   : > { %v2660_v50 = vmul.f32 %v2608_v26, %v6010_v29  ;;  %v2606_v15 = vmul.f32 %v6001_v45, %v6010_v29  ;;  %v2772_v43 = vmul.f32 %v6004_v55, %v6010_v29  ;;  %v2857_v58 = vmul.f32 %v2805_v44, %v6010_v29 }
 0x8e4   : > { %2571 = vmatpush.xpose.msra.mxu3 %v2532_v56  ;;  %2738 = vmatpush.xpose.msrb.mxu2 %v2532_v56 }
 0x8e7   : > { %2572 = vmatmul.f32.vlgmr.msra.gmra.mxu3 %v2554_v27  ;;  %2739 = vmatmul.f32.vlgmr.msrb.gmra.mxu2 %v2721_v34  ;;  %v2547_v30 = vpop.f32.mrf.mxu2 }
 0x8e8   : > { %2625 = vmatpush.xpose.msrb.mxu3 %v2534_v33  ;;  %v2548_v41 = vadd.f32 %v2547_v30, %v2376_v51 }
 0x8ea   : > { %v2661_v40 = vmul.f32 %v2608_v26, %v2548_v41  ;;  %v2607_v14 = vmul.f32 %v6001_v45, %v2548_v41  ;;  %v2773_v52 = vmul.f32 %v6004_v55, %v2548_v41  ;;  %v2858_v17 = vmul.f32 %v2805_v44, %v2548_v41 }
 0x8ec   : > { %2626 = vmatpush.xpose.msrb.mxu3 %v2532_v56  ;;  %2711 = vmatpush.msrb.mxu0 %v2607_v14 }
 0x8ed   : > { %2794 = vmatpush.msra.mxu2 %v2773_v52 }
 0x8ee   : > { %2712 = vmatpush.msrb.mxu0 %v2606_v15 }
 0x8ef   : > { %2575 = vmatmul.f32.gmra.mxu3 %v2555_v46  ;;  %2742 = vmatmul.f32.gmra.mxu2 %v2722_v24 }
 0x8f0   : > { %2682 = vmatpush.msra.mxu3 %v2661_v40  ;;  %2795 = vmatpush.msra.mxu2 %v2772_v43 }
 0x8f1   : > { %2879 = vmatpush.msra.mxu0 %v2858_v17 }
 0x8f2   : > { %2683 = vmatpush.msra.mxu3 %v2660_v50 }
 0x8f3   : > { %2880 = vmatpush.msra.mxu0 %v2857_v58 }
 0x8f7   : > { %2627 = vmatmul.f32.vlgmr.msrb.gmra.mxu3 %v2609_v57  ;;  %v2806_v57 = vmul.f32 %v2805_v44, %v5998_v35 }
 0x8f8   : > { %2822 = vmatpush.xpose.msrb.mxu3 %v2534_v33 }
 0x8fc   : > { %2823 = vmatpush.xpose.msrb.mxu3 %v2532_v56 }
 0x8ff   : > { %2630 = vmatmul.f32.gmra.mxu3 %v2610_v25 }
 0x96a   : > { %v2573_v6 = vpop.f32.mrf.mxu3  ;;  %v2740_v4 = vpop.f32.mrf.mxu2 }
 0x96b   : > { %v2579_v63 = vmul.f32 0.17677669, %v2573_v6  ;;  %v2746_v7 = vmul.f32 0.17677669, %v2740_v4 }
 0x96d   : > { %v2581_v48 = vadd.f32 %v2579_v63, %v6022_v60  ;;  %v6038_v49 = vadd.f32 %v2746_v7, %v6022_v60 }
 0x96f   : > { %v2584_v47 = vsel %vm2583_vm5, %v2581_v48, -inf  ;;  %v2750_v9 = vsel %vm2583_vm5, %v6038_v49, -inf }
 0x970   : > { %2585 = vmax.xlane.f32.xlu2 %v2584_v47  ;;  %v2807_v47 = vmul.f32 %v2805_v44, %v6013_v42 }
 0x972   : > { %v2576_v36 = vpop.f32.mrf.mxu3  ;;  %v2743_v22 = vpop.f32.mrf.mxu2 }
 0x973   : > { %v2580_v11 = vmul.f32 0.17677669, %v2576_v36  ;;  %v2747_v33 = vmul.f32 0.17677669, %v2743_v22 }
 0x975   : > { %v6029_v54 = vadd.f32 %v2580_v11, %v6026_v5  ;;  %v2749_v55 = vadd.f32 %v2747_v33, %v6026_v5 }
 0x977   : > { %v2587_v32 = vsel %vm2583_vm5, %v6029_v54, -inf  ;;  %v2753_v56 = vsel %vm2583_vm5, %v2749_v55, -inf }
 0x978   : > { %2588 = vmax.xlane.f32.xlu2 %v2587_v32 }
 0x97a   : > { %v2628_v38 = vpop.f32.mrf.mxu3 }
 0x97b   : > { %v2634_v16 = vmul.f32 0.17677669, %v2628_v38 }
 0x97d   : > { %v2636_v1 = vadd.f32 %v2634_v16, %v6022_v60 }
 0x97f   : > { %v2638_v2 = vsel %vm2583_vm5, %v2636_v1, -inf }
 0x980   : > { %2639 = vmax.xlane.f32.xlu0 %v2638_v2 }
 0x982   : > { %v2631_v3 = vpop.f32.mrf.mxu3 }
 0x983   : > { %v2635_v59 = vmul.f32 0.17677669, %v2631_v3 }
 0x985   : > { %v2637_v0 = vadd.f32 %v2635_v59, %v6026_v5 }
 0x987   : > { %v2641_v20 = vsel %vm2583_vm5, %v2637_v0, -inf }
 0x988   : > { %2642 = vmax.xlane.f32.xlu0 %v2641_v20 }
 0x990   : > { %2751 = vmax.xlane.f32.xlu0 %v2750_v9 }
 0x9e3   : > { %v2586_v21 = vpop.xlane.xlu2 %2585 }
 0x9e4   : > { %v2590_v53 = vsub.f32 %v2581_v48, %v2586_v21 }
 0x9e6   : > { %v2592_v45 = vmul.f32 1.442695, %v2590_v53 }
 0x9eb   : > { %v2589_v32 = vpop.xlane.xlu2 %2588 }
 0x9ec   : > { %v2591_v35 = vsub.f32 %v6029_v54, %v2589_v32 }
 0x9ee   : > { %v2594_v38 = vmul.f32 1.442695, %v2591_v35 }
 0x9f3   : > { %v2640_v10 = vpop.xlane.xlu0 %2639 }
 0x9f4   : > { %v2644_v12 = vsub.f32 %v2636_v1, %v2640_v10 }
 0x9f6   : > { %v2646_v13 = vmul.f32 1.442695, %v2644_v12 }
 0x9f8   : > { %4664 = vpow2.f32 %v2646_v13 }
 0x9fb   : > { %v2643_v39 = vpop.xlane.xlu0 %2642 }
 0x9fc   : > { %v2645_v18 = vsub.f32 %v2637_v0, %v2643_v39 }
 0x9fe   : > { %v4665_v62 = vpop.eup %4664  ;;  %v2648_v8 = vmul.f32 1.442695, %v2645_v18 }
 0x9ff   : > { %v2650_v19 = vsel %vm2583_vm5, %v4665_v62, 0.0 }
 0xa00   : > { %4666 = vpow2.f32 %v2648_v8  ;;  %2651 = vadd.xlane.f32.xlu1 %v2650_v19 }
 0xa01   : > { %4668 = vpow2.f32 %v2592_v45 }
 0xa03   : > { %v2752_v1 = vpop.xlane.xlu0 %2751 }
 0xa04   : > { %v2756_v59 = vsub.f32 %v6038_v49, %v2752_v1  ;;  %v6091_v1 = vld [vmem:[%s5577_s30] sm:$0xff] }
 0xa06   : > { %v4667_v23 = vpop.eup %4666  ;;  %v2758_v4 = vmul.f32 1.442695, %v2756_v59 }
 0xa07   : > { %v2653_v37 = vsel %vm2583_vm5, %v4667_v23, 0.0  ;;  %v4669_v27 = vpop.eup %4668 }
 0xa08   : > { %2654 = vadd.xlane.f32.xlu1 %v2653_v37  ;;  %v2596_v34 = vsel %vm2583_vm5, %v4669_v27, 0.0  ;;  %v4418_v37 = vld [vmem:[%s5569_s19 + $0x38] sm:$0xff] }
 0xa09   : > { %2956 = vmatpush.bf16.msrb.mxu1 %v4418_v37 }
 0xa10   : > { %2754 = vmax.xlane.f32.xlu1 %v2753_v56 }
 0xa18   : > { %2597 = vadd.xlane.f32.xlu1 %v2596_v34  ;;  %v4416_v34 = vld [vmem:[%s5569_s19 + $0x28] sm:$0xff] }
 0xa73   : > { %v2652_v51 = vpop.xlane.xlu1 %2651 }
 0xa74   : > { %4670 = vrcp.f32 %v2652_v51 }
 0xa7a   : > { %v4671_v28 = vpop.eup %4670 }
 0xa7b   : > { %v2658_v29 = vmul.f32 %v4671_v28, %v4665_v62  ;;  %v2655_v30 = vpop.xlane.xlu1 %2654 }
 0xa7c   : > { %4672 = vrcp.f32 %v2655_v30  ;;  %v4414_v30 = vld [vmem:[%s5569_s19 + $0x18] sm:$0xff] }
 0xa7d   : > { %4128 = vmatmul.msk.f32.vlgmr.msra.gmra.mxu3 %vm2583_vm5, %v2658_v29  ;;  %v4415_v29 = vld [vmem:[%s5569_s19 + $0x20] sm:$0xff] }
 0xa82   : > { %v4673_v41 = vpop.eup %4672 }
 0xa83   : > { %v2755_v26 = vpop.xlane.xlu1 %2754  ;;  %v2659_v40 = vmul.f32 %v4673_v41, %v4667_v23  ;;  %v4413_v41 = vld [vmem:[%s5569_s19 + $0x10] sm:$0xff] }
 0xa84   : > { %v2757_v50 = vsub.f32 %v2749_v55, %v2755_v26  ;;  %v4412_v26 = vld [vmem:[%s5569_s19 + $0x8] sm:$0xff] }
 0xa85   : > { %4129 = vmatmul.msk.f32.gmra.mxu3 %vm2583_vm5, %v2659_v40  ;;  %v4411_v40 = vld [vmem:[%s5569_s19] sm:$0xff] }
 0xa86   : > { %v2760_v46 = vmul.f32 1.442695, %v2757_v50 }
 0xa88   : > { %4674 = vpow2.f32 %v2760_v46 }
 0xa8b   : > { %v2598_v24 = vpop.xlane.xlu1 %2597 }
 0xa8c   : > { %4676 = vrcp.f32 %v2598_v24 }
 0xa8d   : > { %2824 = vmatmul.f32.vlgmr.msrb.gmra.mxu3 %v2806_v57  ;;  %4678 = vpow2.f32 %v2594_v38 }
 0xa8e   : > { %v4675_v25 = vpop.eup %4674  ;;  %4680 = vpow2.f32 %v2758_v4 }
 0xa8f   : > { %v2765_v6 = vsel %vm2583_vm5, %v4675_v25, 0.0 }
 0xa90   : > { %2766 = vadd.xlane.f32.xlu1 %v2765_v6 }
 0xa92   : > { %v4677_v63 = vpop.eup %4676 }
 0xa93   : > { %v2604_v48 = vmul.f32 %v4677_v63, %v4669_v27  ;;  %v4679_v20 = vpop.eup %4678  ;;  %v4417_v27 = vld [vmem:[%s5569_s19 + $0x30] sm:$0xff] }
 0xa94   : > { %v2599_v10 = vsel %vm2583_vm5, %v4679_v20, 0.0  ;;  %2957 = vmatpush.bf16.msrb.mxu1 %v4417_v27  ;;  %v4428_v27 = vld [vmem:[%s5571_s27 + $0x44] sm:$0xf0] }
 0xa95   : > { %4130 = vmatmul.msk.f32.vlgmr.msrb.gmra.mxu0 %vm2583_vm5, %v2604_v48  ;;  %2827 = vmatmul.f32.gmra.mxu3 %v2807_v47 }
 0xa98   : > { %2958 = vmatpush.bf16.msrb.mxu1 %v4416_v34  ;;  %v4427_v34 = vld [vmem:[%s5571_s27 + $0x44] sm:$0xf] }
 0xa9c   : > { %2959 = vmatpush.bf16.msrb.mxu1 %v4415_v29 }
 0xaa0   : > { %2960 = vmatpush.bf16.msrb.mxu1 %v4414_v30  ;;  %v4194_v30 = vld [vmem:[%s5571_s27 + $0x30] sm:$0xf] }
 0xaa4   : > { %2961 = vmatpush.bf16.msrb.mxu1 %v4413_v41  ;;  %v4426_v41 = vld [vmem:[%s5571_s27 + $0x34] sm:$0xf0] }
 0xaa8   : > { %2962 = vmatpush.bf16.msrb.mxu1 %v4412_v26  ;;  %v4425_v26 = vld [vmem:[%s5571_s27 + $0x34] sm:$0xf] }
 0xaac   : > { %2963 = vmatpush.bf16.msrb.mxu1 %v4411_v40  ;;  %v4195_v40 = vor.u32 %v4426_v41, %v4194_v30  ;;  %v4446_v30 = vld [vmem:[%s5575_s4 + $0x58] sm:$0xff]  ;;  %v4437_v41 = vld [vmem:[%s5575_s4 + $0x10] sm:$0xff] }
 0xb00   : > { %v6061_v36 = vpop.f32.mrf.mxu3 }
 0xb03   : > { %v2767_v8 = vpop.xlane.xlu1 %2766 }
 0xb08   : > { %v6063_v11 = vpop.f32.mrf.mxu3 }
 0xb10   : > { %v2825_v16 = vpop.f32.mrf.mxu3 }
 0xb11   : > { %v2831_v2 = vmul.f32 0.17677669, %v2825_v16 }
 0xb12   : > { %v2714_v50 = vpop.f32.mrf.mxu0 }
 0xb13   : > { %v2833_v3 = vadd.f32 %v2831_v2, %v6022_v60  ;;  %v4681_v60 = vpop.eup %4680  ;;  %v2715_v6 = vadd.f32 %v2714_v50, %v6061_v36  ;;  %v2907_v2 = vperm.slane %v6091_v1, 0  ;;  %v4196_v50 = vld [vmem:[%s5571_s27 + $0x38] sm:$0xf0] }
 0xb14   : > { %v2762_v12 = vsel %vm2583_vm5, %v4681_v60, 0.0 }
 0xb15   : > { %v2835_v42 = vsel %vm2583_vm5, %v2833_v3, -inf }
 0xb16   : > { %2836 = vmax.xlane.f32.xlu2 %v2835_v42 }
 0xb18   : > { %v2828_v0 = vpop.f32.mrf.mxu3 }
 0xb19   : > { %v2832_v7 = vmul.f32 0.17677669, %v2828_v0  ;;  %v5202_v0 = vmov 128.0  }
 0xb1b   : > { %v2834_v9 = vadd.f32 %v2832_v7, %v6026_v5 }
 0xb1d   : > { %v2838_v54 = vsel %vm2583_vm5, %v2834_v9, -inf }
 0xb1e   : > { %2839 = vmax.xlane.f32.xlu0 %v2838_v54  ;;  %2600 = vadd.xlane.f32.xlu2 %v2599_v10 }
 0xb26   : > { %2763 = vadd.xlane.f32.xlu0 %v2762_v12 }
 0xb89   : > { %v2837_v49 = vpop.xlane.xlu2 %2836 }
 0xb8a   : > { %v2841_v13 = vsub.f32 %v2833_v3, %v2837_v49 }
 0xb8c   : > { %v2843_v44 = vmul.f32 1.442695, %v2841_v13 }
 0xb8e   : > { %4682 = vpow2.f32 %v2843_v44 }
 0xb91   : > { %v2840_v14 = vpop.xlane.xlu0 %2839  ;;  %v2601_v15 = vpop.xlane.xlu2 %2600 }
 0xb92   : > { %v2842_v52 = vsub.f32 %v2834_v9, %v2840_v14  ;;  %4684 = vrcp.f32 %v2601_v15 }
 0xb94   : > { %v4683_v5 = vpop.eup %4682  ;;  %v2845_v17 = vmul.f32 1.442695, %v2842_v52  ;;  %v4226_v52 = vld [vmem:[%s5571_s27 + $0x70] sm:$0xf] }
 0xb95   : > { %v2847_v43 = vsel %vm2583_vm5, %v4683_v5, 0.0 }
 0xb96   : > { %4686 = vpow2.f32 %v2845_v17  ;;  %2848 = vadd.xlane.f32.xlu2 %v2847_v43  ;;  %v4433_v17 = vld [vmem:[%s5571_s27 + $0x74] sm:$0xf] }
 0xb98   : > { %v4685_v39 = vpop.eup %4684 }
 0xb99   : > { %v2764_v58 = vpop.xlane.xlu0 %2763  ;;  %v2605_v18 = vmul.f32 %v4685_v39, %v4679_v20  ;;  %v4228_v39 = vld [vmem:[%s5571_s27 + $0x78] sm:$0xf0] }
 0xb9a   : > { %4688 = vrcp.f32 %v2764_v58  ;;  %v4231_v58 = vor.u32 %v4433_v17, %v4228_v39 }
 0xb9b   : > { %4131 = vmatmul.msk.f32.gmra.mxu0 %vm2583_vm5, %v2605_v18  ;;  %4690 = vrcp.f32 %v2767_v8  ;;  %v4218_v18 = vld [vmem:[%s5571_s27 + $0x60] sm:$0xf]  ;;  %v4431_v8 = vld [vmem:[%s5571_s27 + $0x64] sm:$0xf] }
 0xb9c   : > { %v4687_v62 = vpop.eup %4686  ;;  %3142 = vmatpush.bf16.msra.mxu3 %v4231_v58 }
 0xb9d   : > { %v2850_v19 = vsel %vm2583_vm5, %v4687_v62, 0.0 }
 0xb9e   : > { %2851 = vadd.xlane.f32.xlu0 %v2850_v19 }
 0xba0   : > { %v4689_v21 = vpop.eup %4688 }
 0xba1   : > { %v2770_v22 = vmul.f32 %v4689_v21, %v4681_v60  ;;  %v4691_v23 = vpop.eup %4690  ;;  %v4220_v21 = vld [vmem:[%s5571_s27 + $0x68] sm:$0xf0] }
 0xba2   : > { %v2771_v53 = vmul.f32 %v4691_v23, %v4675_v25  ;;  %v4210_v23 = vld [vmem:[%s5571_s27 + $0x50] sm:$0xf] }
 0xba3   : > { %4132 = vmatmul.msk.f32.vlgmr.msra.gmra.mxu2 %vm2583_vm5, %v2770_v22  ;;  %v4223_v22 = vor.u32 %v4431_v8, %v4220_v21 }
 0xba5   : > { %3143 = vmatpush.bf16.msra.mxu3 %v4223_v22 }
 0xbab   : > { %4133 = vmatmul.msk.f32.gmra.mxu2 %vm2583_vm5, %v2771_v53  ;;  %v4430_v53 = vld [vmem:[%s5571_s27 + $0x54] sm:$0xf0] }
 0xbac   : > { %v4211_v37 = vor.u32 %v4430_v53, %v4210_v23  ;;  %v3022_v23 = vperm.slane %v6091_v1, 2 }
 0xc09   : > { %v2849_v33 = vpop.xlane.xlu2 %2848 }
 0xc0a   : > { %4692 = vrcp.f32 %v2849_v33  ;;  %v4429_v33 = vld [vmem:[%s5571_s27 + $0x54] sm:$0xf] }
 0xc10   : > { %v4693_v45 = vpop.eup %4692 }
 0xc11   : > { %v2855_v55 = vmul.f32 %v4693_v45, %v4683_v5  ;;  %v2852_v56 = vpop.xlane.xlu0 %2851  ;;  %v4434_v5 = vld [vmem:[%s5571_s27 + $0x74] sm:$0xf0]  ;;  %v4212_v45 = vld [vmem:[%s5571_s27 + $0x58] sm:$0xf0] }
 0xc12   : > { %4694 = vrcp.f32 %v2852_v56  ;;  %v4227_v43 = vor.u32 %v4434_v5, %v4226_v52  ;;  %v4202_v56 = vld [vmem:[%s5571_s27 + $0x40] sm:$0xf] }
 0xc13   : > { %4134 = vmatmul.msk.f32.vlgmr.msra.gmra.mxu0 %vm2583_vm5, %v2855_v55  ;;  %4696 = vrcp.f32 %v5202_v0  ;;  %v4215_v55 = vor.u32 %v4429_v33, %v4212_v45  ;;  %v4442_v45 = vld [vmem:[%s5575_s4 + $0x38] sm:$0xff] }
 0xc14   : > { %3128 = vmatpush.bf16.msrb.mxu2 %v4227_v43  ;;  %3323 = vmatpush.bf16.msrb.mxu0 %v4442_v45 }
 0xc15   : > { %3144 = vmatpush.bf16.msra.mxu3 %v4215_v55  ;;  %v4441_v55 = vld [vmem:[%s5575_s4 + $0x30] sm:$0xff] }
 0xc18   : > { %v4695_v51 = vpop.eup %4694  ;;  %v2717_v46 = vpop.f32.mrf.mxu0  ;;  %3324 = vmatpush.bf16.msrb.mxu0 %v4441_v55 }
 0xc19   : > { %v2856_v28 = vmul.f32 %v4695_v51, %v4687_v62  ;;  %v2718_v63 = vadd.f32 %v2717_v46, %v6063_v11  ;;  %v4697_v7 = vpop.eup %4696  ;;  %v4432_v62 = vld [vmem:[%s5571_s27 + $0x64] sm:$0xf0]  ;;  %v4203_v51 = vor.u32 %v4428_v27, %v4202_v56  ;;  %v4199_v46 = vor.u32 %v4425_v26, %v4196_v50  ;;  %v4449_v56 = vld [vmem:[%s5575_s4 + $0x70] sm:$0xff]  ;;  %v4440_v27 = vld [vmem:[%s5575_s4 + $0x28] sm:$0xff] }
 0xc1a   : > { %v2977_v20 = vmul.f32 128.0, %v4697_v7  ;;  %vm2981_vm6 = vweird.f32 %v4697_v7  ;;  %v4219_v19 = vor.u32 %v4432_v62, %v4218_v18  ;;  %v3019_v62 = vperm.slane %v6091_v1, 1  ;;  %v4445_v26 = vld [vmem:[%s5575_s4 + $0x50] sm:$0xff]  ;;  %v4444_v50 = vld [vmem:[%s5575_s4 + $0x48] sm:$0xff] }
 0xc1b   : > { %4135 = vmatmul.msk.f32.gmra.mxu0 %vm2583_vm5, %v2856_v28  ;;  %v4204_v28 = vld [vmem:[%s5571_s27 + $0x48] sm:$0xf0] }
 0xc1c   : > { %v2978_v9 = vsub.f32 1.0, %v2977_v20  ;;  %3129 = vmatpush.bf16.msrb.mxu2 %v4219_v19  ;;  %v4207_v29 = vor.u32 %v4427_v34, %v4204_v28  ;;  %v4448_v34 = vld [vmem:[%s5575_s4 + $0x68] sm:$0xff]  ;;  %3325 = vmatpush.bf16.msrb.mxu0 %v4440_v27  ;;  %v4447_v28 = vld [vmem:[%s5575_s4 + $0x60] sm:$0xff] }
 0xc1e   : > { %v2979_v54 = vmul.f32 %v4697_v7, %v2978_v9  ;;  %3145 = vmatpush.bf16.msra.mxu3 %v4207_v29  ;;  %v4438_v29 = vld [vmem:[%s5575_s4 + $0x18] sm:$0xff] }
 0xc20   : > { %v2980_v10 = vadd.f32 %v4697_v7, %v2979_v54  ;;  %3130 = vmatpush.bf16.msrb.mxu2 %v4211_v37 }
 0xc22   : > { %v6096_v60 = vsel %vm2981_vm6, %v4697_v7, %v2980_v10  ;;  %3146 = vmatpush.bf16.msra.mxu3 %v4199_v46  ;;  %v3042_v46 = vld [vmem:[%s5573_s21] sm:$0x3] }
 0xc24   : > { %3131 = vmatpush.bf16.msrb.mxu2 %v4203_v51  ;;  %v4439_v51 = vld [vmem:[%s5575_s4 + $0x20] sm:$0xff] }
 0xc25   : > { %3326 = vmatpush.bf16.msrb.mxu0 %v4439_v51 }
 0xc26   : > { %v2797_v24 = vpop.f32.mrf.mxu2 }
 0xc27   : > { %v2803_v48 = vadd.f32 %v2797_v24, %v2715_v6  ;;  %v4186_v24 = vld [vmem:[%s5571_s27 + $0x20] sm:$0xf] }
 0xc28   : > { %3132 = vmatpush.bf16.msrb.mxu2 %v4195_v40  ;;  %v4436_v40 = vld [vmem:[%s5575_s4 + $0x8] sm:$0xff] }
 0xc29   : > { %3327 = vmatpush.bf16.msrb.mxu0 %v4438_v29 }
 0xc2d   : > { %3328 = vmatpush.bf16.msrb.mxu0 %v4437_v41 }
 0xc2e   : > { %v2800_v25 = vpop.f32.mrf.mxu2 }
 0xc2f   : > { %v2804_v47 = vadd.f32 %v2800_v25, %v2718_v63  ;;  %v4423_v25 = vld [vmem:[%s5571_s27 + $0x24] sm:$0xf]  ;;  %v4188_v63 = vld [vmem:[%s5571_s27 + $0x28] sm:$0xf0] }
 0xc31   : > { %3329 = vmatpush.bf16.msrb.mxu0 %v4436_v40 }
 0xc90   : > { %v2882_v57 = vpop.f32.mrf.mxu0 }
 0xc91   : > { %v2888_v35 = vadd.f32 %v2882_v57, %v2803_v48  ;;  %v4424_v57 = vld [vmem:[%s5571_s27 + $0x24] sm:$0xf0]  ;;  %v4191_v48 = vor.u32 %v4423_v25, %v4188_v63  ;;  %v3044_v25 = vperm.slane %v3042_v46, 0 }
 0xc92   : > { %v4187_v6 = vor.u32 %v4424_v57, %v4186_v24  ;;  %v4435_v24 = vld [vmem:[%s5575_s4] sm:$0xff] }
 0xc93   : > { %3147 = vmatpush.bf16.msra.mxu3 %v4191_v48  ;;  %v4443_v57 = vld [vmem:[%s5575_s4 + $0x40] sm:$0xff]  ;;  %3330 = vmatpush.bf16.msrb.mxu0 %v4435_v24 }
 0xc94   : > { %3133 = vmatpush.bf16.msrb.mxu2 %v4187_v6  ;;  %v3045_v6 = vperm.slane %v3042_v46, 1 }
 0xc98   : > { %v2885_v32 = vpop.f32.mrf.mxu0 }
 0xc99   : > { %v2889_v38 = vadd.f32 %v2885_v32, %v2804_v47  ;;  %v4178_v47 = vld [vmem:[%s5571_s27 + $0x10] sm:$0xf]  ;;  %v4422_v32 = vld [vmem:[%s5571_s27 + $0x14] sm:$0xf0] }
 0xc9b   : > { %v2890_v16 = vpack.c.bf16 %v2889_v38, %v2888_v35  ;;  %v4421_v35 = vld [vmem:[%s5571_s27 + $0x14] sm:$0xf]  ;;  %v4179_v38 = vor.u32 %v4422_v32, %v4178_v47 }
 0xc9d   : > { %2964 = vmatmul.bf16.vlgmr.msrb.gmra.mxu1 %v2890_v16  ;;  %v4180_v16 = vld [vmem:[%s5571_s27 + $0x18] sm:$0xf0]  ;;  %3134 = vmatpush.bf16.msrb.mxu2 %v4179_v38 }
 0xd1a   : > { %v2965_v3 = vpop.f32.mrf.mxu1 }
 0xd1b   : > { %v2966_v59 = vadd.f32 %v2965_v3, %v2907_v2  ;;  %v4420_v3 = vld [vmem:[%s5571_s27 + $0x4] sm:$0xf0] }
 0xd1d   : > { %v2970_v42 = vadd.f32 %v2966_v59, %v5987_v61 }
 0xd1f   : > { %2972 = vadd.xlane.f32.xlu1 %v2970_v42 }
 0xd22   : > { %v2967_v4 = vpop.f32.mrf.mxu1 }
 0xd23   : > { %v2968_v36 = vadd.f32 %v2967_v4, %v2907_v2  ;;  %v4170_v2 = vld [vmem:[%s5571_s27] sm:$0xf]  ;;  %v4419_v4 = vld [vmem:[%s5571_s27 + $0x4] sm:$0xf] }
 0xd24   : > { %v4171_v0 = vor.u32 %v4420_v3, %v4170_v2 }
 0xd25   : > { %v2971_v11 = vadd.f32 %v2968_v36, %v5989_v31  ;;  %v4172_v36 = vld [vmem:[%s5571_s27 + $0x8] sm:$0xf0] }
 0xd26   : > { %v4175_v7 = vor.u32 %v4419_v4, %v4172_v36  ;;  %3135 = vmatpush.bf16.msrb.mxu2 %v4171_v0 }
 0xd27   : > { %2974 = vadd.xlane.f32.xlu2 %v2971_v11 }
 0xd92   : > { %v2973_v61 = vpop.xlane.xlu1 %2972 }
 0xd93   : > { %v2983_v12 = vmul.f32 %v6096_v60, %v2973_v61 }
 0xd95   : > { %v6099_v49 = vsub.f32 %v2970_v42, %v2983_v12  ;;  %v4183_v42 = vor.u32 %v4421_v35, %v4180_v16 }
 0xd97   : > { %v2987_v31 = vmul.f32 %v6099_v49, %v6099_v49  ;;  %3148 = vmatpush.bf16.msra.mxu3 %v4183_v42 }
 0xd99   : > { %2989 = vadd.xlane.f32.xlu0 %v2987_v31 }
 0xd9a   : > { %v2975_v13 = vpop.xlane.xlu2 %2974 }
 0xd9b   : > { %v2984_v44 = vmul.f32 %v6096_v60, %v2975_v13  ;;  %3149 = vmatpush.bf16.msra.mxu3 %v4175_v7 }
 0xd9d   : > { %v6104_v14 = vsub.f32 %v2971_v11, %v2984_v44 }
 0xd9f   : > { %v2988_v15 = vmul.f32 %v6104_v14, %v6104_v14 }
 0xda1   : > { %2991 = vadd.xlane.f32.xlu1 %v2988_v15 }
 0xe0c   : > { %v2990_v59 = vpop.xlane.xlu0 %2989 }
 0xe0d   : > { %v2993_v11 = vmul.f32 %v2990_v59, %v6096_v60 }
 0xe0f   : > { %v2995_v20 = vadd.f32 1e-05, %v2993_v11 }
 0xe11   : > { %4698 = vrsqrt.f32 %v2995_v20  ;;  %vm3003_vm8 = vweird.f32 %v2995_v20 }
 0xe14   : > { %v2992_v9 = vpop.xlane.xlu1 %2991 }
 0xe15   : > { %v2994_v54 = vmul.f32 %v2992_v9, %v6096_v60 }
 0xe17   : > { %v4699_v10 = vpop.eup %4698  ;;  %v2996_v61 = vadd.f32 1e-05, %v2994_v54 }
 0xe18   : > { %v2998_v12 = vmul.f32 %v4699_v10, %v2995_v20  ;;  %vm3004_vm7 = vweird.f32 %v4699_v10 }
 0xe19   : > { %4700 = vrsqrt.f32 %v2996_v61  ;;  %vm3005_vm9 = vmor %vm3003_vm8, %vm3004_vm7  ;;  %vm3013_vm11 = vweird.f32 %v2996_v61 }
 0xe1a   : > { %v2999_v31 = vmul.f32 %v4699_v10, %v2998_v12 }
 0xe1c   : > { %v3000_v13 = vmul.f32 0.5, %v2999_v31 }
 0xe1e   : > { %v3001_v44 = vsub.f32 1.5, %v3000_v13 }
 0xe1f   : > { %v4701_v15 = vpop.eup %4700 }
 0xe20   : > { %v3002_v52 = vmul.f32 %v4699_v10, %v3001_v44  ;;  %v3008_v5 = vmul.f32 %v4701_v15, %v2996_v61  ;;  %vm3014_vm10 = vweird.f32 %v4701_v15 }
 0xe21   : > { %vm3015_vm12 = vmor %vm3013_vm11, %vm3014_vm10 }
 0xe22   : > { %v3009_v17 = vmul.f32 %v4701_v15, %v3008_v5  ;;  %v3006_v43 = vsel %vm3005_vm9, %v4699_v10, %v3002_v52 }
 0xe23   : > { %v3017_v18 = vmul.f32 %v3006_v43, %v6099_v49 }
 0xe24   : > { %v3010_v39 = vmul.f32 0.5, %v3009_v17 }
 0xe25   : > { %v3020_v22 = vmul.f32 %v3019_v62, %v3017_v18 }
 0xe26   : > { %v3011_v58 = vsub.f32 1.5, %v3010_v39 }
 0xe27   : > { %v6146_v33 = vadd.f32 %v3022_v23, %v3020_v22 }
 0xe28   : > { %v3012_v8 = vmul.f32 %v4701_v15, %v3011_v58 }
 0xe2a   : > { %v3016_v19 = vsel %vm3015_vm12, %v4701_v15, %v3012_v8 }
 0xe2b   : > { %v3018_v21 = vmul.f32 %v3016_v19, %v6104_v14  ;;  %v4450_v14 = vld [vmem:[%s5575_s4 + $0x78] sm:$0xff] }
 0xe2c   : > { %3337 = vmatpush.bf16.msra.mxu1 %v4450_v14 }
 0xe2d   : > { %v3021_v53 = vmul.f32 %v3019_v62, %v3018_v21 }
 0xe2f   : > { %v6148_v49 = vadd.f32 %v3022_v23, %v3021_v53 }
 0xe30   : > { %3338 = vmatpush.bf16.msra.mxu1 %v4449_v56 }
 0xe31   : > { %v3025_v37 = vpack.c.bf16 %v6148_v49, %v6146_v33 }
 0xe33   : > { %3136 = vmatmul.bf16.vlgmr.msrb.gmra.mxu2 %v3025_v37  ;;  %3150 = vmatmul.bf16.vlgmr.msra.gmra.mxu3 %v3025_v37 }
 0xe34   : > { %3339 = vmatpush.bf16.msra.mxu1 %v4448_v34  ;;  %v3226_v34 = vperm.slane %v6091_v1, 3 }
 0xe38   : > { %3340 = vmatpush.bf16.msra.mxu1 %v4447_v28 }
 0xe3c   : > { %3341 = vmatpush.bf16.msra.mxu1 %v4446_v30 }
 0xe40   : > { %3342 = vmatpush.bf16.msra.mxu1 %v4445_v26 }
 0xe44   : > { %3343 = vmatpush.bf16.msra.mxu1 %v4444_v50 }
 0xe48   : > { %3344 = vmatpush.bf16.msra.mxu1 %v4443_v57 }
 0xeb6   : > { %v3137_v63 = vpop.f32.mrf.mxu2  ;;  %v3151_v48 = vpop.f32.mrf.mxu3 }
 0xeb7   : > { %v3138_v47 = vadd.f32 %v3137_v63, %v3044_v25  ;;  %v3152_v32 = vadd.f32 %v3151_v48, %v3045_v6 }
 0xeb9   : > { %v3160_v35 = vmul.f32 0.044715, %v3138_v47  ;;  %v3161_v38 = vmul.f32 0.044715, %v3152_v32  ;;  %v3156_v8 = vmul.f32 0.5, %v3138_v47  ;;  %v3157_v22 = vmul.f32 0.5, %v3152_v32 }
 0xebb   : > { %v3164_v16 = vmul.f32 %v3160_v35, %v3138_v47  ;;  %v3165_v2 = vmul.f32 %v3161_v38, %v3152_v32 }
 0xebd   : > { %v3168_v3 = vmul.f32 %v3164_v16, %v3138_v47  ;;  %v3169_v59 = vmul.f32 %v3165_v2, %v3152_v32 }
 0xebe   : > { %v3139_v42 = vpop.f32.mrf.mxu2  ;;  %v3153_v4 = vpop.f32.mrf.mxu3 }
 0xebf   : > { %v3172_v36 = vadd.f32 %v3168_v3, %v3138_v47  ;;  %v3140_v11 = vadd.f32 %v3139_v42, %v3044_v25  ;;  %v3154_v0 = vadd.f32 %v3153_v4, %v3045_v6  ;;  %v3173_v7 = vadd.f32 %v3169_v59, %v3152_v32 }
 0xec1   : > { %v3162_v20 = vmul.f32 0.044715, %v3140_v11  ;;  %v3163_v9 = vmul.f32 0.044715, %v3154_v0  ;;  %v3176_v54 = vmul.f32 0.7978846, %v3172_v36 }
 0xec2   : > { %v3177_v61 = vmul.f32 0.7978846, %v3173_v7  ;;  %v3158_v19 = vmul.f32 0.5, %v3140_v11  ;;  %v3159_v23 = vmul.f32 0.5, %v3154_v0 }
 0xec3   : > { %v3166_v10 = vmul.f32 %v3162_v20, %v3140_v11  ;;  %v3167_v12 = vmul.f32 %v3163_v9, %v3154_v0  ;;  %4702 = vtanh.f32 %v3176_v54  ;;  %v3393_v9 = vperm.slane %v6091_v1, 4 }
 0xec4   : > { %4704 = vtanh.f32 %v3177_v61  ;;  %v3396_v61 = vperm.slane %v6091_v1, 5 }
 0xec5   : > { %v3170_v31 = vmul.f32 %v3166_v10, %v3140_v11  ;;  %v3171_v13 = vmul.f32 %v3167_v12, %v3154_v0 }
 0xec7   : > { %v3174_v44 = vadd.f32 %v3170_v31, %v3140_v11  ;;  %v3175_v15 = vadd.f32 %v3171_v13, %v3154_v0 }
 0xec9   : > { %v3178_v52 = vmul.f32 0.7978846, %v3174_v44  ;;  %v3179_v5 = vmul.f32 0.7978846, %v3175_v15  ;;  %v4703_v17 = vpop.eup %4702 }
 0xeca   : > { %v4705_v43 = vpop.eup %4704  ;;  %v3184_v39 = vadd.f32 1.0, %v4703_v17 }
 0xecb   : > { %4706 = vtanh.f32 %v3178_v52  ;;  %v3185_v18 = vadd.f32 1.0, %v4705_v43 }
 0xecc   : > { %4708 = vtanh.f32 %v3179_v5  ;;  %v3188_v37 = vmul.f32 %v3184_v39, %v3156_v8 }
 0xecd   : > { %v3189_v14 = vmul.f32 %v3185_v18, %v3157_v22 }
 0xed1   : > { %v4707_v58 = vpop.eup %4706 }
 0xed2   : > { %v4709_v62 = vpop.eup %4708  ;;  %v3186_v21 = vadd.f32 1.0, %v4707_v58 }
 0xed3   : > { %v3187_v53 = vadd.f32 1.0, %v4709_v62 }
 0xed4   : > { %v3190_v45 = vmul.f32 %v3186_v21, %v3158_v19 }
 0xed5   : > { %v3191_v55 = vmul.f32 %v3187_v53, %v3159_v23 }
 0xed6   : > { %v3192_v56 = vpack.c.bf16 %v3190_v45, %v3188_v37 }
 0xed7   : > { %v3193_v27 = vpack.c.bf16 %v3191_v55, %v3189_v14 }
 0xed8   : > { %3331 = vmatmul.bf16.vlgmr.msrb.gmra.mxu0 %v3192_v56 }
 0xed9   : > { %3345 = vmatmul.bf16.vlgmr.msra.gmra.mxu1 %v3193_v27 }
 0xf55   : > { %v3332_v51 = vpop.f32.mrf.mxu0 }
 0xf56   : > { %v3333_v28 = vadd.f32 %v3332_v51, %v3226_v34  ;;  %v3346_v29 = vpop.f32.mrf.mxu1 }
 0xf58   : > { %v3347_v30 = vadd.f32 %v3346_v29, %v3333_v28 }
 0xf5a   : > { %v3351_v41 = vadd.f32 %v3347_v30, %v6146_v33 }
 0xf5c   : > { %3353 = vadd.xlane.f32.xlu2 %v3351_v41 }
 0xf5d   : > { %v3334_v26 = vpop.f32.mrf.mxu0 }
 0xf5e   : > { %v3335_v40 = vadd.f32 %v3334_v26, %v3226_v34  ;;  %v3348_v50 = vpop.f32.mrf.mxu1 }
 0xf60   : > { %v3349_v46 = vadd.f32 %v3348_v50, %v3335_v40 }
 0xf62   : > { %v3352_v24 = vadd.f32 %v3349_v46, %v6148_v49 }
 0xf64   : > { %3355 = vadd.xlane.f32.xlu0 %v3352_v24 }
 0xfcf   : > { %v3354_v57 = vpop.xlane.xlu2 %3353 }
 0xfd0   : > { %v3357_v25 = vmul.f32 %v3354_v57, %v6096_v60 }
 0xfd2   : > { %v3359_v6 = vsub.f32 %v3351_v41, %v3357_v25 }
 0xfd4   : > { %v3361_v63 = vmul.f32 %v3359_v6, %v3359_v6 }
 0xfd6   : > { %3363 = vadd.xlane.f32.xlu1 %v3361_v63 }
 0xfd7   : > { %v3356_v48 = vpop.xlane.xlu0 %3355 }
 0xfd8   : > { %v3358_v47 = vmul.f32 %v3356_v48, %v6096_v60 }
 0xfda   : > { %v3360_v32 = vsub.f32 %v3352_v24, %v3358_v47 }
 0xfdc   : > { %v3362_v35 = vmul.f32 %v3360_v32, %v3360_v32 }
 0xfde   : > { %3365 = vadd.xlane.f32.xlu2 %v3362_v35 }
0x1049   : > { %v3364_v33 = vpop.xlane.xlu1 %3363 }
0x104a   : > { %v3367_v38 = vmul.f32 %v3364_v33, %v6096_v60 }
0x104c   : > { %v3369_v16 = vadd.f32 1e-05, %v3367_v38 }
0x104e   : > { %4710 = vrsqrt.f32 %v3369_v16  ;;  %vm3377_vm14 = vweird.f32 %v3369_v16 }
0x1051   : > { %v3366_v2 = vpop.xlane.xlu2 %3365 }
0x1052   : > { %v3368_v49 = vmul.f32 %v3366_v2, %v6096_v60 }
0x1054   : > { %v4711_v3 = vpop.eup %4710  ;;  %v3370_v59 = vadd.f32 1e-05, %v3368_v49 }
0x1055   : > { %v3372_v42 = vmul.f32 %v4711_v3, %v3369_v16  ;;  %vm3378_vm13 = vweird.f32 %v4711_v3 }
0x1056   : > { %4712 = vrsqrt.f32 %v3370_v59  ;;  %vm3379_vm15 = vmor %vm3377_vm14, %vm3378_vm13  ;;  %vm3387_vm1 = vweird.f32 %v3370_v59 }
0x1057   : > { %v3373_v4 = vmul.f32 %v4711_v3, %v3372_v42 }
0x1059   : > { %v3374_v36 = vmul.f32 0.5, %v3373_v4 }
0x105b   : > { %v3375_v11 = vsub.f32 1.5, %v3374_v36 }
0x105c   : > { %v4713_v0 = vpop.eup %4712 }
0x105d   : > { %v3376_v7 = vmul.f32 %v4711_v3, %v3375_v11  ;;  %v3382_v20 = vmul.f32 %v4713_v0, %v3370_v59  ;;  %vm3388_vm0 = vweird.f32 %v4713_v0 }
0x105e   : > { %vm3389_vm2 = vmor %vm3387_vm1, %vm3388_vm0 }
0x105f   : > { %v3380_v54 = vsel %vm3379_vm15, %v4711_v3, %v3376_v7  ;;  %v3383_v10 = vmul.f32 %v4713_v0, %v3382_v20 }
0x1060   : > { %v3391_v60 = vmul.f32 %v3380_v54, %v3359_v6 }
0x1061   : > { %v3384_v12 = vmul.f32 0.5, %v3383_v10 }
0x1062   : > { %v3394_v31 = vmul.f32 %v3393_v9, %v3391_v60 }
0x1063   : > { %v3385_v13 = vsub.f32 1.5, %v3384_v12 }
0x1064   : > { %v3397_v44 = vadd.f32 %v3396_v61, %v3394_v31 }
0x1065   : > { %v3386_v15 = vmul.f32 %v4713_v0, %v3385_v13 }
0x1066   : > { %3399 = vst [vmem:[#allocation2] sm:$0xff] %v3397_v44 }
0x1067   : > { %v3390_v52 = vsel %vm3389_vm2, %v4713_v0, %v3386_v15 }
0x1068   : > { %v3392_v5 = vmul.f32 %v3390_v52, %v3360_v32 }
0x106a   : > { %v3395_v17 = vmul.f32 %v3393_v9, %v3392_v5  ;;  %3404 = sbr.rel (%p4296_p5) target bundleno = 4337 (0x10f1), region = 152 }
0x106c   : > { %v3398_v43 = vadd.f32 %v3396_v61, %v3395_v17 }
0x106e   : > { %3400 = vst [vmem:[#allocation2 + $0x8] sm:$0xff] %v3398_v43 }
0x106f   : > { %3423 = vmatpush.msra.mxu0 %v3398_v43  ;;  %v3405_v1 = vld [vmem:[#allocation12] sm:$0x3] }
0x1071   : > { %3424 = vmatpush.msra.mxu0 %v3397_v44 }
0x1072   : > { %4297 = vmatmul.msk.f32.vlgmr.msra.gmra.mxu0 %vm2583_vm5, %v3405_v1 }
0x10ef   : > { %v3426_v39 = vpop.f32.mrf.mxu0 }
0x10f0   : > { %3429 = vst [vmem:[#allocation21] sm:$0x3] %v3426_v39 }
0x10f1 PF: > { %s6285_s24 = sld [smem:[#allocation30_spill]]  ;;  %s5203_s19 = smov [#allocation21]  }
0x10f2   : > { %s3436_s27 = sshll.u32 %s5203_s19, 4  ;;  %s6286_s30 = sld [smem:[#allocation46_spill]]  ;;  %s3437_s27 = int_to_ptr.vmem [resolvable:$true] %s3436_s27 }
0x10f7   : > { %p4553_p6 = scmp.eq.s32.totalorder %s6285_s24, 1 }
0x10f8   : > { %s3438_s2 = sshll.u32 %s6286_s30, 4  ;;  %s3439_s2 = int_to_ptr.hbm [resolvable:$true] %s3438_s2 }
0x10f9   : > { %4496 = dma.vmem_to_hbm [thread:$0]  (%p4553_p6), %s3437_s27, 32, %s3439_s2, [#allocation5]  }
0x10fa   : > { %5169 = dma.done.wait (%p4553_p6), [#allocation5], 32  }
0x10fb   : > { %5171 = vsyncadd (%p4553_p6), [#allocation5], 4294967264 }
0x10fc PF: > { %s6287_s30 = sld [smem:[#allocation33_spill]] }
0x10fd   : > { %s6288_s27 = sld [smem:[#allocation28_spill]] }
0x10fe   : > { %s6289_s28 = sld [smem:[#allocation29_spill]] }
0x10ff   : > { %s6290_s29 = sld [smem:[#allocation34_spill]] }
0x1102   : > { %p30_p0 = scmp.ge.s32.totalorder %s6287_s30, 4  }
0x1104   :  { %32 = sbr.rel (!%p30_p0) target bundleno = 19 (0x13), region = 226 }
0x1109   :  { %3452 = vsyncpa [#allocation4], 1 }
0x110a   :  { %3454 = vsyncpa [#allocation4 + $0x1], 1 }
0x110b   :  { %3455 = vsyncpa [#allocation7], 1 }
0x110c   :  { %3456 = vsyncpa [#allocation10], 1 }
0x110d   :  { %3457 = vsyncpa [#allocation13], 1 }
0x110e   :  { %3458 = vsyncpa [#allocation5], 1 }
0x110f   :  { %3460 = vsyncpa [#allocation5 + $0x1], 1 }

</bundles_post_ra>
